<compile_context>
chip_gen: v7x
topology: tpu7x:2x2x1
jax: 0.10.0
libtpu: 0.0.40
codegen_flags: <defaults>
</compile_context>

<pallas_src>
import math

import jax
import jax.numpy as jnp
from jax import lax
from jax.experimental import pallas as pl
from jax.experimental.pallas import tpu as pltpu


def _ltc_kernel(x_ref, wf_ref, wth_ref, bf_ref, lth_ref,
                spk_ref, tau_out_ref, v_out_ref,
                v_sc, tau_sc, act_sc):
    """One grid step = one (batch-tile, time-chunk).

    x_ref:       (TB, TT, Dp)   batch-major input chunk
    wf_ref:      (Dp, 2Dp)      fused [Wtx | Wmem] (in, out layout)
    wth_ref:     (Dp, Dp)       recurrent tau -> tau weights
    bf_ref:      (1, 2Dp)       fused [b_tau | b_mem]
    lth_ref:     (1, Dp)        log_thresh
    spk_ref:     (TB, TT, Dp)   spikes for this chunk (batch-major)
    tau/v_out:   (TB, Dp)       final recurrent state (written on last chunk)
    v_sc/tau_sc: (TB, Dp)       f32 recurrent state carried across time chunks
    act_sc:      (TB, TT, 2Dp)  f32 hoisted activations [xt@Wtx+bt | xt@Wm+bm]
    """
    t_blk = pl.program_id(1)

    @pl.when(t_blk == 0)
    def _init():
        v_sc[...] = jnp.zeros(v_sc.shape, v_sc.dtype)
        tau_sc[...] = jnp.ones(tau_sc.shape, tau_sc.dtype)

    TB, TT, Dp = x_ref.shape
    Dp2 = 2 * Dp

    thr = jax.nn.sigmoid(lth_ref[...])           # (1, Dp); EUP, cheap
    wth = wth_ref[...]                           # (Dp, Dp), resident in VMEM
    bf = bf_ref[...]                             # (1, 2Dp)

    # ---- hoisted non-recurrent matmul: whole chunk, M = TB*TT, N = 2*Dp ----
    if TT % 8 == 0:
        # (TB, TT, Dp) -> (TB*TT, Dp) is sublane-aligned => layout-free view.
        x2d = x_ref[...].reshape(TB * TT, Dp)
        act = jnp.dot(x2d, wf_ref[...], preferred_element_type=jnp.float32) + bf
        act_sc[...] = act.reshape(TB, TT, Dp2)
    else:
        # Unaligned time dim: hoist per batch row (still out of the time loop).
        xb = x_ref[...]
        for b in range(TB):
            act_sc[b] = (jnp.dot(xb[b], wf_ref[...],
                                 preferred_element_type=jnp.float32) + bf)

    # ---- serialized recurrence: only tau@Wth + cheap VPU/EUP work per step ----
    v = v_sc[...]
    tau = tau_sc[...]
    for t in range(TT):                          # static unroll (TT <= ~32)
        row = act_sc[:, t, :]                    # (TB, 2Dp)
        pre = row[:, :Dp]                        # xt@Wtx + bt
        mem = row[:, Dp:]                        # xt@Wm  + bm
        tau = jax.nn.sigmoid(
            pre + jnp.dot(tau, wth, preferred_element_type=jnp.float32))
        # EUP divide + EUP exp (approx reciprocal; may flip spikes exactly at
        # the threshold — accounted for in the tolerance-based test below).
        alpha = jnp.exp(-pl.reciprocal(tau + 1e-6, approx=True))
        v = alpha * v + (1.0 - alpha) * mem
        spike = v >= thr
        v = jnp.where(spike, 0.0, v)
        spk_ref[:, t, :] = spike.astype(spk_ref.dtype)

    v_sc[...] = v
    tau_sc[...] = tau

    @pl.when(t_blk == pl.num_programs(1) - 1)
    def _finalize():
        tau_out_ref[...] = tau.astype(tau_out_ref.dtype)
        v_out_ref[...] = v.astype(v_out_ref.dtype)


def ltc_block(x, w_tau, b_tau, w_mem, b_mem, log_thresh, *, time_chunk=16):
    """x: (B, T, D) f32; w_tau: (2D, D); w_mem: (D, D); biases/log_thresh: (D,).

    Weights are stored (in_features, out_features) so the kernel does x @ W + b.
    Returns (spikes (B,T,D), tau (B,D), v (B,D)).
    """
    B, T, D = x.shape
    dt = x.dtype

    # ---- lane-pad D up to a multiple of 128 (dense stores / full MXU lanes).
    # Padded weight rows/cols & bias lanes are zero so padded lanes never feed
    # back into real lanes; they are sliced off at the end. ----
    Dp = max(128, ((D + 127) // 128) * 128)
    dpad = Dp - D

    wtx = w_tau[:D]          # (D, D): input -> tau
    wth = w_tau[D:]          # (D, D): recurrent tau -> tau
    wm = w_mem
    bt, bm, lth = b_tau, b_mem, log_thresh
    if dpad:
        wtx = jnp.pad(wtx, ((0, dpad), (0, dpad)))
        wth = jnp.pad(wth, ((0, dpad), (0, dpad)))
        wm = jnp.pad(wm, ((0, dpad), (0, dpad)))
        bt = jnp.pad(bt, (0, dpad))
        bm = jnp.pad(bm, (0, dpad))
        lth = jnp.pad(lth, (0, dpad))

    # Fuse the two non-recurrent projections into one RHS / one bias row.
    wf = jnp.concatenate([wtx, wm], axis=1)          # (Dp, 2Dp)
    bf = jnp.concatenate([bt, bm]).reshape(1, 2 * Dp)
    lth2 = lth.reshape(1, Dp)

    # ---- pad batch to a multiple of 8 (full sublane occupancy); padded rows
    # are computed on zeros and sliced away. ----
    Bp = max(8, ((B + 7) // 8) * 8)
    bpad = Bp - B
    if dpad or bpad:
        x = jnp.pad(x, ((0, bpad), (0, 0), (0, dpad)))

    # Batch tile: modest cap (vreg pressure — MXU M now comes from TB*TT), and
    # prefer >= 2 batch tiles when B allows so megacore / v7x's 2 TCs both work.
    TB = 8
    for cand in (64, 32, 16, 8):
        if Bp % cand == 0:
            TB = cand
            break
    if Bp // TB < 2:
        for cand in (32, 16, 8):
            if Bp % cand == 0 and Bp // cand >= 2:
                TB = cand
                break

    # Time chunk: multiple of 8 dividing T (keeps the block & in-kernel reshape
    # tile-aligned), else the full T dim.  Amortizes per-grid-step overhead and
    # enlarges M = TB*TT of the hoisted matmul.
    TT = T
    for cand in (time_chunk, 32, 16, 8):
        if cand and cand % 8 == 0 and T % cand == 0:
            TT = cand
            break

    grid = (Bp // TB, T // TT)

    # Explicit VMEM budget (double-buffered x/spk chunks + resident weights +
    # scratch), with headroom; floor 32 MiB, cap 64 MiB (v7x physical).
    isz = jnp.dtype(dt).itemsize
    vmem_est = (
        2 * TB * TT * Dp * isz            # x chunk, double-buffered
        + 2 * TB * TT * Dp * isz          # spikes chunk, double-buffered
        + 2 * (Dp * 2 * Dp + Dp * Dp + 3 * Dp) * 4   # weights/biases (worst-case 2x)
        + 2 * 2 * TB * Dp * isz           # tau/v output blocks
        + (2 * TB * Dp + TB * TT * 2 * Dp) * 4       # scratches
    )
    vmem_limit = int(min(64 * 2**20, max(2 * vmem_est, 32 * 2**20)))

    spk, tau, v = pl.pallas_call(
        _ltc_kernel,
        out_shape=(
            jax.ShapeDtypeStruct((Bp, T, Dp), dt),    # spikes (batch-major)
            jax.ShapeDtypeStruct((Bp, Dp), dt),       # final tau
            jax.ShapeDtypeStruct((Bp, Dp), dt),       # final v
        ),
        grid=grid,
        in_specs=[
            pl.BlockSpec((TB, TT, Dp), lambda b, t: (b, t, 0)),     # x chunk
            pl.BlockSpec((Dp, 2 * Dp), lambda b, t: (0, 0)),        # [Wtx|Wm] resident
            pl.BlockSpec((Dp, Dp), lambda b, t: (0, 0)),            # Wth resident
            pl.BlockSpec((1, 2 * Dp), lambda b, t: (0, 0)),         # [bt|bm]
            pl.BlockSpec((1, Dp), lambda b, t: (0, 0)),             # log_thresh
        ],
        out_specs=(
            pl.BlockSpec((TB, TT, Dp), lambda b, t: (b, t, 0)),     # spikes chunk
            pl.BlockSpec((TB, Dp), lambda b, t: (b, 0)),            # tau (finalize)
            pl.BlockSpec((TB, Dp), lambda b, t: (b, 0)),            # v   (finalize)
        ),
        scratch_shapes=[
            pltpu.VMEM((TB, Dp), jnp.float32),          # v state
            pltpu.VMEM((TB, Dp), jnp.float32),          # tau state
            pltpu.VMEM((TB, TT, 2 * Dp), jnp.float32),  # hoisted activations
        ],
        compiler_params=pltpu.CompilerParams(
            dimension_semantics=("parallel", "arbitrary"),
            vmem_limit_bytes=vmem_limit),
    )(x, wf, wth, bf, lth2)

    return spk[:B, :, :D], tau[:B, :D], v[:B, :D]


def _ref_ltc(x, w_tau, b_tau, w_mem, b_mem, log_thresh):
    """Pure-JAX reference (eval-mode dropout = identity)."""
    B, T, D = x.shape
    hp = lax.Precision.HIGHEST
    wtx, wth = w_tau[:D], w_tau[D:]
    v = jnp.zeros((B, D), jnp.float32)
    tau = jnp.ones((B, D), jnp.float32)
    thr = jax.nn.sigmoid(log_thresh)
    spikes = []
    for t in range(T):
        xt = x[:, t, :]
        tau = jax.nn.sigmoid(jnp.dot(xt, wtx, precision=hp)
                             + jnp.dot(tau, wth, precision=hp) + b_tau)
        alpha = jnp.exp(-1.0 / (tau + 1e-6))
        v = alpha * v + (1.0 - alpha) * (jnp.dot(xt, w_mem, precision=hp) + b_mem)
        s = (v >= thr).astype(jnp.float32)
        v = v * (1.0 - s)
        spikes.append(s)
    return jnp.stack(spikes, axis=1), tau, v


if __name__ == "__main__":
    # Small shapes consistent with the module: (batch, seq, dim)
    B, T, D = 2, 8, 32

    key = jax.random.PRNGKey(0)
    kx, k1, k2, k3, k4 = jax.random.split(key, 5)

    x = jax.random.normal(kx, (B, T, D), dtype=jnp.float32)

    # nn.Linear-style init: uniform(-1/sqrt(fan_in), 1/sqrt(fan_in)),
    # weights stored (in_features, out_features) so the kernel does x @ W + b.
    bt_bound = 1.0 / math.sqrt(2 * D)
    w_tau = jax.random.uniform(k1, (2 * D, D), jnp.float32, -bt_bound, bt_bound)
    b_tau = jax.random.uniform(k2, (D,), jnp.float32, -bt_bound, bt_bound)
    bm_bound = 1.0 / math.sqrt(D)
    w_mem = jax.random.uniform(k3, (D, D), jnp.float32, -bm_bound, bm_bound)
    b_mem = jax.random.uniform(k4, (D,), jnp.float32, -bm_bound, bm_bound)
    log_thresh = jnp.zeros((D,), jnp.float32)   # matches torch.zeros(dim) init

    spikes, tau, v = ltc_block(x, w_tau, b_tau, w_mem, b_mem, log_thresh)
    spikes, tau, v = jax.block_until_ready((spikes, tau, v))

    assert spikes.shape == (B, T, D)
    assert tau.shape == (B, D)
    assert v.shape == (B, D)

    spikes_r, tau_r, v_r = _ref_ltc(x, w_tau, b_tau, w_mem, b_mem, log_thresh)

    # tau does not depend on v / alpha / spikes, so it differs from the
    # reference only by MXU accumulation order -> tight tolerance.
    assert jnp.allclose(tau, tau_r, atol=1e-4, rtol=1e-4), "tau mismatch"

    # spikes (and hence v, per-element) can legitimately flip for values that
    # land within the approx-reciprocal error of the threshold, so bound the
    # disagreement rate instead of demanding exact equality.
    spike_mismatch = float(jnp.mean((spikes != spikes_r).astype(jnp.float32)))
    assert spike_mismatch <= 0.05, f"spike mismatch rate {spike_mismatch}"
    v_bad = ~jnp.isclose(v, v_r, atol=5e-3, rtol=5e-3)
    v_bad_rate = float(jnp.mean(v_bad.astype(jnp.float32)))
    assert v_bad_rate <= 0.05, f"v mismatch rate {v_bad_rate}"

    print("KERNEL_OK")
</pallas_src>

<mosaic_0001>
module attributes {stable_mosaic.version = 11 : i64} {
  func.func @_ltc_kernel(%arg0: i32, %arg1: i32, %arg2: memref<8x8x128xf32, #tpu.memory_space<vmem>>, %arg3: memref<128x256xf32, #tpu.memory_space<vmem>>, %arg4: memref<128x128xf32, #tpu.memory_space<vmem>>, %arg5: memref<1x256xf32, #tpu.memory_space<vmem>>, %arg6: memref<1x128xf32, #tpu.memory_space<vmem>>, %arg7: memref<8x8x128xf32, #tpu.memory_space<vmem>>, %arg8: memref<8x128xf32, #tpu.memory_space<vmem>>, %arg9: memref<8x128xf32, #tpu.memory_space<vmem>>, %arg10: memref<8x128xf32, #tpu.memory_space<vmem>>, %arg11: memref<8x128xf32, #tpu.memory_space<vmem>>, %arg12: memref<8x8x256xf32, #tpu.memory_space<vmem>>) attributes {dimension_semantics = [#tpu.dimension_semantics<parallel>, #tpu.dimension_semantics<arbitrary>], iteration_bounds = array<i64: 1, 1>, scalar_prefetch = 0 : i64, scratch_operands = 3 : i64, tpu.core_type = #tpu.core_type<tc>, window_params = [{transform_indices = @transform_0, window_bounds = array<i64: 8, 8, 128>}, {pipeline_mode = #tpu.pipeline_mode<synchronous>, transform_indices = @transform_1, window_bounds = array<i64: 128, 256>}, {pipeline_mode = #tpu.pipeline_mode<synchronous>, transform_indices = @transform_2, window_bounds = array<i64: 128, 128>}, {pipeline_mode = #tpu.pipeline_mode<synchronous>, transform_indices = @transform_3, window_bounds = array<i64: 1, 256>}, {pipeline_mode = #tpu.pipeline_mode<synchronous>, transform_indices = @transform_4, window_bounds = array<i64: 1, 128>}, {transform_indices = @transform_5, window_bounds = array<i64: 8, 8, 128>}, {transform_indices = @transform_6, window_bounds = array<i64: 8, 128>}, {transform_indices = @transform_7, window_bounds = array<i64: 8, 128>}]} {
    %c0_i32 = arith.constant 0 : i32
    %0 = arith.cmpi eq, %arg1, %c0_i32 : i32
    %1 = arith.extui %0 : i1 to i32
    %c0_i32_0 = arith.constant 0 : i32
    %2 = arith.cmpi ne, %1, %c0_i32_0 : i32
    scf.if %2 {
      %cst_114 = arith.constant 0.000000e+00 : f32
      %274 = vector.broadcast %cst_114 : f32 to vector<8x128xf32>
      %c0_115 = arith.constant 0 : index
      %c0_116 = arith.constant 0 : index
      %275 = vector.load %arg10[%c0_115, %c0_116] : memref<8x128xf32, #tpu.memory_space<vmem>>, vector<8x128xf32>
      tpu.vector_store %arg10[%c0_115, %c0_116], %274 {strides = array<i32>} : memref<8x128xf32, #tpu.memory_space<vmem>>, vector<8x128xf32>,
      %cst_117 = arith.constant 1.000000e+00 : f32
      %276 = vector.broadcast %cst_117 : f32 to vector<8x128xf32>
      %c0_118 = arith.constant 0 : index
      %c0_119 = arith.constant 0 : index
      %277 = vector.load %arg11[%c0_118, %c0_119] : memref<8x128xf32, #tpu.memory_space<vmem>>, vector<8x128xf32>
      tpu.vector_store %arg11[%c0_118, %c0_119], %276 {strides = array<i32>} : memref<8x128xf32, #tpu.memory_space<vmem>>, vector<8x128xf32>,
    } else {
    }
    %c0 = arith.constant 0 : index
    %c0_1 = arith.constant 0 : index
    %3 = vector.load %arg6[%c0, %c0_1] : memref<1x128xf32, #tpu.memory_space<vmem>>, vector<1x128xf32>
    %4 = arith.negf %3 : vector<1x128xf32>
    %5 = math.exp %4 : vector<1x128xf32>
    %cst = arith.constant 1.000000e+00 : f32
    %6 = vector.broadcast %cst : f32 to vector<1x128xf32>
    %7 = arith.addf %6, %5 : vector<1x128xf32>
    %8 = arith.divf %6, %7 : vector<1x128xf32>
    %c0_2 = arith.constant 0 : index
    %c0_3 = arith.constant 0 : index
    %9 = vector.load %arg4[%c0_2, %c0_3] : memref<128x128xf32, #tpu.memory_space<vmem>>, vector<128x128xf32>
    %c0_4 = arith.constant 0 : index
    %c0_5 = arith.constant 0 : index
    %10 = vector.load %arg5[%c0_4, %c0_5] : memref<1x256xf32, #tpu.memory_space<vmem>>, vector<1x256xf32>
    %c0_6 = arith.constant 0 : index
    %c0_7 = arith.constant 0 : index
    %c0_8 = arith.constant 0 : index
    %11 = vector.load %arg2[%c0_6, %c0_7, %c0_8] : memref<8x8x128xf32, #tpu.memory_space<vmem>>, vector<8x8x128xf32>
    %12 = vector.shape_cast %11 : vector<8x8x128xf32> to vector<64x128xf32>
    %c0_9 = arith.constant 0 : index
    %c0_10 = arith.constant 0 : index
    %13 = vector.load %arg3[%c0_9, %c0_10] : memref<128x256xf32, #tpu.memory_space<vmem>>, vector<128x256xf32>
    %cst_11 = arith.constant dense<0.000000e+00> : vector<64x256xf32>
    %14 = tpu.matmul %12, %13, %cst_11 {dimension_numbers = #tpu.dot_dimension_numbers<[1], [0], [0], [1], [0, 0, 1, 1], [], []>} : vector<64x128xf32>, vector<128x256xf32>, vector<64x256xf32> -> vector<64x256xf32>
    %15 = vector.broadcast %10 : vector<1x256xf32> to vector<64x256xf32>
    %16 = arith.addf %14, %15 : vector<64x256xf32>
    %17 = vector.shape_cast %16 : vector<64x256xf32> to vector<8x8x256xf32>
    %c0_12 = arith.constant 0 : index
    %c0_13 = arith.constant 0 : index
    %c0_14 = arith.constant 0 : index
    %18 = vector.load %arg12[%c0_12, %c0_13, %c0_14] : memref<8x8x256xf32, #tpu.memory_space<vmem>>, vector<8x8x256xf32>
    tpu.vector_store %arg12[%c0_12, %c0_13, %c0_14], %17 {strides = array<i32>} : memref<8x8x256xf32, #tpu.memory_space<vmem>>, vector<8x8x256xf32>,
    %c0_15 = arith.constant 0 : index
    %c0_16 = arith.constant 0 : index
    %19 = vector.load %arg10[%c0_15, %c0_16] : memref<8x128xf32, #tpu.memory_space<vmem>>, vector<8x128xf32>
    %c0_17 = arith.constant 0 : index
    %c0_18 = arith.constant 0 : index
    %20 = vector.load %arg11[%c0_17, %c0_18] : memref<8x128xf32, #tpu.memory_space<vmem>>, vector<8x128xf32>
    %c0_19 = arith.constant 0 : index
    %c0_20 = arith.constant 0 : index
    %c0_21 = arith.constant 0 : index
    %21 = vector.load %arg12[%c0_19, %c0_20, %c0_21] : memref<8x8x256xf32, #tpu.memory_space<vmem>>, vector<8x1x256xf32>
    %22 = vector.shape_cast %21 : vector<8x1x256xf32> to vector<8x256xf32>
    %23 = vector.extract_strided_slice %22 {offsets = [0, 0], sizes = [8, 128], strides = [1, 1]} : vector<8x256xf32> to vector<8x128xf32>
    %24 = vector.extract_strided_slice %22 {offsets = [0, 128], sizes = [8, 128], strides = [1, 1]} : vector<8x256xf32> to vector<8x128xf32>
    %cst_22 = arith.constant dense<0.000000e+00> : vector<8x128xf32>
    %25 = tpu.matmul %20, %9, %cst_22 {dimension_numbers = #tpu.dot_dimension_numbers<[1], [0], [0], [1], [0, 0, 1, 1], [], []>} : vector<8x128xf32>, vector<128x128xf32>, vector<8x128xf32> -> vector<8x128xf32>
    %26 = arith.addf %23, %25 : vector<8x128xf32>
    %27 = arith.negf %26 : vector<8x128xf32>
    %28 = math.exp %27 : vector<8x128xf32>
    %cst_23 = arith.constant 1.000000e+00 : f32
    %29 = vector.broadcast %cst_23 : f32 to vector<8x128xf32>
    %30 = arith.addf %29, %28 : vector<8x128xf32>
    %31 = arith.divf %29, %30 : vector<8x128xf32>
    %cst_24 = arith.constant 9.99999997E-7 : f32
    %32 = vector.broadcast %cst_24 : f32 to vector<8x128xf32>
    %33 = arith.addf %31, %32 : vector<8x128xf32>
    %34 = tpu.reciprocal %33 {approx = true} : vector<8x128xf32> -> vector<8x128xf32>
    %cst_25 = arith.constant 0.000000e+00 : f32
    %35 = vector.broadcast %cst_25 : f32 to vector<8x128xf32>
    %36 = arith.subf %35, %34 : vector<8x128xf32>
    %37 = math.exp %36 : vector<8x128xf32>
    %38 = arith.mulf %37, %19 : vector<8x128xf32>
    %cst_26 = arith.constant 1.000000e+00 : f32
    %39 = vector.broadcast %cst_26 : f32 to vector<8x128xf32>
    %40 = arith.subf %39, %37 : vector<8x128xf32>
    %41 = arith.mulf %40, %24 : vector<8x128xf32>
    %42 = arith.addf %38, %41 : vector<8x128xf32>
    %43 = vector.broadcast %8 : vector<1x128xf32> to vector<8x128xf32>
    %44 = arith.cmpf oge, %42, %43 : vector<8x128xf32>
    %cst_27 = arith.constant 0.000000e+00 : f32
    %45 = vector.broadcast %cst_27 : f32 to vector<8x128xf32>
    %46 = arith.select %44, %45, %42 : vector<8x128xi1>, vector<8x128xf32>
    %47 = arith.extui %44 : vector<8x128xi1> to vector<8x128xi32>
    %48 = arith.sitofp %47 : vector<8x128xi32> to vector<8x128xf32>
    %c0_28 = arith.constant 0 : index
    %c0_29 = arith.constant 0 : index
    %c0_30 = arith.constant 0 : index
    %49 = vector.load %arg7[%c0_28, %c0_29, %c0_30] : memref<8x8x128xf32, #tpu.memory_space<vmem>>, vector<8x1x128xf32>
    %50 = vector.shape_cast %49 : vector<8x1x128xf32> to vector<8x128xf32>
    %51 = vector.shape_cast %48 : vector<8x128xf32> to vector<8x1x128xf32>
    tpu.vector_store %arg7[%c0_28, %c0_29, %c0_30], %51 {strides = array<i32>} : memref<8x8x128xf32, #tpu.memory_space<vmem>>, vector<8x1x128xf32>,
    %c0_31 = arith.constant 0 : index
    %c1 = arith.constant 1 : index
    %c0_32 = arith.constant 0 : index
    %52 = vector.load %arg12[%c0_31, %c1, %c0_32] : memref<8x8x256xf32, #tpu.memory_space<vmem>>, vector<8x1x256xf32>
    %53 = vector.shape_cast %52 : vector<8x1x256xf32> to vector<8x256xf32>
    %54 = vector.extract_strided_slice %53 {offsets = [0, 0], sizes = [8, 128], strides = [1, 1]} : vector<8x256xf32> to vector<8x128xf32>
    %55 = vector.extract_strided_slice %53 {offsets = [0, 128], sizes = [8, 128], strides = [1, 1]} : vector<8x256xf32> to vector<8x128xf32>
    %cst_33 = arith.constant dense<0.000000e+00> : vector<8x128xf32>
    %56 = tpu.matmul %31, %9, %cst_33 {dimension_numbers = #tpu.dot_dimension_numbers<[1], [0], [0], [1], [0, 0, 1, 1], [], []>} : vector<8x128xf32>, vector<128x128xf32>, vector<8x128xf32> -> vector<8x128xf32>
    %57 = arith.addf %54, %56 : vector<8x128xf32>
    %58 = arith.negf %57 : vector<8x128xf32>
    %59 = math.exp %58 : vector<8x128xf32>
    %cst_34 = arith.constant 1.000000e+00 : f32
    %60 = vector.broadcast %cst_34 : f32 to vector<8x128xf32>
    %61 = arith.addf %60, %59 : vector<8x128xf32>
    %62 = arith.divf %60, %61 : vector<8x128xf32>
    %cst_35 = arith.constant 9.99999997E-7 : f32
    %63 = vector.broadcast %cst_35 : f32 to vector<8x128xf32>
    %64 = arith.addf %62, %63 : vector<8x128xf32>
    %65 = tpu.reciprocal %64 {approx = true} : vector<8x128xf32> -> vector<8x128xf32>
    %cst_36 = arith.constant 0.000000e+00 : f32
    %66 = vector.broadcast %cst_36 : f32 to vector<8x128xf32>
    %67 = arith.subf %66, %65 : vector<8x128xf32>
    %68 = math.exp %67 : vector<8x128xf32>
    %69 = arith.mulf %68, %46 : vector<8x128xf32>
    %cst_37 = arith.constant 1.000000e+00 : f32
    %70 = vector.broadcast %cst_37 : f32 to vector<8x128xf32>
    %71 = arith.subf %70, %68 : vector<8x128xf32>
    %72 = arith.mulf %71, %55 : vector<8x128xf32>
    %73 = arith.addf %69, %72 : vector<8x128xf32>
    %74 = vector.broadcast %8 : vector<1x128xf32> to vector<8x128xf32>
    %75 = arith.cmpf oge, %73, %74 : vector<8x128xf32>
    %cst_38 = arith.constant 0.000000e+00 : f32
    %76 = vector.broadcast %cst_38 : f32 to vector<8x128xf32>
    %77 = arith.select %75, %76, %73 : vector<8x128xi1>, vector<8x128xf32>
    %78 = arith.extui %75 : vector<8x128xi1> to vector<8x128xi32>
    %79 = arith.sitofp %78 : vector<8x128xi32> to vector<8x128xf32>
    %c0_39 = arith.constant 0 : index
    %c1_40 = arith.constant 1 : index
    %c0_41 = arith.constant 0 : index
    %80 = vector.load %arg7[%c0_39, %c1_40, %c0_41] : memref<8x8x128xf32, #tpu.memory_space<vmem>>, vector<8x1x128xf32>
    %81 = vector.shape_cast %80 : vector<8x1x128xf32> to vector<8x128xf32>
    %82 = vector.shape_cast %79 : vector<8x128xf32> to vector<8x1x128xf32>
    tpu.vector_store %arg7[%c0_39, %c1_40, %c0_41], %82 {strides = array<i32>} : memref<8x8x128xf32, #tpu.memory_space<vmem>>, vector<8x1x128xf32>,
    %c0_42 = arith.constant 0 : index
    %c2 = arith.constant 2 : index
    %c0_43 = arith.constant 0 : index
    %83 = vector.load %arg12[%c0_42, %c2, %c0_43] : memref<8x8x256xf32, #tpu.memory_space<vmem>>, vector<8x1x256xf32>
    %84 = vector.shape_cast %83 : vector<8x1x256xf32> to vector<8x256xf32>
    %85 = vector.extract_strided_slice %84 {offsets = [0, 0], sizes = [8, 128], strides = [1, 1]} : vector<8x256xf32> to vector<8x128xf32>
    %86 = vector.extract_strided_slice %84 {offsets = [0, 128], sizes = [8, 128], strides = [1, 1]} : vector<8x256xf32> to vector<8x128xf32>
    %cst_44 = arith.constant dense<0.000000e+00> : vector<8x128xf32>
    %87 = tpu.matmul %62, %9, %cst_44 {dimension_numbers = #tpu.dot_dimension_numbers<[1], [0], [0], [1], [0, 0, 1, 1], [], []>} : vector<8x128xf32>, vector<128x128xf32>, vector<8x128xf32> -> vector<8x128xf32>
    %88 = arith.addf %85, %87 : vector<8x128xf32>
    %89 = arith.negf %88 : vector<8x128xf32>
    %90 = math.exp %89 : vector<8x128xf32>
    %cst_45 = arith.constant 1.000000e+00 : f32
    %91 = vector.broadcast %cst_45 : f32 to vector<8x128xf32>
    %92 = arith.addf %91, %90 : vector<8x128xf32>
    %93 = arith.divf %91, %92 : vector<8x128xf32>
    %cst_46 = arith.constant 9.99999997E-7 : f32
    %94 = vector.broadcast %cst_46 : f32 to vector<8x128xf32>
    %95 = arith.addf %93, %94 : vector<8x128xf32>
    %96 = tpu.reciprocal %95 {approx = true} : vector<8x128xf32> -> vector<8x128xf32>
    %cst_47 = arith.constant 0.000000e+00 : f32
    %97 = vector.broadcast %cst_47 : f32 to vector<8x128xf32>
    %98 = arith.subf %97, %96 : vector<8x128xf32>
    %99 = math.exp %98 : vector<8x128xf32>
    %100 = arith.mulf %99, %77 : vector<8x128xf32>
    %cst_48 = arith.constant 1.000000e+00 : f32
    %101 = vector.broadcast %cst_48 : f32 to vector<8x128xf32>
    %102 = arith.subf %101, %99 : vector<8x128xf32>
    %103 = arith.mulf %102, %86 : vector<8x128xf32>
    %104 = arith.addf %100, %103 : vector<8x128xf32>
    %105 = vector.broadcast %8 : vector<1x128xf32> to vector<8x128xf32>
    %106 = arith.cmpf oge, %104, %105 : vector<8x128xf32>
    %cst_49 = arith.constant 0.000000e+00 : f32
    %107 = vector.broadcast %cst_49 : f32 to vector<8x128xf32>
    %108 = arith.select %106, %107, %104 : vector<8x128xi1>, vector<8x128xf32>
    %109 = arith.extui %106 : vector<8x128xi1> to vector<8x128xi32>
    %110 = arith.sitofp %109 : vector<8x128xi32> to vector<8x128xf32>
    %c0_50 = arith.constant 0 : index
    %c2_51 = arith.constant 2 : index
    %c0_52 = arith.constant 0 : index
    %111 = vector.load %arg7[%c0_50, %c2_51, %c0_52] : memref<8x8x128xf32, #tpu.memory_space<vmem>>, vector<8x1x128xf32>
    %112 = vector.shape_cast %111 : vector<8x1x128xf32> to vector<8x128xf32>
    %113 = vector.shape_cast %110 : vector<8x128xf32> to vector<8x1x128xf32>
    tpu.vector_store %arg7[%c0_50, %c2_51, %c0_52], %113 {strides = array<i32>} : memref<8x8x128xf32, #tpu.memory_space<vmem>>, vector<8x1x128xf32>,
    %c0_53 = arith.constant 0 : index
    %c3 = arith.constant 3 : index
    %c0_54 = arith.constant 0 : index
    %114 = vector.load %arg12[%c0_53, %c3, %c0_54] : memref<8x8x256xf32, #tpu.memory_space<vmem>>, vector<8x1x256xf32>
    %115 = vector.shape_cast %114 : vector<8x1x256xf32> to vector<8x256xf32>
    %116 = vector.extract_strided_slice %115 {offsets = [0, 0], sizes = [8, 128], strides = [1, 1]} : vector<8x256xf32> to vector<8x128xf32>
    %117 = vector.extract_strided_slice %115 {offsets = [0, 128], sizes = [8, 128], strides = [1, 1]} : vector<8x256xf32> to vector<8x128xf32>
    %cst_55 = arith.constant dense<0.000000e+00> : vector<8x128xf32>
    %118 = tpu.matmul %93, %9, %cst_55 {dimension_numbers = #tpu.dot_dimension_numbers<[1], [0], [0], [1], [0, 0, 1, 1], [], []>} : vector<8x128xf32>, vector<128x128xf32>, vector<8x128xf32> -> vector<8x128xf32>
    %119 = arith.addf %116, %118 : vector<8x128xf32>
    %120 = arith.negf %119 : vector<8x128xf32>
    %121 = math.exp %120 : vector<8x128xf32>
    %cst_56 = arith.constant 1.000000e+00 : f32
    %122 = vector.broadcast %cst_56 : f32 to vector<8x128xf32>
    %123 = arith.addf %122, %121 : vector<8x128xf32>
    %124 = arith.divf %122, %123 : vector<8x128xf32>
    %cst_57 = arith.constant 9.99999997E-7 : f32
    %125 = vector.broadcast %cst_57 : f32 to vector<8x128xf32>
    %126 = arith.addf %124, %125 : vector<8x128xf32>
    %127 = tpu.reciprocal %126 {approx = true} : vector<8x128xf32> -> vector<8x128xf32>
    %cst_58 = arith.constant 0.000000e+00 : f32
    %128 = vector.broadcast %cst_58 : f32 to vector<8x128xf32>
    %129 = arith.subf %128, %127 : vector<8x128xf32>
    %130 = math.exp %129 : vector<8x128xf32>
    %131 = arith.mulf %130, %108 : vector<8x128xf32>
    %cst_59 = arith.constant 1.000000e+00 : f32
    %132 = vector.broadcast %cst_59 : f32 to vector<8x128xf32>
    %133 = arith.subf %132, %130 : vector<8x128xf32>
    %134 = arith.mulf %133, %117 : vector<8x128xf32>
    %135 = arith.addf %131, %134 : vector<8x128xf32>
    %136 = vector.broadcast %8 : vector<1x128xf32> to vector<8x128xf32>
    %137 = arith.cmpf oge, %135, %136 : vector<8x128xf32>
    %cst_60 = arith.constant 0.000000e+00 : f32
    %138 = vector.broadcast %cst_60 : f32 to vector<8x128xf32>
    %139 = arith.select %137, %138, %135 : vector<8x128xi1>, vector<8x128xf32>
    %140 = arith.extui %137 : vector<8x128xi1> to vector<8x128xi32>
    %141 = arith.sitofp %140 : vector<8x128xi32> to vector<8x128xf32>
    %c0_61 = arith.constant 0 : index
    %c3_62 = arith.constant 3 : index
    %c0_63 = arith.constant 0 : index
    %142 = vector.load %arg7[%c0_61, %c3_62, %c0_63] : memref<8x8x128xf32, #tpu.memory_space<vmem>>, vector<8x1x128xf32>
    %143 = vector.shape_cast %142 : vector<8x1x128xf32> to vector<8x128xf32>
    %144 = vector.shape_cast %141 : vector<8x128xf32> to vector<8x1x128xf32>
    tpu.vector_store %arg7[%c0_61, %c3_62, %c0_63], %144 {strides = array<i32>} : memref<8x8x128xf32, #tpu.memory_space<vmem>>, vector<8x1x128xf32>,
    %c0_64 = arith.constant 0 : index
    %c4 = arith.constant 4 : index
    %c0_65 = arith.constant 0 : index
    %145 = vector.load %arg12[%c0_64, %c4, %c0_65] : memref<8x8x256xf32, #tpu.memory_space<vmem>>, vector<8x1x256xf32>
    %146 = vector.shape_cast %145 : vector<8x1x256xf32> to vector<8x256xf32>
    %147 = vector.extract_strided_slice %146 {offsets = [0, 0], sizes = [8, 128], strides = [1, 1]} : vector<8x256xf32> to vector<8x128xf32>
    %148 = vector.extract_strided_slice %146 {offsets = [0, 128], sizes = [8, 128], strides = [1, 1]} : vector<8x256xf32> to vector<8x128xf32>
    %cst_66 = arith.constant dense<0.000000e+00> : vector<8x128xf32>
    %149 = tpu.matmul %124, %9, %cst_66 {dimension_numbers = #tpu.dot_dimension_numbers<[1], [0], [0], [1], [0, 0, 1, 1], [], []>} : vector<8x128xf32>, vector<128x128xf32>, vector<8x128xf32> -> vector<8x128xf32>
    %150 = arith.addf %147, %149 : vector<8x128xf32>
    %151 = arith.negf %150 : vector<8x128xf32>
    %152 = math.exp %151 : vector<8x128xf32>
    %cst_67 = arith.constant 1.000000e+00 : f32
    %153 = vector.broadcast %cst_67 : f32 to vector<8x128xf32>
    %154 = arith.addf %153, %152 : vector<8x128xf32>
    %155 = arith.divf %153, %154 : vector<8x128xf32>
    %cst_68 = arith.constant 9.99999997E-7 : f32
    %156 = vector.broadcast %cst_68 : f32 to vector<8x128xf32>
    %157 = arith.addf %155, %156 : vector<8x128xf32>
    %158 = tpu.reciprocal %157 {approx = true} : vector<8x128xf32> -> vector<8x128xf32>
    %cst_69 = arith.constant 0.000000e+00 : f32
    %159 = vector.broadcast %cst_69 : f32 to vector<8x128xf32>
    %160 = arith.subf %159, %158 : vector<8x128xf32>
    %161 = math.exp %160 : vector<8x128xf32>
    %162 = arith.mulf %161, %139 : vector<8x128xf32>
    %cst_70 = arith.constant 1.000000e+00 : f32
    %163 = vector.broadcast %cst_70 : f32 to vector<8x128xf32>
    %164 = arith.subf %163, %161 : vector<8x128xf32>
    %165 = arith.mulf %164, %148 : vector<8x128xf32>
    %166 = arith.addf %162, %165 : vector<8x128xf32>
    %167 = vector.broadcast %8 : vector<1x128xf32> to vector<8x128xf32>
    %168 = arith.cmpf oge, %166, %167 : vector<8x128xf32>
    %cst_71 = arith.constant 0.000000e+00 : f32
    %169 = vector.broadcast %cst_71 : f32 to vector<8x128xf32>
    %170 = arith.select %168, %169, %166 : vector<8x128xi1>, vector<8x128xf32>
    %171 = arith.extui %168 : vector<8x128xi1> to vector<8x128xi32>
    %172 = arith.sitofp %171 : vector<8x128xi32> to vector<8x128xf32>
    %c0_72 = arith.constant 0 : index
    %c4_73 = arith.constant 4 : index
    %c0_74 = arith.constant 0 : index
    %173 = vector.load %arg7[%c0_72, %c4_73, %c0_74] : memref<8x8x128xf32, #tpu.memory_space<vmem>>, vector<8x1x128xf32>
    %174 = vector.shape_cast %173 : vector<8x1x128xf32> to vector<8x128xf32>
    %175 = vector.shape_cast %172 : vector<8x128xf32> to vector<8x1x128xf32>
    tpu.vector_store %arg7[%c0_72, %c4_73, %c0_74], %175 {strides = array<i32>} : memref<8x8x128xf32, #tpu.memory_space<vmem>>, vector<8x1x128xf32>,
    %c0_75 = arith.constant 0 : index
    %c5 = arith.constant 5 : index
    %c0_76 = arith.constant 0 : index
    %176 = vector.load %arg12[%c0_75, %c5, %c0_76] : memref<8x8x256xf32, #tpu.memory_space<vmem>>, vector<8x1x256xf32>
    %177 = vector.shape_cast %176 : vector<8x1x256xf32> to vector<8x256xf32>
    %178 = vector.extract_strided_slice %177 {offsets = [0, 0], sizes = [8, 128], strides = [1, 1]} : vector<8x256xf32> to vector<8x128xf32>
    %179 = vector.extract_strided_slice %177 {offsets = [0, 128], sizes = [8, 128], strides = [1, 1]} : vector<8x256xf32> to vector<8x128xf32>
    %cst_77 = arith.constant dense<0.000000e+00> : vector<8x128xf32>
    %180 = tpu.matmul %155, %9, %cst_77 {dimension_numbers = #tpu.dot_dimension_numbers<[1], [0], [0], [1], [0, 0, 1, 1], [], []>} : vector<8x128xf32>, vector<128x128xf32>, vector<8x128xf32> -> vector<8x128xf32>
    %181 = arith.addf %178, %180 : vector<8x128xf32>
    %182 = arith.negf %181 : vector<8x128xf32>
    %183 = math.exp %182 : vector<8x128xf32>
    %cst_78 = arith.constant 1.000000e+00 : f32
    %184 = vector.broadcast %cst_78 : f32 to vector<8x128xf32>
    %185 = arith.addf %184, %183 : vector<8x128xf32>
    %186 = arith.divf %184, %185 : vector<8x128xf32>
    %cst_79 = arith.constant 9.99999997E-7 : f32
    %187 = vector.broadcast %cst_79 : f32 to vector<8x128xf32>
    %188 = arith.addf %186, %187 : vector<8x128xf32>
    %189 = tpu.reciprocal %188 {approx = true} : vector<8x128xf32> -> vector<8x128xf32>
    %cst_80 = arith.constant 0.000000e+00 : f32
    %190 = vector.broadcast %cst_80 : f32 to vector<8x128xf32>
    %191 = arith.subf %190, %189 : vector<8x128xf32>
    %192 = math.exp %191 : vector<8x128xf32>
    %193 = arith.mulf %192, %170 : vector<8x128xf32>
    %cst_81 = arith.constant 1.000000e+00 : f32
    %194 = vector.broadcast %cst_81 : f32 to vector<8x128xf32>
    %195 = arith.subf %194, %192 : vector<8x128xf32>
    %196 = arith.mulf %195, %179 : vector<8x128xf32>
    %197 = arith.addf %193, %196 : vector<8x128xf32>
    %198 = vector.broadcast %8 : vector<1x128xf32> to vector<8x128xf32>
    %199 = arith.cmpf oge, %197, %198 : vector<8x128xf32>
    %cst_82 = arith.constant 0.000000e+00 : f32
    %200 = vector.broadcast %cst_82 : f32 to vector<8x128xf32>
    %201 = arith.select %199, %200, %197 : vector<8x128xi1>, vector<8x128xf32>
    %202 = arith.extui %199 : vector<8x128xi1> to vector<8x128xi32>
    %203 = arith.sitofp %202 : vector<8x128xi32> to vector<8x128xf32>
    %c0_83 = arith.constant 0 : index
    %c5_84 = arith.constant 5 : index
    %c0_85 = arith.constant 0 : index
    %204 = vector.load %arg7[%c0_83, %c5_84, %c0_85] : memref<8x8x128xf32, #tpu.memory_space<vmem>>, vector<8x1x128xf32>
    %205 = vector.shape_cast %204 : vector<8x1x128xf32> to vector<8x128xf32>
    %206 = vector.shape_cast %203 : vector<8x128xf32> to vector<8x1x128xf32>
    tpu.vector_store %arg7[%c0_83, %c5_84, %c0_85], %206 {strides = array<i32>} : memref<8x8x128xf32, #tpu.memory_space<vmem>>, vector<8x1x128xf32>,
    %c0_86 = arith.constant 0 : index
    %c6 = arith.constant 6 : index
    %c0_87 = arith.constant 0 : index
    %207 = vector.load %arg12[%c0_86, %c6, %c0_87] : memref<8x8x256xf32, #tpu.memory_space<vmem>>, vector<8x1x256xf32>
    %208 = vector.shape_cast %207 : vector<8x1x256xf32> to vector<8x256xf32>
    %209 = vector.extract_strided_slice %208 {offsets = [0, 0], sizes = [8, 128], strides = [1, 1]} : vector<8x256xf32> to vector<8x128xf32>
    %210 = vector.extract_strided_slice %208 {offsets = [0, 128], sizes = [8, 128], strides = [1, 1]} : vector<8x256xf32> to vector<8x128xf32>
    %cst_88 = arith.constant dense<0.000000e+00> : vector<8x128xf32>
    %211 = tpu.matmul %186, %9, %cst_88 {dimension_numbers = #tpu.dot_dimension_numbers<[1], [0], [0], [1], [0, 0, 1, 1], [], []>} : vector<8x128xf32>, vector<128x128xf32>, vector<8x128xf32> -> vector<8x128xf32>
    %212 = arith.addf %209, %211 : vector<8x128xf32>
    %213 = arith.negf %212 : vector<8x128xf32>
    %214 = math.exp %213 : vector<8x128xf32>
    %cst_89 = arith.constant 1.000000e+00 : f32
    %215 = vector.broadcast %cst_89 : f32 to vector<8x128xf32>
    %216 = arith.addf %215, %214 : vector<8x128xf32>
    %217 = arith.divf %215, %216 : vector<8x128xf32>
    %cst_90 = arith.constant 9.99999997E-7 : f32
    %218 = vector.broadcast %cst_90 : f32 to vector<8x128xf32>
    %219 = arith.addf %217, %218 : vector<8x128xf32>
    %220 = tpu.reciprocal %219 {approx = true} : vector<8x128xf32> -> vector<8x128xf32>
    %cst_91 = arith.constant 0.000000e+00 : f32
    %221 = vector.broadcast %cst_91 : f32 to vector<8x128xf32>
    %222 = arith.subf %221, %220 : vector<8x128xf32>
    %223 = math.exp %222 : vector<8x128xf32>
    %224 = arith.mulf %223, %201 : vector<8x128xf32>
    %cst_92 = arith.constant 1.000000e+00 : f32
    %225 = vector.broadcast %cst_92 : f32 to vector<8x128xf32>
    %226 = arith.subf %225, %223 : vector<8x128xf32>
    %227 = arith.mulf %226, %210 : vector<8x128xf32>
    %228 = arith.addf %224, %227 : vector<8x128xf32>
    %229 = vector.broadcast %8 : vector<1x128xf32> to vector<8x128xf32>
    %230 = arith.cmpf oge, %228, %229 : vector<8x128xf32>
    %cst_93 = arith.constant 0.000000e+00 : f32
    %231 = vector.broadcast %cst_93 : f32 to vector<8x128xf32>
    %232 = arith.select %230, %231, %228 : vector<8x128xi1>, vector<8x128xf32>
    %233 = arith.extui %230 : vector<8x128xi1> to vector<8x128xi32>
    %234 = arith.sitofp %233 : vector<8x128xi32> to vector<8x128xf32>
    %c0_94 = arith.constant 0 : index
    %c6_95 = arith.constant 6 : index
    %c0_96 = arith.constant 0 : index
    %235 = vector.load %arg7[%c0_94, %c6_95, %c0_96] : memref<8x8x128xf32, #tpu.memory_space<vmem>>, vector<8x1x128xf32>
    %236 = vector.shape_cast %235 : vector<8x1x128xf32> to vector<8x128xf32>
    %237 = vector.shape_cast %234 : vector<8x128xf32> to vector<8x1x128xf32>
    tpu.vector_store %arg7[%c0_94, %c6_95, %c0_96], %237 {strides = array<i32>} : memref<8x8x128xf32, #tpu.memory_space<vmem>>, vector<8x1x128xf32>,
    %c0_97 = arith.constant 0 : index
    %c7 = arith.constant 7 : index
    %c0_98 = arith.constant 0 : index
    %238 = vector.load %arg12[%c0_97, %c7, %c0_98] : memref<8x8x256xf32, #tpu.memory_space<vmem>>, vector<8x1x256xf32>
    %239 = vector.shape_cast %238 : vector<8x1x256xf32> to vector<8x256xf32>
    %240 = vector.extract_strided_slice %239 {offsets = [0, 0], sizes = [8, 128], strides = [1, 1]} : vector<8x256xf32> to vector<8x128xf32>
    %241 = vector.extract_strided_slice %239 {offsets = [0, 128], sizes = [8, 128], strides = [1, 1]} : vector<8x256xf32> to vector<8x128xf32>
    %cst_99 = arith.constant dense<0.000000e+00> : vector<8x128xf32>
    %242 = tpu.matmul %217, %9, %cst_99 {dimension_numbers = #tpu.dot_dimension_numbers<[1], [0], [0], [1], [0, 0, 1, 1], [], []>} : vector<8x128xf32>, vector<128x128xf32>, vector<8x128xf32> -> vector<8x128xf32>
    %243 = arith.addf %240, %242 : vector<8x128xf32>
    %244 = arith.negf %243 : vector<8x128xf32>
    %245 = math.exp %244 : vector<8x128xf32>
    %cst_100 = arith.constant 1.000000e+00 : f32
    %246 = vector.broadcast %cst_100 : f32 to vector<8x128xf32>
    %247 = arith.addf %246, %245 : vector<8x128xf32>
    %248 = arith.divf %246, %247 : vector<8x128xf32>
    %cst_101 = arith.constant 9.99999997E-7 : f32
    %249 = vector.broadcast %cst_101 : f32 to vector<8x128xf32>
    %250 = arith.addf %248, %249 : vector<8x128xf32>
    %251 = tpu.reciprocal %250 {approx = true} : vector<8x128xf32> -> vector<8x128xf32>
    %cst_102 = arith.constant 0.000000e+00 : f32
    %252 = vector.broadcast %cst_102 : f32 to vector<8x128xf32>
    %253 = arith.subf %252, %251 : vector<8x128xf32>
    %254 = math.exp %253 : vector<8x128xf32>
    %255 = arith.mulf %254, %232 : vector<8x128xf32>
    %cst_103 = arith.constant 1.000000e+00 : f32
    %256 = vector.broadcast %cst_103 : f32 to vector<8x128xf32>
    %257 = arith.subf %256, %254 : vector<8x128xf32>
    %258 = arith.mulf %257, %241 : vector<8x128xf32>
    %259 = arith.addf %255, %258 : vector<8x128xf32>
    %260 = vector.broadcast %8 : vector<1x128xf32> to vector<8x128xf32>
    %261 = arith.cmpf oge, %259, %260 : vector<8x128xf32>
    %cst_104 = arith.constant 0.000000e+00 : f32
    %262 = vector.broadcast %cst_104 : f32 to vector<8x128xf32>
    %263 = arith.select %261, %262, %259 : vector<8x128xi1>, vector<8x128xf32>
    %264 = arith.extui %261 : vector<8x128xi1> to vector<8x128xi32>
    %265 = arith.sitofp %264 : vector<8x128xi32> to vector<8x128xf32>
    %c0_105 = arith.constant 0 : index
    %c7_106 = arith.constant 7 : index
    %c0_107 = arith.constant 0 : index
    %266 = vector.load %arg7[%c0_105, %c7_106, %c0_107] : memref<8x8x128xf32, #tpu.memory_space<vmem>>, vector<8x1x128xf32>
    %267 = vector.shape_cast %266 : vector<8x1x128xf32> to vector<8x128xf32>
    %268 = vector.shape_cast %265 : vector<8x128xf32> to vector<8x1x128xf32>
    tpu.vector_store %arg7[%c0_105, %c7_106, %c0_107], %268 {strides = array<i32>} : memref<8x8x128xf32, #tpu.memory_space<vmem>>, vector<8x1x128xf32>,
    %c0_108 = arith.constant 0 : index
    %c0_109 = arith.constant 0 : index
    %269 = vector.load %arg10[%c0_108, %c0_109] : memref<8x128xf32, #tpu.memory_space<vmem>>, vector<8x128xf32>
    tpu.vector_store %arg10[%c0_108, %c0_109], %263 {strides = array<i32>} : memref<8x128xf32, #tpu.memory_space<vmem>>, vector<8x128xf32>,
    %c0_110 = arith.constant 0 : index
    %c0_111 = arith.constant 0 : index
    %270 = vector.load %arg11[%c0_110, %c0_111] : memref<8x128xf32, #tpu.memory_space<vmem>>, vector<8x128xf32>
    tpu.vector_store %arg11[%c0_110, %c0_111], %248 {strides = array<i32>} : memref<8x128xf32, #tpu.memory_space<vmem>>, vector<8x128xf32>,
    %c0_i32_112 = arith.constant 0 : i32
    %271 = arith.cmpi eq, %arg1, %c0_i32_112 : i32
    %272 = arith.extui %271 : i1 to i32
    %c0_i32_113 = arith.constant 0 : i32
    %273 = arith.cmpi ne, %272, %c0_i32_113 : i32
    scf.if %273 {
      %c0_114 = arith.constant 0 : index
      %c0_115 = arith.constant 0 : index
      %274 = vector.load %arg8[%c0_114, %c0_115] : memref<8x128xf32, #tpu.memory_space<vmem>>, vector<8x128xf32>
      tpu.vector_store %arg8[%c0_114, %c0_115], %248 {strides = array<i32>} : memref<8x128xf32, #tpu.memory_space<vmem>>, vector<8x128xf32>,
      %c0_116 = arith.constant 0 : index
      %c0_117 = arith.constant 0 : index
      %275 = vector.load %arg9[%c0_116, %c0_117] : memref<8x128xf32, #tpu.memory_space<vmem>>, vector<8x128xf32>
      tpu.vector_store %arg9[%c0_116, %c0_117], %263 {strides = array<i32>} : memref<8x128xf32, #tpu.memory_space<vmem>>, vector<8x128xf32>,
    } else {
    }
    return
  }
  func.func @transform_0(%arg0: i32, %arg1: i32) -> (i32, i32, i32) {
    %c0_i32 = arith.constant 0 : i32
    %c0_i32_0 = arith.constant 0 : i32
    return %arg0, %arg1, %c0_i32 : i32, i32, i32
  }
  func.func @transform_1(%arg0: i32, %arg1: i32) -> (i32, i32) {
    %c0_i32 = arith.constant 0 : i32
    %c0_i32_0 = arith.constant 0 : i32
    %c0_i32_1 = arith.constant 0 : i32
    return %c0_i32, %c0_i32_0 : i32, i32
  }
  func.func @transform_2(%arg0: i32, %arg1: i32) -> (i32, i32) {
    %c0_i32 = arith.constant 0 : i32
    %c0_i32_0 = arith.constant 0 : i32
    %c0_i32_1 = arith.constant 0 : i32
    return %c0_i32, %c0_i32_0 : i32, i32
  }
  func.func @transform_3(%arg0: i32, %arg1: i32) -> (i32, i32) {
    %c0_i32 = arith.constant 0 : i32
    %c0_i32_0 = arith.constant 0 : i32
    %c0_i32_1 = arith.constant 0 : i32
    return %c0_i32, %c0_i32_0 : i32, i32
  }
  func.func @transform_4(%arg0: i32, %arg1: i32) -> (i32, i32) {
    %c0_i32 = arith.constant 0 : i32
    %c0_i32_0 = arith.constant 0 : i32
    %c0_i32_1 = arith.constant 0 : i32
    return %c0_i32, %c0_i32_0 : i32, i32
  }
  func.func @transform_5(%arg0: i32, %arg1: i32) -> (i32, i32, i32) {
    %c0_i32 = arith.constant 0 : i32
    %c0_i32_0 = arith.constant 0 : i32
    return %arg0, %arg1, %c0_i32 : i32, i32, i32
  }
  func.func @transform_6(%arg0: i32, %arg1: i32) -> (i32, i32) {
    %c0_i32 = arith.constant 0 : i32
    %c0_i32_0 = arith.constant 0 : i32
    return %arg0, %c0_i32 : i32, i32
  }
  func.func @transform_7(%arg0: i32, %arg1: i32) -> (i32, i32) {
    %c0_i32 = arith.constant 0 : i32
    %c0_i32_0 = arith.constant 0 : i32
    return %arg0, %c0_i32 : i32, i32
  }
}

</mosaic_0001>

<bundles_post_ra>
// kernel: tpu_custom_call.1
= control target key start
LH: loop header
LB: loop body
LE: loop exit
PB: predicated region body
PF: predicated region fallthrough
CT: control target
= control target key end

     0   :  { %13 = vsyncpa [#allocation6], 0  ;;  %s6318_s0 = inlined_call_operand.hbm [shape: f32[8,8,128], index: 0, kind: input, shape index: {}]   ;;  %s6319_s1 = inlined_call_operand.hbm [shape: f32[128,256], index: 1, kind: input, shape index: {}]   ;;  %s6320_s2 = inlined_call_operand.hbm [shape: f32[128,128], index: 2, kind: input, shape index: {}]   ;;  %s6321_s3 = inlined_call_operand.vmem [shape: f32[1,256], index: 3, kind: input, shape index: {}]   ;;  %s6322_s4 = inlined_call_operand.vmem [shape: f32[1,128], index: 4, kind: input, shape index: {}]   ;;  %s6323_s5 = inlined_call_operand.hbm [shape: f32[8,8,128], index: 5, kind: output, shape index: {0}]   ;;  %s6324_s6 = inlined_call_operand.hbm [shape: f32[8,128], index: 6, kind: output, shape index: {1}]   ;;  %s6325_s7 = inlined_call_operand.hbm [shape: f32[8,128], index: 7, kind: output, shape index: {2}]  }
   0x1   :  { %14 = vsyncpa [#allocation9], 0 }
   0x2   :  { %15 = vsyncpa [#allocation7], 0 }
   0x3   :  { %16 = vsyncpa [#allocation13], 0  ;;  %s5099_s24 = smov [#allocation8]   ;;  %s4959_s28 = scalar_lea.hbm %s6319_s1, 4096 }
   0x4   :  { %s34_s25 = sshll.u32 %s5099_s24, 4  ;;  %p4960_p0 = scmp.ne.s32.totalorder %s6319_s1, %s4959_s28  ;;  %s35_s25 = int_to_ptr.vmem [resolvable:$true] %s34_s25 }
   0x5   :  { %p4963_p1 = scmp.lt.u32.totalorder %s4959_s28, %s6319_s1 }
   0x7   :  { %p4965_p2 = pnand %p4963_p1, %p4960_p0 }
   0x9   :  { %4968 = shalt.err (!%p4965_p2)
}
   0xa   :  { %s4969_s10 = scalar_lea.vmem %s35_s25, 4096  ;;  %p4974_p4 = scmp.lt.s32.totalorder %s35_s25, %s35_s25 }
   0xb   :  { %p4970_p3 = scmp.ne.s32.totalorder %s35_s25, %s4969_s10  ;;  %p4975_p5 = scmp.lt.s32.totalorder %s4969_s10, %s4969_s10 }
   0xd   :  { %p4976_p6 = por %p4975_p5, %p4974_p4 }
   0xf   :  { %p4977_p7 = pnand %p4976_p6, %p4970_p3 }
  0x11   :  { %4980 = shalt.err (!%p4977_p7)
}
  0x12   :  { %s5100_s11 = smov 256   ;;  %s5101_s12 = smov 16  }
  0x13   :  { %40 = dma.hbm_to_vmem [thread:$0]  %s6319_s1, 4096, %s35_s25, [#allocation9], %s5100_s11, %s5100_s11, %s5101_s12  }
  0x14   :  { %s5102_s15 = smov [#allocation5]   ;;  %s4981_s19 = scalar_lea.hbm %s6318_s0, 1024 }
  0x15   :  { %s22_s16 = sshll.u32 %s5102_s15, 4  ;;  %p4982_p8 = scmp.ne.s32.totalorder %s6318_s0, %s4981_s19  ;;  %s23_s16 = int_to_ptr.vmem [resolvable:$true] %s22_s16 }
  0x16   :  { %p4985_p9 = scmp.lt.u32.totalorder %s4981_s19, %s6318_s0 }
  0x18   :  { %p4987_p10 = pnand %p4985_p9, %p4982_p8 }
  0x1a   :  { %4990 = shalt.err (!%p4987_p10)
}
  0x1b   :  { %s4991_s24 = scalar_lea.vmem %s23_s16, 1024  ;;  %p4996_p12 = scmp.lt.s32.totalorder %s23_s16, %s23_s16 }
  0x1c   :  { %p4992_p11 = scmp.ne.s32.totalorder %s23_s16, %s4991_s24  ;;  %p4997_p13 = scmp.lt.s32.totalorder %s4991_s24, %s4991_s24 }
  0x1e   :  { %p4998_p0 = por %p4997_p13, %p4996_p12 }
  0x20   :  { %p4999_p1 = pnand %p4998_p0, %p4992_p11 }
  0x22   :  { %5002 = shalt.err (!%p4999_p1)
}
  0x23   :  { %s5103_s1 = smov 128   ;;  %s5104_s25 = smov 8  }
  0x24   :  { %28 = dma.hbm_to_vmem [thread:$0]  %s6318_s0, 1024, %s23_s16, [#allocation6], %s5103_s1, %s5103_s1, %s5104_s25  }
  0x25   :  { %s5105_s28 = smov [#allocation10]   ;;  %s5003_s9 = scalar_lea.hbm %s6320_s2, 2048 }
  0x26   :  { %s46_s29 = sshll.u32 %s5105_s28, 4  ;;  %p5004_p2 = scmp.ne.s32.totalorder %s6320_s2, %s5003_s9  ;;  %s47_s29 = int_to_ptr.vmem [resolvable:$true] %s46_s29 }
  0x27   :  { %p5007_p3 = scmp.lt.u32.totalorder %s5003_s9, %s6320_s2 }
  0x29   :  { %p5009_p4 = pnand %p5007_p3, %p5004_p2 }
  0x2b   :  { %5012 = shalt.err (!%p5009_p4)
}
  0x2c   :  { %s5013_s14 = scalar_lea.vmem %s47_s29, 2048  ;;  %p5018_p6 = scmp.lt.s32.totalorder %s47_s29, %s47_s29 }
  0x2d   :  { %p5014_p5 = scmp.ne.s32.totalorder %s47_s29, %s5013_s14  ;;  %p5019_p7 = scmp.lt.s32.totalorder %s5013_s14, %s5013_s14 }
  0x2f   :  { %p5020_p8 = por %p5019_p7, %p5018_p6 }
  0x31   :  { %p5021_p9 = pnand %p5020_p8, %p5014_p5 }
  0x33   :  { %5024 = shalt.err (!%p5021_p9)
}
  0x34   :  { %52 = dma.hbm_to_vmem [thread:$0]  %s6320_s2, 2048, %s47_s29, [#allocation9], %s5103_s1, %s5103_s1, %s5104_s25  }
  0x35   :  { %5091 = dma.done.wait [#allocation6], 1024  }
  0x36   :  { %5092 = vsyncadd [#allocation6], 4294966272 }
  0x37   :  { %5093 = dma.done.wait [#allocation9], 6144  }
  0x38   :  { %5094 = vsyncadd [#allocation9], 4294961152  ;;  %v5106_v0 = vmov 0.0|0.0   ;;  %v5107_v1 = vmov 0.0   ;;  %vm5108_vm0 = vmmov 0   ;;  %v105_v2 = vld [vmem:[#allocation8 + $0x8] sm:$0xff] }
  0x39   :  { %4236 = vmatprep.subr.bf16.mxu1 %v5106_v0  ;;  %211 = vmatprep.mubr.f32.mxu0 %v5107_v1  ;;  %v107_v3 = vld [vmem:[#allocation8 + $0x18] sm:$0xff]  ;;  %v104_v4 = vld [vmem:[#allocation8] sm:$0xff]  ;;  %v106_v6 = vld [vmem:[#allocation8 + $0x10] sm:$0xff] }
  0x3a   :  { %3956 = vmatprep.mubr.msk.f32.mxu1 %vm5108_vm0, %v5107_v1  ;;  %v4204_v5 = vpack.c.bf16 %v107_v3, %v105_v2  ;;  %v109_v7 = vld [vmem:[#allocation8 + $0x28] sm:$0xff]  ;;  %v111_v8 = vld [vmem:[#allocation8 + $0x38] sm:$0xff]  ;;  %v4206_v9 = vpack.c.bf16 %v106_v6, %v104_v4  ;;  %v108_v11 = vld [vmem:[#allocation8 + $0x20] sm:$0xff] }
  0x3b   :  { %v4208_v10 = vpack.c.bf16 %v111_v8, %v109_v7  ;;  %v110_v12 = vld [vmem:[#allocation8 + $0x30] sm:$0xff]  ;;  %v113_v13 = vld [vmem:[#allocation8 + $0x48] sm:$0xff]  ;;  %v115_v14 = vld [vmem:[#allocation8 + $0x58] sm:$0xff] }
  0x3c   :  { %4205 = vmatprep.subr.bf16.mxu0 %v4204_v5  ;;  %v79_v15 = vld [vmem:[#allocation10] sm:$0xff]  ;;  %v80_v16 = vld [vmem:[#allocation10 + $0x8] sm:$0xff]  ;;  %v4210_v17 = vpack.c.bf16 %v110_v12, %v108_v11  ;;  %v4212_v20 = vpack.c.bf16 %v115_v14, %v113_v13  ;;  %v114_v21 = vld [vmem:[#allocation8 + $0x50] sm:$0xff]  ;;  %v5109_v14 = vmov 1.0  }
  0x3d   :  { %4207 = vmatpush1.bf16.msra.mxu0 %v4206_v9  ;;  %v5200_v18 = vpack.c.bf16 %v80_v16, %v79_v15  ;;  %v112_v19 = vld [vmem:[#allocation8 + $0x40] sm:$0xff]  ;;  %v81_v22 = vld [vmem:[#allocation10 + $0x10] sm:$0xff]  ;;  %v82_v23 = vld [vmem:[#allocation10 + $0x18] sm:$0xff] }
  0x3e   :  { %4209 = vmatprep.subr.bf16.mxu0 %v4208_v10  ;;  %v117_v24 = vld [vmem:[#allocation8 + $0x68] sm:$0xff]  ;;  %v119_v25 = vld [vmem:[#allocation8 + $0x78] sm:$0xff]  ;;  %v5203_v26 = vpack.c.bf16 %v82_v23, %v81_v22  ;;  %v83_v27 = vld [vmem:[#allocation10 + $0x20] sm:$0xff]  ;;  %v4214_v29 = vpack.c.bf16 %v114_v21, %v112_v19  ;;  %v137_v22 = vlaneseq }
  0x3f   :  { %4238 = vmatpush3.bf16.msra.mxu1 %v5200_v18  ;;  %v84_v28 = vld [vmem:[#allocation10 + $0x28] sm:$0xff]  ;;  %v4216_v30 = vpack.c.bf16 %v119_v25, %v117_v24  ;;  %v116_v31 = vld [vmem:[#allocation8 + $0x60] sm:$0xff]  ;;  %v118_v32 = vld [vmem:[#allocation8 + $0x70] sm:$0xff]  ;;  %v5110_v24 = vmov 1966171168  }
  0x40   :  { %4239 = vmatprep.subr.bf16.mxu1 %v5106_v0  ;;  %v121_v33 = vld [vmem:[#allocation8 + $0x88] sm:$0xff]  ;;  %v123_v34 = vld [vmem:[#allocation8 + $0x98] sm:$0xff]  ;;  %v5207_v35 = vpack.c.bf16 %v84_v28, %v83_v27  ;;  %v85_v36 = vld [vmem:[#allocation10 + $0x30] sm:$0xff]  ;;  %v4218_v38 = vpack.c.bf16 %v118_v32, %v116_v31  ;;  %v5276_v23 = vshrl.u32 %v137_v22, 7  ;;  %v366_v25 = vunpack.c.l.s4 %v5110_v24 }
  0x41   :  { %4211 = vmatpush1.bf16.msra.mxu0 %v4210_v17  ;;  %v86_v37 = vld [vmem:[#allocation10 + $0x38] sm:$0xff]  ;;  %v4220_v39 = vpack.c.bf16 %v123_v34, %v121_v33  ;;  %v120_v40 = vld [vmem:[#allocation8 + $0x80] sm:$0xff]  ;;  %v122_v41 = vld [vmem:[#allocation8 + $0x90] sm:$0xff] }
  0x42   :  { %4213 = vmatprep.subr.bf16.mxu0 %v4212_v20  ;;  %v125_v42 = vld [vmem:[#allocation8 + $0xa8] sm:$0xff]  ;;  %v127_v43 = vld [vmem:[#allocation8 + $0xb8] sm:$0xff]  ;;  %v5211_v44 = vpack.c.bf16 %v86_v37, %v85_v36  ;;  %v87_v45 = vld [vmem:[#allocation10 + $0x40] sm:$0xff]  ;;  %v4222_v47 = vpack.c.bf16 %v122_v41, %v120_v40  ;;  %v139_v27 = vsub.s32 0, %v5276_v23 }
  0x43   :  { %4241 = vmatpush3.bf16.msra.mxu1 %v5203_v26  ;;  %v88_v46 = vld [vmem:[#allocation10 + $0x48] sm:$0xff]  ;;  %v4224_v48 = vpack.c.bf16 %v127_v43, %v125_v42  ;;  %v124_v49 = vld [vmem:[#allocation8 + $0xa0] sm:$0xff]  ;;  %v126_v50 = vld [vmem:[#allocation8 + $0xb0] sm:$0xff] }
  0x44   :  { %4242 = vmatprep.subr.bf16.mxu1 %v5106_v0  ;;  %v129_v51 = vld [vmem:[#allocation8 + $0xc8] sm:$0xff]  ;;  %v131_v52 = vld [vmem:[#allocation8 + $0xd8] sm:$0xff]  ;;  %v5215_v53 = vpack.c.bf16 %v88_v46, %v87_v45  ;;  %v89_v54 = vld [vmem:[#allocation10 + $0x50] sm:$0xff]  ;;  %v4226_v56 = vpack.c.bf16 %v126_v50, %v124_v49 }
  0x45   :  { %4215 = vmatpush1.bf16.msra.mxu0 %v4214_v29  ;;  %v90_v55 = vld [vmem:[#allocation10 + $0x58] sm:$0xff]  ;;  %v4228_v57 = vpack.c.bf16 %v131_v52, %v129_v51  ;;  %v128_v58 = vld [vmem:[#allocation8 + $0xc0] sm:$0xff]  ;;  %v130_v59 = vld [vmem:[#allocation8 + $0xd0] sm:$0xff]  ;;  %v143_v29 = vsub.s32 1, %v5276_v23 }
  0x46   :  { %4217 = vmatprep.subr.bf16.mxu0 %v4216_v30  ;;  %v133_v60 = vld [vmem:[#allocation8 + $0xe8] sm:$0xff]  ;;  %v135_v61 = vld [vmem:[#allocation8 + $0xf8] sm:$0xff]  ;;  %v5219_v62 = vpack.c.bf16 %v90_v55, %v89_v54  ;;  %v91_v63 = vld [vmem:[#allocation10 + $0x60] sm:$0xff]  ;;  %v4230_v3 = vpack.c.bf16 %v130_v59, %v128_v58  ;;  %v367_v30 = vunpack.c.0.s8 %v366_v25 }
  0x47   :  { %4244 = vmatpush3.bf16.msra.mxu1 %v5207_v35  ;;  %v92_v2 = vld [vmem:[#allocation10 + $0x68] sm:$0xff]  ;;  %v4232_v4 = vpack.c.bf16 %v135_v61, %v133_v60  ;;  %v132_v5 = vld [vmem:[#allocation8 + $0xe0] sm:$0xff]  ;;  %v134_v6 = vld [vmem:[#allocation8 + $0xf0] sm:$0xff] }
  0x48   :  { %4245 = vmatprep.subr.bf16.mxu1 %v5106_v0  ;;  %v5223_v7 = vpack.c.bf16 %v92_v2, %v91_v63  ;;  %v93_v8 = vld [vmem:[#allocation10 + $0x70] sm:$0xff]  ;;  %v94_v9 = vld [vmem:[#allocation10 + $0x78] sm:$0xff]  ;;  %v4234_v10 = vpack.c.bf16 %v134_v6, %v132_v5  ;;  %v96_v12 = vld [vmem:[#allocation5] sm:$0xff]  ;;  %v5290_v34 = vsub.s32 %v367_v30, %v5276_v23 }
  0x49   :  { %4219 = vmatpush1.bf16.msra.mxu0 %v4218_v38  ;;  %v5227_v11 = vpack.c.bf16 %v94_v9, %v93_v8  ;;  %v97_v13 = vld [vmem:[#allocation5 + $0x8] sm:$0xff]  ;;  %v98_v15 = vld [vmem:[#allocation5 + $0x10] sm:$0xff]  ;;  %v99_v16 = vld [vmem:[#allocation5 + $0x18] sm:$0xff] }
  0x4a   :  { %4221 = vmatprep.subr.bf16.mxu0 %v4220_v39  ;;  %v100_v17 = vld [vmem:[#allocation5 + $0x20] sm:$0xff]  ;;  %v101_v19 = vld [vmem:[#allocation5 + $0x28] sm:$0xff]  ;;  %v102_v20 = vld [vmem:[#allocation5 + $0x30] sm:$0xff] }
  0x4b   :  { %4247 = vmatpush3.bf16.msra.mxu1 %v5211_v44  ;;  %v103_v21 = vld [vmem:[#allocation5 + $0x38] sm:$0xff]  ;;  %v95_v28 = vld [vmem:[%s6321_s3] sm:$0x3] }
  0x4c   :  { %4248 = vmatprep.subr.bf16.mxu1 %v5106_v0  ;;  %v5285_v31 = vrot.slane %v95_v28, %v139_v27  ;;  %v5287_v32 = vrot.slane %v95_v28, %v143_v29 }
  0x4d   :  { %4223 = vmatpush1.bf16.msra.mxu0 %v4222_v47 }
  0x4e   :  { %4225 = vmatprep.subr.bf16.mxu0 %v4224_v48 }
  0x4f   :  { %4250 = vmatpush3.bf16.msra.mxu1 %v5215_v53 }
  0x50   :  { %4251 = vmatprep.subr.bf16.mxu1 %v5106_v0 }
  0x51   :  { %4227 = vmatpush1.bf16.msra.mxu0 %v4226_v56 }
  0x52   :  { %4229 = vmatprep.subr.bf16.mxu0 %v4228_v57 }
  0x53   :  { %4253 = vmatpush3.bf16.msra.mxu1 %v5219_v62 }
  0x54   :  { %4254 = vmatprep.subr.bf16.mxu1 %v5106_v0 }
  0x55   :  { %4231 = vmatpush1.bf16.msra.mxu0 %v4230_v3 }
  0x56   :  { %4233 = vmatprep.subr.bf16.mxu0 %v4232_v4 }
  0x57   :  { %4256 = vmatpush3.bf16.msra.mxu1 %v5223_v7 }
  0x58   :  { %4257 = vmatprep.subr.bf16.mxu1 %v5106_v0 }
  0x59   :  { %4235 = vmatpush1.bf16.msra.mxu0 %v4234_v10 }
  0x5a   :  { %4260 = vmatprep.subr.bf16.mxu0 %v5106_v0 }
  0x5b   :  { %4259 = vmatpush3.bf16.msra.mxu1 %v5227_v11 }
  0x5c   :  { %212 = vmatmul.mubr.f32.vlgmr.msra.gmra.mrb[0].mxu0 %v96_v12  ;;  %4284 = vmatprep.subr.bf16.mxu1 %v5106_v0  ;;  %v72_v12 = vld [vmem:[%s6322_s4] sm:$0x1]  ;;  %s5111_s4 = smov [#allocation12]  }
  0x5d   :  { %217 = vmatprep.mubr.f32.mxu0 %v5107_v1  ;;  %4262 = vmatpush3.bf16.msra.mxu0 %v5200_v18  ;;  %s3632_s18 = sshll.u32 %s5111_s4, 4  ;;  %s3633_s18 = int_to_ptr.vmem [resolvable:$true] %s3632_s18 }
  0x5e   :  { %3957 = vmatmul.mubr.f32.vlgmr.msra.gmra.mrb[0].mxu1 %v5109_v14  ;;  %4263 = vmatprep.subr.bf16.mxu0 %v5106_v0  ;;  %s5025_s19 = scalar_lea.vmem %s3633_s18, 128  ;;  %p5030_p11 = scmp.lt.s32.totalorder %s3633_s18, %s3633_s18 }
  0x5f   :  { %4286 = vmatpush3.bf16.msra.mxu1 %v5200_v18  ;;  %4026 = vmatprep.mubr.msk.f32.mxu1 %vm5108_vm0, %v5107_v1  ;;  %p5026_p10 = scmp.ne.s32.totalorder %s3633_s18, %s5025_s19  ;;  %p5031_p12 = scmp.lt.s32.totalorder %s5025_s19, %s5025_s19 }
  0x60   :  { %218 = vmatmul.mubr.f32.gmra.mrb[2].mxu0 %v97_v13  ;;  %4287 = vmatprep.subr.bf16.mxu1 %v5106_v0 }
  0x61   :  { %223 = vmatprep.mubr.f32.mxu0 %v5107_v1  ;;  %4265 = vmatpush3.bf16.msra.mxu0 %v5203_v26  ;;  %p5032_p13 = por %p5031_p12, %p5030_p11 }
  0x62   :  { %4266 = vmatprep.subr.bf16.mxu0 %v5106_v0 }
  0x63   :  { %4289 = vmatpush3.bf16.msra.mxu1 %v5203_v26  ;;  %p5033_p0 = pnand %p5032_p13, %p5026_p10 }
  0x64   :  { %224 = vmatmul.mubr.f32.gmra.mrb[4].mxu0 %v98_v15  ;;  %4290 = vmatprep.subr.bf16.mxu1 %v5106_v0 }
  0x65   :  { %229 = vmatprep.mubr.f32.mxu0 %v5107_v1  ;;  %4268 = vmatpush3.bf16.msra.mxu0 %v5207_v35 }
  0x66   :  { %4269 = vmatprep.subr.bf16.mxu0 %v5106_v0 }
  0x67   :  { %4292 = vmatpush3.bf16.msra.mxu1 %v5207_v35 }
  0x68   :  { %230 = vmatmul.mubr.f32.gmra.mrb[6].mxu0 %v99_v16  ;;  %4293 = vmatprep.subr.bf16.mxu1 %v5106_v0 }
  0x69   :  { %235 = vmatprep.mubr.f32.mxu0 %v5107_v1  ;;  %4271 = vmatpush3.bf16.msra.mxu0 %v5211_v44 }
  0x6a   :  { %4272 = vmatprep.subr.bf16.mxu0 %v5106_v0 }
  0x6b   :  { %4295 = vmatpush3.bf16.msra.mxu1 %v5211_v44 }
  0x6c   :  { %236 = vmatmul.mubr.f32.gmra.mrb[8].mxu0 %v100_v17  ;;  %4296 = vmatprep.subr.bf16.mxu1 %v5106_v0 }
  0x6d   :  { %241 = vmatprep.mubr.f32.mxu0 %v5107_v1  ;;  %4274 = vmatpush3.bf16.msra.mxu0 %v5215_v53 }
  0x6e   :  { %4275 = vmatprep.subr.bf16.mxu0 %v5106_v0 }
  0x6f   :  { %4298 = vmatpush3.bf16.msra.mxu1 %v5215_v53 }
  0x70   :  { %242 = vmatmul.mubr.f32.gmra.mrb[10].mxu0 %v101_v19  ;;  %4299 = vmatprep.subr.bf16.mxu1 %v5106_v0 }
  0x71   :  { %247 = vmatprep.mubr.f32.mxu0 %v5107_v1  ;;  %4277 = vmatpush3.bf16.msra.mxu0 %v5219_v62 }
  0x72   :  { %4278 = vmatprep.subr.bf16.mxu0 %v5106_v0 }
  0x73   :  { %4301 = vmatpush3.bf16.msra.mxu1 %v5219_v62 }
  0x74   :  { %248 = vmatmul.mubr.f32.gmra.mrb[12].mxu0 %v102_v20  ;;  %4302 = vmatprep.subr.bf16.mxu1 %v5106_v0 }
  0x75   :  { %253 = vmatprep.mubr.f32.mxu0 %v5107_v1  ;;  %4280 = vmatpush3.bf16.msra.mxu0 %v5223_v7 }
  0x76   :  { %4281 = vmatprep.subr.bf16.mxu0 %v5106_v0 }
  0x77   :  { %4304 = vmatpush3.bf16.msra.mxu1 %v5223_v7 }
  0x78   :  { %254 = vmatmul.mubr.f32.gmra.mrb[14].mxu0 %v103_v21  ;;  %4305 = vmatprep.subr.bf16.mxu1 %v5106_v0  ;;  %v3659_v21 = vmul.f32 -1.442695, %v72_v12 }
  0x79   :  { %4283 = vmatpush3.bf16.msra.mxu0 %v5227_v11  ;;  %3991 = vmatprep.mubr.msk.f32.mxu0 %vm5108_vm0, %v5107_v1 }
  0x7a   :  { %4308 = vmatprep.subr.bf16.mxu0 %v5106_v0 }
  0x7b   :  { %4307 = vmatpush3.bf16.msra.mxu1 %v5227_v11 }
  0x7c   :  { %4332 = vmatprep.subr.bf16.mxu1 %v5106_v0 }
 0x12f   :  { %v213_v33 = vpop.f32.mrb[0].mxu0 }
 0x130   :  { %v214_v36 = vadd.f32 %v213_v33, %v5285_v31  ;;  %v215_v37 = vpop.f32.mrb[1].mxu0 }
 0x131   :  { %v216_v38 = vadd.f32 %v215_v37, %v5287_v32  ;;  %v359_v39 = vpop.f32.mrb[0].mxu1 }
 0x132   :  { %260 = vst [vmem:[#allocation4] sm:$0xff] %v214_v36  ;;  %v3958_v40 = vpop.f32.mrb[1].mxu1  ;;  %v371_v42 = vrot.slane %v359_v39, %v5290_v34  ;;  %v364_v2 = vcombine.high %v359_v39, %v359_v39 }
 0x133   :  { %261 = vst [vmem:[#allocation4 + $0x8] sm:$0xff] %v216_v38  ;;  %v219_v41 = vpop.f32.mrb[2].mxu0 }
 0x134   :  { %v220_v43 = vadd.f32 %v219_v41, %v5285_v31  ;;  %v221_v45 = vpop.f32.mrb[3].mxu0  ;;  %v379_v47 = vcombine.high %v371_v42, %v371_v42  ;;  %v387_v48 = vrot.slane %v371_v42, %v5290_v34  ;;  %v378_v14 = vrot.slane %v364_v2, %v5290_v34 }
 0x135   :  { %v222_v46 = vadd.f32 %v221_v45, %v5287_v32 }
 0x136   :  { %262 = vst [vmem:[#allocation4 + $0x10] sm:$0xff] %v220_v43  ;;  %v401_v55 = vrot.slane %v379_v47, %v5290_v34  ;;  %v409_v3 = vcombine.high %v387_v48, %v387_v48  ;;  %v380_v28 = vcombine.high %v378_v14, %v378_v14  ;;  %v394_v29 = vrot.slane %v378_v14, %v5290_v34 }
 0x137   :  { %263 = vst [vmem:[#allocation4 + $0x18] sm:$0xff] %v222_v46  ;;  %v225_v49 = vpop.f32.mrb[4].mxu0 }
 0x138   :  { %v226_v50 = vadd.f32 %v225_v49, %v5285_v31  ;;  %v227_v51 = vpop.f32.mrb[5].mxu0  ;;  %v411_v15 = vcombine.high %v401_v55, %v401_v55  ;;  %v408_v43 = vrot.slane %v380_v28, %v5290_v34 }
 0x139   :  { %v228_v52 = vadd.f32 %v227_v51, %v5287_v32 }
 0x13a   :  { %v5300_v54 = vld [vmem:[#allocation4] ss:$8 sm:$0x3]  ;;  %264 = vst [vmem:[#allocation4 + $0x20] sm:$0xff] %v226_v50  ;;  %v412_v2 = vcombine.high %v408_v43, %v408_v43 }
 0x13b   :  { %v421_v56 = vadd.f32 %v387_v48, %v5300_v54  ;;  %265 = vst [vmem:[#allocation4 + $0x28] sm:$0xff] %v228_v52  ;;  %v231_v57 = vpop.f32.mrb[6].mxu0 }
 0x13c   :  { %v232_v58 = vadd.f32 %v231_v57, %v5285_v31  ;;  %v233_v59 = vpop.f32.mrb[7].mxu0 }
 0x13d   :  { %v3660_v60 = vmul.f32 -1.442695, %v421_v56  ;;  %v234_v61 = vadd.f32 %v233_v59, %v5287_v32  ;;  %v410_v56 = vcombine.high %v394_v29, %v394_v29 }
 0x13e   :  { %v5306_v63 = vld [vmem:[#allocation4 + $0x10] ss:$8 sm:$0x3]  ;;  %266 = vst [vmem:[#allocation4 + $0x30] sm:$0xff] %v232_v58 }
 0x13f   :  { %v422_v4 = vadd.f32 %v401_v55, %v5306_v63  ;;  %4443 = vpow2.f32 %v3660_v60  ;;  %267 = vst [vmem:[#allocation4 + $0x38] sm:$0xff] %v234_v61  ;;  %v237_v5 = vpop.f32.mrb[8].mxu0 }
 0x140   :  { %v238_v6 = vadd.f32 %v237_v5, %v5285_v31  ;;  %v239_v8 = vpop.f32.mrb[9].mxu0 }
 0x141   :  { %v3661_v9 = vmul.f32 -1.442695, %v422_v4  ;;  %v240_v10 = vadd.f32 %v239_v8, %v5287_v32 }
 0x142   :  { %v5314_v13 = vld [vmem:[#allocation4 + $0x20] ss:$8 sm:$0x3]  ;;  %268 = vst [vmem:[#allocation4 + $0x40] sm:$0xff] %v238_v6 }
 0x143   :  { %4445 = vpow2.f32 %v3661_v9  ;;  %269 = vst [vmem:[#allocation4 + $0x48] sm:$0xff] %v240_v10  ;;  %v243_v16 = vpop.f32.mrb[10].mxu0  ;;  %v423_v17 = vadd.f32 %v409_v3, %v5314_v13 }
 0x144   :  { %v244_v19 = vadd.f32 %v243_v16, %v5285_v31  ;;  %v245_v20 = vpop.f32.mrb[11].mxu0 }
 0x145   :  { %v246_v22 = vadd.f32 %v245_v20, %v5287_v32  ;;  %v3662_v24 = vmul.f32 -1.442695, %v423_v17 }
 0x146   :  { %v5320_v25 = vld [vmem:[#allocation4 + $0x30] ss:$8 sm:$0x3]  ;;  %270 = vst [vmem:[#allocation4 + $0x50] sm:$0xff] %v244_v19 }
 0x147   :  { %271 = vst [vmem:[#allocation4 + $0x58] sm:$0xff] %v246_v22  ;;  %v249_v30 = vpop.f32.mrb[12].mxu0  ;;  %v424_v33 = vadd.f32 %v411_v15, %v5320_v25  ;;  %4447 = vpow2.f32 %v3662_v24 }
 0x148   :  { %v250_v36 = vadd.f32 %v249_v30, %v5285_v31  ;;  %v251_v37 = vpop.f32.mrb[13].mxu0  ;;  %4449 = vpow2.f32 %v3659_v21 }
 0x149   :  { %v4444_v38 = vpop.eup %4443  ;;  %v252_v39 = vadd.f32 %v251_v37, %v5287_v32  ;;  %v3663_v40 = vmul.f32 -1.442695, %v424_v33 }
 0x14a   :  { %v453_v41 = vadd.f32 1.0, %v4444_v38  ;;  %v5326_v42 = vld [vmem:[#allocation4 + $0x40] ss:$8 sm:$0x3]  ;;  %272 = vst [vmem:[#allocation4 + $0x60] sm:$0xff] %v250_v36 }
 0x14b   :  { %273 = vst [vmem:[#allocation4 + $0x68] sm:$0xff] %v252_v39  ;;  %v255_v45 = vpop.f32.mrb[14].mxu0  ;;  %v425_v46 = vadd.f32 %v394_v29, %v5326_v42  ;;  %4451 = vpow2.f32 %v3663_v40 }
 0x14c   :  { %4453 = vrcp.f32 %v453_v41  ;;  %v256_v47 = vadd.f32 %v255_v45, %v5285_v31  ;;  %v257_v48 = vpop.f32.mrb[15].mxu0 }
 0x14d   :  { %v4446_v49 = vpop.eup %4445  ;;  %v258_v50 = vadd.f32 %v257_v48, %v5287_v32  ;;  %v3664_v51 = vmul.f32 -1.442695, %v425_v46 }
 0x14e   :  { %v454_v52 = vadd.f32 1.0, %v4446_v49  ;;  %v5332_v55 = vld [vmem:[#allocation4 + $0x50] ss:$8 sm:$0x3]  ;;  %274 = vst [vmem:[#allocation4 + $0x70] sm:$0xff] %v256_v47 }
 0x14f   :  { %275 = vst [vmem:[#allocation4 + $0x78] sm:$0xff] %v258_v50  ;;  %v426_v57 = vadd.f32 %v408_v43, %v5332_v55  ;;  %4455 = vpow2.f32 %v3664_v51 }
 0x150   :  { %4457 = vrcp.f32 %v454_v52 }
 0x151   :  { %v4448_v58 = vpop.eup %4447  ;;  %v3665_v59 = vmul.f32 -1.442695, %v426_v57 }
 0x152   :  { %v5335_v60 = vld [vmem:[#allocation4 + $0x60] ss:$8 sm:$0x3]  ;;  %v455_v31 = vadd.f32 1.0, %v4448_v58  ;;  %v4450_v61 = vpop.eup %4449 }
 0x153   :  { %v427_v32 = vadd.f32 %v410_v56, %v5335_v60  ;;  %4459 = vpow2.f32 %v3665_v59  ;;  %v76_v6 = vadd.f32 1.0, %v4450_v61  ;;  %v525_v59 = vrot.slane %v5107_v1, %v5290_v34 }
 0x154   :  { %4461 = vrcp.f32 %v455_v31 }
 0x155   :  { %v4452_v3 = vpop.eup %4451  ;;  %v3666_v4 = vmul.f32 -1.442695, %v427_v32 }
 0x156   :  { %v5338_v5 = vpop.eup %4453  ;;  %v5340_v8 = vld [vmem:[#allocation4 + $0x70] ss:$8 sm:$0x3]  ;;  %v456_v9 = vadd.f32 1.0, %v4452_v3 }
 0x157   :  { %v477_v10 = vadd.f32 1e-06, %v5338_v5  ;;  %v428_v12 = vadd.f32 %v412_v2, %v5340_v8  ;;  %4463 = vpow2.f32 %v3666_v4 }
 0x158   :  { %4465 = vrcp.f32 %v456_v9  ;;  %v541_v9 = vrot.slane %v525_v59, %v5290_v34 }
 0x159   :  { %v4456_v14 = vpop.eup %4455  ;;  %4467 = vrcp.f32 %v477_v10  ;;  %v3667_v15 = vmul.f32 -1.442695, %v428_v12 }
 0x15a   :  { %v4458_v16 = vpop.eup %4457  ;;  %4469 = vrcp.f32 %v76_v6  ;;  %v457_v17 = vadd.f32 1.0, %v4456_v14  ;;  %v533_v6 = vcombine.high %v525_v59, %v525_v59 }
 0x15b   :  { %v478_v19 = vadd.f32 1e-06, %v4458_v16  ;;  %4471 = vpow2.f32 %v3667_v15  ;;  %v757_v23 = vcombine.low %v5338_v5, %v4458_v16 }
 0x15c   :  { %4473 = vrcp.f32 %v457_v17 }
 0x15d   :  { %v4460_v20 = vpop.eup %4459  ;;  %4475 = vrcp.f32 %v478_v19  ;;  %v767_v14 = vrot.slane %v757_v23, %v5290_v34 }
 0x15e   :  { %v4462_v21 = vpop.eup %4461  ;;  %v458_v22 = vadd.f32 1.0, %v4460_v20  ;;  %v599_v20 = vrot.slane %v5300_v54, 1  ;;  %v600_v54 = vrot.slane %v5306_v63, 1 }
 0x15f   :  { %v479_v24 = vadd.f32 1e-06, %v4462_v21 }
 0x160   :  { %4477 = vrcp.f32 %v458_v22 }
 0x161   :  { %v4464_v28 = vpop.eup %4463  ;;  %4479 = vrcp.f32 %v479_v24 }
 0x162   :  { %v4466_v29 = vpop.eup %4465  ;;  %v459_v30 = vadd.f32 1.0, %v4464_v28 }
 0x163   :  { %v4468_v33 = vpop.eup %4467  ;;  %v480_v36 = vadd.f32 1e-06, %v4466_v29  ;;  %v758_v56 = vcombine.low %v4462_v21, %v4466_v29  ;;  %v555_v29 = vrot.slane %v533_v6, %v5290_v34 }
 0x164   :  { %v4470_v37 = vpop.eup %4469  ;;  %v493_v38 = vsub.f32 0.0, %v4468_v33  ;;  %4481 = vrcp.f32 %v459_v30 }
 0x165   :  { %v4472_v39 = vpop.eup %4471  ;;  %4483 = vrcp.f32 %v480_v36  ;;  %v5346_v48 = vrot.slane %v4470_v37, %v139_v27  ;;  %v774_v3 = vrot.slane %v758_v56, %v5290_v34 }
 0x166   :  { %v4474_v40 = vpop.eup %4473  ;;  %v501_v41 = vmul.f32 1.442695, %v493_v38  ;;  %v460_v43 = vadd.f32 1.0, %v4472_v39  ;;  %v563_v38 = vcombine.high %v541_v9, %v541_v9 }
 0x167   :  { %v4476_v45 = vpop.eup %4475  ;;  %v481_v46 = vadd.f32 1e-06, %v4474_v40  ;;  %v643_v58 = vrot.slane %v5346_v48, %v5290_v34  ;;  %v789_v24 = vcombine.low %v767_v14, %v774_v3  ;;  %v565_v3 = vcombine.high %v555_v29, %v555_v29 }
 0x168   :  { %v494_v47 = vsub.f32 0.0, %v4476_v45  ;;  %4485 = vpow2.f32 %v501_v41 }
 0x169   :  { %4487 = vrcp.f32 %v460_v43  ;;  %v651_v2 = vcombine.high %v643_v58, %v643_v58  ;;  %v5357_v5 = vrot.slane %v643_v58, %v5290_v34 }
 0x16a   :  { %v4478_v49 = vpop.eup %4477  ;;  %v503_v50 = vmul.f32 1.442695, %v494_v47  ;;  %4489 = vrcp.f32 %v481_v46 }
 0x16b   :  { %v4480_v51 = vpop.eup %4479  ;;  %v482_v52 = vadd.f32 1e-06, %v4478_v49  ;;  %v759_v12 = vcombine.low %v4474_v40, %v4478_v49  ;;  %v5360_v16 = vrot.slane %v651_v2, %v5290_v34  ;;  %v797_v49 = vrot.slane %v789_v24, %v5290_v34 }
 0x16c   :  { %4491 = vpow2.f32 %v503_v50  ;;  %v495_v57 = vsub.f32 0.0, %v4480_v51  ;;  %v518_v51 = vcombine.high %v5107_v1, %v5107_v1 }
 0x16d   :  { %4493 = vrcp.f32 %v482_v52  ;;  %v781_v39 = vrot.slane %v759_v12, %v5290_v34  ;;  %v5381_v12 = vcombine.high %v5357_v5, %v5357_v5 }
 0x16e   :  { %v4482_v31 = vpop.eup %4481  ;;  %v505_v27 = vmul.f32 1.442695, %v495_v57 }
 0x16f   :  { %v4484_v61 = vpop.eup %4483  ;;  %v483_v32 = vadd.f32 1e-06, %v4482_v31 }
 0x170   :  { %v496_v4 = vsub.f32 0.0, %v4484_v61  ;;  %4495 = vpow2.f32 %v505_v27  ;;  %v636_v27 = vcombine.high %v5346_v48, %v5346_v48 }
 0x171   :  { %4497 = vrcp.f32 %v483_v32  ;;  %v601_v32 = vrot.slane %v5314_v13, 1  ;;  %v532_v13 = vrot.slane %v518_v51, %v5290_v34 }
 0x172   :  { %v4486_v10 = vpop.eup %4485  ;;  %v507_v15 = vmul.f32 1.442695, %v496_v4  ;;  %v650_v24 = vrot.slane %v636_v27, %v5290_v34 }
 0x173   :  { %v4488_v17 = vpop.eup %4487  ;;  %v583_v19 = vsub.f32 1.0, %v4486_v10  ;;  %v575_v30 = vmul.f32 %v4486_v10, %v541_v9 }
 0x174   :  { %v4490_v21 = vpop.eup %4489  ;;  %v760_v22 = vcombine.low %v4482_v31, %v4488_v17  ;;  %v484_v28 = vadd.f32 1e-06, %v4488_v17  ;;  %4499 = vpow2.f32 %v507_v15 }
 0x175   :  { %v615_v33 = vmul.f32 %v599_v20, %v583_v19  ;;  %v497_v36 = vsub.f32 0.0, %v4490_v21  ;;  %v602_v20 = vrot.slane %v5320_v25, 1 }
 0x176   :  { %v4492_v37 = vpop.eup %4491  ;;  %v788_v40 = vrot.slane %v760_v22, %v5290_v34  ;;  %4501 = vrcp.f32 %v484_v28  ;;  %v534_v28 = vcombine.high %v532_v13, %v532_v13 }
 0x177   :  { %v4494_v41 = vpop.eup %4493  ;;  %v584_v43 = vsub.f32 1.0, %v4492_v37  ;;  %v623_v45 = vadd.f32 %v615_v33, %v575_v30  ;;  %v509_v46 = vmul.f32 1.442695, %v497_v36  ;;  %v576_v52 = vmul.f32 %v4492_v37, %v555_v29 }
 0x178   :  { %v790_v47 = vcombine.low %v781_v39, %v788_v40  ;;  %v498_v50 = vsub.f32 0.0, %v4494_v41  ;;  %v5394_v29 = vcombine.high %v5360_v16, %v5360_v16  ;;  %v548_v36 = vrot.slane %v532_v13, %v5290_v34 }
 0x179   :  { %v616_v56 = vmul.f32 %v600_v54, %v584_v43  ;;  %vm693_vm1 = vcmp.ge.f32.partialorder %v623_v45, %v5357_v5  ;;  %4503 = vpow2.f32 %v509_v46  ;;  %v652_v43 = vcombine.high %v650_v24, %v650_v24 }
 0x17a   :  { %v4496_v57 = vpop.eup %4495  ;;  %v5371_v58 = vsel %vm693_vm1, 0.0, %v623_v45  ;;  %v3668_v59 = vsel %vm693_vm1, 1.0, %v5107_v1  ;;  %v804_v63 = vrot.slane %v790_v47, %v5290_v34  ;;  %v511_v31 = vmul.f32 1.442695, %v498_v50 }
 0x17b   :  { %v4498_v23 = vpop.eup %4497  ;;  %v624_v61 = vadd.f32 %v616_v56, %v576_v52  ;;  %725 = vst [vmem:[#allocation11] sm:$0x1] %v3668_v59  ;;  %v585_v2 = vsub.f32 1.0, %v4496_v57  ;;  %v577_v9 = vmul.f32 %v4496_v57, %v563_v38  ;;  %v603_v45 = vrot.slane %v5326_v42, 1 }
 0x17c   :  { %v805_v4 = vcombine.low %v797_v49, %v804_v63  ;;  %v499_v6 = vsub.f32 0.0, %v4498_v23  ;;  %4505 = vpow2.f32 %v511_v31  ;;  %v5406_v46 = vrot.slane %v650_v24, %v5290_v34 }
 0x17d   :  { %vm694_vm2 = vcmp.ge.f32.partialorder %v624_v61, %v5360_v16  ;;  %v617_v10 = vmul.f32 %v601_v32, %v585_v2  ;;  %v562_v47 = vrot.slane %v534_v28, %v5290_v34  ;;  %v604_v42 = vrot.slane %v5332_v55, 1 }
 0x17e   :  { %v4500_v14 = vpop.eup %4499  ;;  %v5383_v15 = vsel %vm694_vm2, 0.0, %v624_v61  ;;  %v3669_v48 = vsel %vm694_vm2, 1.0, %v5107_v1  ;;  %3992 = vmatmul.mubr.f32.vlgmr.msra.gmra.mrb[16].mxu0 %v805_v4  ;;  %v513_v17 = vmul.f32 1.442695, %v499_v6  ;;  %v5417_v63 = vrot.slane %v652_v43, %v5290_v34 }
 0x17f   :  { %726 = vst [vmem:[#allocation11 + $0x8] sm:$0x1] %v3669_v48  ;;  %v586_v19 = vsub.f32 1.0, %v4500_v14  ;;  %v625_v21 = vadd.f32 %v617_v10, %v577_v9  ;;  %4310 = vmatpush3.bf16.msra.mxu0 %v5200_v18  ;;  %4061 = vmatprep.mubr.msk.f32.mxu0 %vm5108_vm0, %v5107_v1  ;;  %v578_v33 = vmul.f32 %v4500_v14, %v565_v3  ;;  %v605_v32 = vrot.slane %v5335_v60, 1 }
 0x180   :  { %v4502_v22 = vpop.eup %4501  ;;  %4507 = vpow2.f32 %v513_v17  ;;  %4311 = vmatprep.subr.bf16.mxu0 %v5106_v0  ;;  %v564_v31 = vcombine.high %v548_v36, %v548_v36  ;;  %v5428_v10 = vcombine.high %v5406_v46, %v5406_v46  ;;  %v566_v14 = vcombine.high %v562_v47, %v562_v47 }
 0x181   :  { %v500_v30 = vsub.f32 0.0, %v4502_v22  ;;  %v618_v25 = vmul.f32 %v602_v20, %v586_v19  ;;  %vm695_vm3 = vcmp.ge.f32.partialorder %v625_v21, %v5381_v12  ;;  %v606_v20 = vrot.slane %v5340_v8, 1 }
 0x182   :  { %v5399_v37 = vsel %vm695_vm3, 0.0, %v625_v21  ;;  %v3670_v38 = vsel %vm695_vm3, 1.0, %v5107_v1  ;;  %v5439_v21 = vcombine.high %v5417_v63, %v5417_v63 }
 0x183   :  { %v4504_v39 = vpop.eup %4503  ;;  %v515_v40 = vmul.f32 1.442695, %v500_v30  ;;  %v626_v41 = vadd.f32 %v618_v25, %v578_v33  ;;  %727 = vst [vmem:[#allocation11 + $0x10] sm:$0x1] %v3670_v38  ;;  %4313 = vmatpush3.bf16.msra.mxu0 %v5203_v26 }
 0x184   :  { %v587_v54 = vsub.f32 1.0, %v4504_v39  ;;  %4314 = vmatprep.subr.bf16.mxu0 %v5106_v0  ;;  %v579_v50 = vmul.f32 %v4504_v39, %v548_v36 }
 0x185   :  { %4509 = vpow2.f32 %v515_v40  ;;  %vm696_vm4 = vcmp.ge.f32.partialorder %v626_v41, %v5394_v29 }
 0x186   :  { %v4506_v49 = vpop.eup %4505  ;;  %v619_v51 = vmul.f32 %v603_v45, %v587_v54  ;;  %v5410_v52 = vsel %vm696_vm4, 0.0, %v626_v41  ;;  %v3671_v56 = vsel %vm696_vm4, 1.0, %v5107_v1  ;;  %v5458_v45 = vld [vmem:[#allocation4 + $0x1] ss:$8 sm:$0x3] }
 0x187   :  { %v588_v57 = vsub.f32 1.0, %v4506_v49  ;;  %728 = vst [vmem:[#allocation11 + $0x18] sm:$0x1] %v3671_v56  ;;  %4316 = vmatpush3.bf16.msra.mxu0 %v5207_v35  ;;  %v580_v23 = vmul.f32 %v4506_v49, %v562_v47  ;;  %v5460_v47 = vld [vmem:[#allocation4 + $0x11] ss:$8 sm:$0x3] }
 0x188   :  { %v627_v59 = vadd.f32 %v619_v51, %v579_v50  ;;  %4317 = vmatprep.subr.bf16.mxu0 %v5106_v0 }
 0x189   :  { %v620_v27 = vmul.f32 %v604_v42, %v588_v57  ;;  %v5464_v57 = vld [vmem:[#allocation4 + $0x21] ss:$8 sm:$0x3]  ;;  %v5466_v42 = vld [vmem:[#allocation4 + $0x31] ss:$8 sm:$0x3] }
 0x18a   :  { %v4508_v61 = vpop.eup %4507  ;;  %vm697_vm5 = vcmp.ge.f32.partialorder %v627_v59, %v5406_v46 }
 0x18b   :  { %v589_v2 = vsub.f32 1.0, %v4508_v61  ;;  %v628_v3 = vadd.f32 %v620_v27, %v580_v23  ;;  %v5421_v55 = vsel %vm697_vm5, 0.0, %v627_v59  ;;  %4319 = vmatpush3.bf16.msra.mxu0 %v5211_v44  ;;  %v3672_v4 = vsel %vm697_vm5, 1.0, %v5107_v1  ;;  %v5471_v23 = vld [vmem:[#allocation4 + $0x51] ss:$8 sm:$0x3] }
 0x18c   :  { %4320 = vmatprep.subr.bf16.mxu0 %v5106_v0  ;;  %v581_v6 = vmul.f32 %v4508_v61, %v564_v31  ;;  %729 = vst [vmem:[#allocation11 + $0x20] sm:$0x1] %v3672_v4  ;;  %v5469_v31 = vld [vmem:[#allocation4 + $0x41] ss:$8 sm:$0x3] }
 0x18d   :  { %v621_v9 = vmul.f32 %v605_v32, %v589_v2  ;;  %vm698_vm6 = vcmp.ge.f32.partialorder %v628_v3, %v5417_v63 }
 0x18e   :  { %v5431_v60 = vsel %vm698_vm6, 0.0, %v628_v3  ;;  %v3673_v48 = vsel %vm698_vm6, 1.0, %v5107_v1  ;;  %v5475_v3 = vld [vmem:[#allocation4 + $0x61] ss:$8 sm:$0x3] }
 0x18f   :  { %v4510_v17 = vpop.eup %4509  ;;  %v629_v13 = vadd.f32 %v621_v9, %v581_v6  ;;  %730 = vst [vmem:[#allocation11 + $0x28] sm:$0x1] %v3673_v48  ;;  %4322 = vmatpush3.bf16.msra.mxu0 %v5215_v53 }
 0x190   :  { %v590_v19 = vsub.f32 1.0, %v4510_v17  ;;  %4323 = vmatprep.subr.bf16.mxu0 %v5106_v0  ;;  %v582_v22 = vmul.f32 %v4510_v17, %v566_v14  ;;  %v5479_v14 = vld [vmem:[#allocation4 + $0x71] ss:$8 sm:$0x3] }
 0x191   :  { %vm699_vm7 = vcmp.ge.f32.partialorder %v629_v13, %v5428_v10 }
 0x192   :  { %v622_v24 = vmul.f32 %v606_v20, %v590_v19  ;;  %v5442_v28 = vsel %vm699_vm7, 0.0, %v629_v13  ;;  %v3674_v30 = vsel %vm699_vm7, 1.0, %v5107_v1 }
 0x193   :  { %731 = vst [vmem:[#allocation11 + $0x30] sm:$0x1] %v3674_v30  ;;  %4325 = vmatpush3.bf16.msra.mxu0 %v5219_v62 }
 0x194   :  { %v630_v33 = vadd.f32 %v622_v24, %v582_v22  ;;  %4326 = vmatprep.subr.bf16.mxu0 %v5106_v0 }
 0x196   :  { %vm700_vm8 = vcmp.ge.f32.partialorder %v630_v33, %v5439_v21 }
 0x197   :  { %v5448_v8 = vsel %vm700_vm8, 0.0, %v630_v33  ;;  %v3675_v25 = vsel %vm700_vm8, 1.0, %v5107_v1  ;;  %4328 = vmatpush3.bf16.msra.mxu0 %v5223_v7 }
 0x198   :  { %732 = vst [vmem:[#allocation11 + $0x38] sm:$0x1] %v3675_v25  ;;  %4329 = vmatprep.subr.bf16.mxu0 %v5106_v0 }
 0x19b   :  { %4331 = vmatpush3.bf16.msra.mxu0 %v5227_v11 }
 0x19c   :  { %4356 = vmatprep.subr.bf16.mxu0 %v5106_v0 }
 0x251   :  { %v873_v36 = vpop.f32.mrb[16].mxu0 }
 0x252   :  { %v878_v38 = vcombine.high %v873_v36, %v873_v36  ;;  %v885_v39 = vrot.slane %v873_v36, %v5290_v34  ;;  %v3993_v40 = vpop.f32.mrb[17].mxu0 }
 0x254   :  { %v892_v41 = vrot.slane %v878_v38, %v5290_v34  ;;  %v893_v43 = vcombine.high %v885_v39, %v885_v39  ;;  %v901_v54 = vrot.slane %v885_v39, %v5290_v34 }
 0x256   :  { %v894_v49 = vcombine.high %v892_v41, %v892_v41  ;;  %v908_v50 = vrot.slane %v892_v41, %v5290_v34  ;;  %v915_v51 = vrot.slane %v893_v43, %v5290_v34  ;;  %v923_v56 = vcombine.high %v901_v54, %v901_v54 }
 0x257   :  { %v935_v59 = vadd.f32 %v901_v54, %v5458_v45 }
 0x258   :  { %v922_v27 = vrot.slane %v894_v49, %v5290_v34  ;;  %v924_v61 = vcombine.high %v908_v50, %v908_v50  ;;  %v925_v2 = vcombine.high %v915_v51, %v915_v51  ;;  %v936_v32 = vadd.f32 %v915_v51, %v5460_v47 }
 0x259   :  { %v937_v4 = vadd.f32 %v923_v56, %v5464_v57  ;;  %v939_v6 = vadd.f32 %v908_v50, %v5469_v31  ;;  %v3676_v9 = vmul.f32 -1.442695, %v935_v59 }
 0x25a   :  { %v926_v48 = vcombine.high %v922_v27, %v922_v27  ;;  %v938_v17 = vadd.f32 %v925_v2, %v5466_v42  ;;  %v940_v13 = vadd.f32 %v922_v27, %v5471_v23  ;;  %v941_v19 = vadd.f32 %v924_v61, %v5475_v3 }
 0x25b   :  { %4511 = vpow2.f32 %v3676_v9  ;;  %v3677_v20 = vmul.f32 -1.442695, %v936_v32  ;;  %v3678_v22 = vmul.f32 -1.442695, %v937_v4  ;;  %v3680_v33 = vmul.f32 -1.442695, %v939_v6 }
 0x25c   :  { %v942_v24 = vadd.f32 %v926_v48, %v5479_v14  ;;  %v3679_v30 = vmul.f32 -1.442695, %v938_v17  ;;  %v3681_v25 = vmul.f32 -1.442695, %v940_v13  ;;  %v3682_v36 = vmul.f32 -1.442695, %v941_v19 }
 0x25d   :  { %4513 = vpow2.f32 %v3677_v20 }
 0x25e   :  { %4515 = vpow2.f32 %v3678_v22  ;;  %v3683_v38 = vmul.f32 -1.442695, %v942_v24 }
 0x25f   :  { %4517 = vpow2.f32 %v3679_v30 }
 0x260   :  { %4519 = vpow2.f32 %v3680_v33 }
 0x261   :  { %4521 = vpow2.f32 %v3681_v25 }
 0x262   :  { %4523 = vpow2.f32 %v3682_v36 }
 0x263   :  { %4525 = vpow2.f32 %v3683_v38 }
 0x265   :  { %v4512_v39 = vpop.eup %4511 }
 0x266   :  { %v967_v40 = vadd.f32 1.0, %v4512_v39 }
 0x267   :  { %v4514_v41 = vpop.eup %4513 }
 0x268   :  { %v4516_v43 = vpop.eup %4515  ;;  %v968_v54 = vadd.f32 1.0, %v4514_v41  ;;  %4527 = vrcp.f32 %v967_v40 }
 0x269   :  { %v4518_v49 = vpop.eup %4517  ;;  %v969_v50 = vadd.f32 1.0, %v4516_v43 }
 0x26a   :  { %v4520_v51 = vpop.eup %4519  ;;  %v970_v56 = vadd.f32 1.0, %v4518_v49  ;;  %4529 = vrcp.f32 %v968_v54 }
 0x26b   :  { %v4522_v59 = vpop.eup %4521  ;;  %v971_v27 = vadd.f32 1.0, %v4520_v51  ;;  %4531 = vrcp.f32 %v969_v50 }
 0x26c   :  { %v4524_v61 = vpop.eup %4523  ;;  %v972_v2 = vadd.f32 1.0, %v4522_v59  ;;  %4533 = vrcp.f32 %v970_v56 }
 0x26d   :  { %v4526_v32 = vpop.eup %4525  ;;  %v973_v4 = vadd.f32 1.0, %v4524_v61  ;;  %4535 = vrcp.f32 %v971_v27 }
 0x26e   :  { %v974_v6 = vadd.f32 1.0, %v4526_v32  ;;  %4537 = vrcp.f32 %v972_v2 }
 0x26f   :  { %4539 = vrcp.f32 %v973_v4 }
 0x270   :  { %4541 = vrcp.f32 %v974_v6 }
 0x272   :  { %v4528_v9 = vpop.eup %4527 }
 0x273   :  { %v991_v48 = vadd.f32 1e-06, %v4528_v9 }
 0x274   :  { %v4530_v17 = vpop.eup %4529 }
 0x275   :  { %v4532_v13 = vpop.eup %4531  ;;  %v992_v19 = vadd.f32 1e-06, %v4530_v17  ;;  %4543 = vrcp.f32 %v991_v48  ;;  %v1151_v33 = vcombine.low %v4528_v9, %v4530_v17 }
 0x276   :  { %v4534_v20 = vpop.eup %4533  ;;  %v993_v22 = vadd.f32 1e-06, %v4532_v13 }
 0x277   :  { %v4536_v24 = vpop.eup %4535  ;;  %v994_v30 = vadd.f32 1e-06, %v4534_v20  ;;  %4545 = vrcp.f32 %v992_v19  ;;  %v1152_v25 = vcombine.low %v4532_v13, %v4534_v20  ;;  %v1161_v56 = vrot.slane %v1151_v33, %v5290_v34 }
 0x278   :  { %v4538_v36 = vpop.eup %4537  ;;  %v995_v38 = vadd.f32 1e-06, %v4536_v24  ;;  %4547 = vrcp.f32 %v993_v22 }
 0x279   :  { %v4540_v39 = vpop.eup %4539  ;;  %v996_v40 = vadd.f32 1e-06, %v4538_v36  ;;  %4549 = vrcp.f32 %v994_v30  ;;  %v1153_v41 = vcombine.low %v4536_v24, %v4538_v36  ;;  %v1168_v43 = vrot.slane %v1152_v25, %v5290_v34 }
 0x27a   :  { %v4542_v54 = vpop.eup %4541  ;;  %v997_v49 = vadd.f32 1e-06, %v4540_v39  ;;  %4551 = vrcp.f32 %v995_v38 }
 0x27b   :  { %v998_v50 = vadd.f32 1e-06, %v4542_v54  ;;  %4553 = vrcp.f32 %v996_v40  ;;  %v1154_v51 = vcombine.low %v4540_v39, %v4542_v54  ;;  %v1175_v59 = vrot.slane %v1153_v41, %v5290_v34 }
 0x27c   :  { %4555 = vrcp.f32 %v997_v49  ;;  %v1183_v61 = vcombine.low %v1161_v56, %v1168_v43 }
 0x27d   :  { %4557 = vrcp.f32 %v998_v50  ;;  %v1182_v27 = vrot.slane %v1154_v51, %v5290_v34 }
 0x27e   :  { %v1191_v9 = vrot.slane %v1183_v61, %v5290_v34 }
 0x27f   :  { %v4544_v2 = vpop.eup %4543  ;;  %v1184_v32 = vcombine.low %v1175_v59, %v1182_v27 }
 0x280   :  { %v1007_v4 = vsub.f32 0.0, %v4544_v2 }
 0x281   :  { %v4546_v6 = vpop.eup %4545  ;;  %v1198_v48 = vrot.slane %v1184_v32, %v5290_v34 }
 0x282   :  { %v4548_v17 = vpop.eup %4547  ;;  %v1008_v13 = vsub.f32 0.0, %v4546_v6  ;;  %v1015_v19 = vmul.f32 1.442695, %v1007_v4  ;;  %v1055_v4 = vrot.slane %v5458_v45, 1 }
 0x283   :  { %v4550_v20 = vpop.eup %4549  ;;  %v1009_v22 = vsub.f32 0.0, %v4548_v17  ;;  %v1199_v24 = vcombine.low %v1191_v9, %v1198_v48  ;;  %v1056_v9 = vrot.slane %v5460_v47, 1  ;;  %v1057_v48 = vrot.slane %v5464_v57, 1 }
 0x284   :  { %v4552_v30 = vpop.eup %4551  ;;  %v1010_v33 = vsub.f32 0.0, %v4550_v20  ;;  %4559 = vpow2.f32 %v1015_v19  ;;  %v1017_v25 = vmul.f32 1.442695, %v1008_v13  ;;  %v1058_v17 = vrot.slane %v5466_v42, 1 }
 0x285   :  { %v4554_v36 = vpop.eup %4553  ;;  %v1011_v38 = vsub.f32 0.0, %v4552_v30  ;;  %v1019_v39 = vmul.f32 1.442695, %v1009_v22  ;;  %4027 = vmatmul.mubr.f32.vlgmr.msra.gmra.mrb[2].mxu1 %v1199_v24  ;;  %v1059_v22 = vrot.slane %v5469_v31, 1 }
 0x286   :  { %v4556_v40 = vpop.eup %4555  ;;  %v1012_v41 = vsub.f32 0.0, %v4554_v36  ;;  %4561 = vpow2.f32 %v1017_v25  ;;  %v1021_v43 = vmul.f32 1.442695, %v1010_v33  ;;  %4334 = vmatpush3.bf16.msra.mxu1 %v5200_v18  ;;  %4096 = vmatprep.mubr.msk.f32.mxu1 %vm5108_vm0, %v5107_v1  ;;  %v1060_v33 = vrot.slane %v5471_v23, 1 }
 0x287   :  { %v4558_v54 = vpop.eup %4557  ;;  %v1013_v49 = vsub.f32 0.0, %v4556_v40  ;;  %4563 = vpow2.f32 %v1019_v39  ;;  %v1023_v50 = vmul.f32 1.442695, %v1011_v38  ;;  %4335 = vmatprep.subr.bf16.mxu1 %v5106_v0  ;;  %v1061_v25 = vrot.slane %v5475_v3, 1 }
 0x288   :  { %v1014_v51 = vsub.f32 0.0, %v4558_v54  ;;  %4565 = vpow2.f32 %v1021_v43  ;;  %v1025_v56 = vmul.f32 1.442695, %v1012_v41 }
 0x289   :  { %4567 = vpow2.f32 %v1023_v50  ;;  %v1027_v59 = vmul.f32 1.442695, %v1013_v49 }
 0x28a   :  { %4569 = vpow2.f32 %v1025_v56  ;;  %v1029_v27 = vmul.f32 1.442695, %v1014_v51  ;;  %4337 = vmatpush3.bf16.msra.mxu1 %v5203_v26 }
 0x28b   :  { %4571 = vpow2.f32 %v1027_v59  ;;  %4338 = vmatprep.subr.bf16.mxu1 %v5106_v0 }
 0x28c   :  { %4573 = vpow2.f32 %v1029_v27 }
 0x28e   :  { %v4560_v61 = vpop.eup %4559  ;;  %4340 = vmatpush3.bf16.msra.mxu1 %v5207_v35 }
 0x28f   :  { %v1031_v2 = vmul.f32 %v4560_v61, %v5371_v58  ;;  %v1039_v32 = vsub.f32 1.0, %v4560_v61  ;;  %4341 = vmatprep.subr.bf16.mxu1 %v5106_v0 }
 0x290   :  { %v4562_v6 = vpop.eup %4561 }
 0x291   :  { %v4564_v13 = vpop.eup %4563  ;;  %v1032_v19 = vmul.f32 %v4562_v6, %v5383_v15  ;;  %v1040_v20 = vsub.f32 1.0, %v4562_v6  ;;  %v1071_v24 = vmul.f32 %v1055_v4, %v1039_v32 }
 0x292   :  { %v4566_v58 = vpop.eup %4565  ;;  %v1033_v30 = vmul.f32 %v4564_v13, %v5399_v37  ;;  %v1041_v45 = vsub.f32 1.0, %v4564_v13  ;;  %4343 = vmatpush3.bf16.msra.mxu1 %v5211_v44  ;;  %v1062_v37 = vrot.slane %v5479_v14, 1 }
 0x293   :  { %v4568_v47 = vpop.eup %4567  ;;  %v1034_v57 = vmul.f32 %v4566_v58, %v5410_v52  ;;  %v1042_v42 = vsub.f32 1.0, %v4566_v58  ;;  %v1072_v36 = vmul.f32 %v1056_v9, %v1040_v20  ;;  %v1079_v15 = vadd.f32 %v1071_v24, %v1031_v2  ;;  %4344 = vmatprep.subr.bf16.mxu1 %v5106_v0 }
 0x294   :  { %v4570_v31 = vpop.eup %4569  ;;  %v1035_v38 = vmul.f32 %v4568_v47, %v5421_v55  ;;  %v1043_v39 = vsub.f32 1.0, %v4568_v47  ;;  %v1073_v40 = vmul.f32 %v1057_v48, %v1041_v45 }
 0x295   :  { %v4572_v23 = vpop.eup %4571  ;;  %v1036_v3 = vmul.f32 %v4570_v31, %v5431_v60  ;;  %v1044_v41 = vsub.f32 1.0, %v4570_v31  ;;  %v1074_v43 = vmul.f32 %v1058_v17, %v1042_v42  ;;  %v1080_v54 = vadd.f32 %v1072_v36, %v1032_v19 }
 0x296   :  { %v4574_v49 = vpop.eup %4573  ;;  %v1037_v52 = vmul.f32 %v4572_v23, %v5442_v28  ;;  %v1045_v50 = vsub.f32 1.0, %v4572_v23  ;;  %v1075_v51 = vmul.f32 %v1059_v22, %v1043_v39  ;;  %v1081_v56 = vadd.f32 %v1073_v40, %v1033_v30  ;;  %4346 = vmatpush3.bf16.msra.mxu1 %v5215_v53  ;;  %v5590_v40 = vld [vmem:[#allocation4 + $0x12] ss:$8 sm:$0x3] }
 0x297   :  { %v1038_v55 = vmul.f32 %v4574_v49, %v5448_v8  ;;  %v1046_v59 = vsub.f32 1.0, %v4574_v49  ;;  %v1076_v27 = vmul.f32 %v1060_v33, %v1044_v41  ;;  %v1082_v14 = vadd.f32 %v1074_v43, %v1034_v57  ;;  %4347 = vmatprep.subr.bf16.mxu1 %v5106_v0  ;;  %v5596_v49 = vld [vmem:[#allocation4 + $0x32] ss:$8 sm:$0x3] }
 0x298   :  { %v1077_v61 = vmul.f32 %v1061_v25, %v1045_v50  ;;  %v1083_v60 = vadd.f32 %v1075_v51, %v1035_v38  ;;  %vm1087_vm9 = vcmp.ge.f32.partialorder %v1079_v15, %v5357_v5  ;;  %vm1088_vm10 = vcmp.ge.f32.partialorder %v1080_v54, %v5360_v16  ;;  %v5599_v50 = vld [vmem:[#allocation4 + $0x42] ss:$8 sm:$0x3]  ;;  %v5601_v51 = vld [vmem:[#allocation4 + $0x52] ss:$8 sm:$0x3] }
 0x299   :  { %v1078_v2 = vmul.f32 %v1062_v37, %v1046_v59  ;;  %v1084_v28 = vadd.f32 %v1076_v27, %v1036_v3  ;;  %vm1089_vm11 = vcmp.ge.f32.partialorder %v1081_v56, %v5381_v12  ;;  %vm1090_vm12 = vcmp.ge.f32.partialorder %v1082_v14, %v5394_v29  ;;  %v5588_v37 = vld [vmem:[#allocation4 + $0x2] ss:$8 sm:$0x3] }
 0x29a   :  { %v1085_v32 = vadd.f32 %v1077_v61, %v1037_v52  ;;  %vm1091_vm13 = vcmp.ge.f32.partialorder %v1083_v60, %v5406_v46  ;;  %v5526_v8 = vsel %vm1087_vm9, 0.0, %v1079_v15  ;;  %v5530_v4 = vsel %vm1088_vm10, 0.0, %v1080_v54  ;;  %4349 = vmatpush3.bf16.msra.mxu1 %v5219_v62  ;;  %v5594_v54 = vld [vmem:[#allocation4 + $0x22] ss:$8 sm:$0x3] }
 0x29b   :  { %v1086_v6 = vadd.f32 %v1078_v2, %v1038_v55  ;;  %vm1092_vm14 = vcmp.ge.f32.partialorder %v1084_v28, %v5417_v63  ;;  %v5536_v9 = vsel %vm1089_vm11, 0.0, %v1081_v56  ;;  %v5540_v48 = vsel %vm1090_vm12, 0.0, %v1082_v14  ;;  %4350 = vmatprep.subr.bf16.mxu1 %v5106_v0  ;;  %v5605_v14 = vld [vmem:[#allocation4 + $0x62] ss:$8 sm:$0x3] }
 0x29c   :  { %vm1093_vm15 = vcmp.ge.f32.partialorder %v1085_v32, %v5428_v10  ;;  %v5546_v17 = vsel %vm1091_vm13, 0.0, %v1083_v60  ;;  %v5550_v13 = vsel %vm1092_vm14, 0.0, %v1084_v28  ;;  %v3684_v19 = vsel %vm1087_vm9, 1.0, %v5107_v1  ;;  %v5609_v28 = vld [vmem:[#allocation4 + $0x72] ss:$8 sm:$0x3] }
 0x29d   :  { %vm1094_vm1 = vcmp.ge.f32.partialorder %v1086_v6, %v5439_v21  ;;  %v5558_v20 = vsel %vm1093_vm15, 0.0, %v1085_v32  ;;  %v3685_v22 = vsel %vm1088_vm10, 1.0, %v5107_v1  ;;  %v3686_v24 = vsel %vm1089_vm11, 1.0, %v5107_v1  ;;  %1119 = vst [vmem:[#allocation11 + $0x1] sm:$0x1] %v3684_v19 }
 0x29e   :  { %v5566_v58 = vsel %vm1094_vm1, 0.0, %v1086_v6  ;;  %v3687_v30 = vsel %vm1090_vm12, 1.0, %v5107_v1  ;;  %v3688_v45 = vsel %vm1091_vm13, 1.0, %v5107_v1  ;;  %v3689_v33 = vsel %vm1092_vm14, 1.0, %v5107_v1  ;;  %1120 = vst [vmem:[#allocation11 + $0x9] sm:$0x1] %v3685_v22  ;;  %4352 = vmatpush3.bf16.msra.mxu1 %v5223_v7 }
 0x29f   :  { %1121 = vst [vmem:[#allocation11 + $0x11] sm:$0x1] %v3686_v24  ;;  %v3690_v25 = vsel %vm1093_vm15, 1.0, %v5107_v1  ;;  %v3691_v47 = vsel %vm1094_vm1, 1.0, %v5107_v1  ;;  %1122 = vst [vmem:[#allocation11 + $0x19] sm:$0x1] %v3687_v30  ;;  %4353 = vmatprep.subr.bf16.mxu1 %v5106_v0 }
 0x2a0   :  { %1123 = vst [vmem:[#allocation11 + $0x21] sm:$0x1] %v3688_v45  ;;  %1124 = vst [vmem:[#allocation11 + $0x29] sm:$0x1] %v3689_v33 }
 0x2a1   :  { %1125 = vst [vmem:[#allocation11 + $0x31] sm:$0x1] %v3690_v25  ;;  %1126 = vst [vmem:[#allocation11 + $0x39] sm:$0x1] %v3691_v47 }
 0x2a2   :  { %4355 = vmatpush3.bf16.msra.mxu1 %v5227_v11 }
 0x2a3   :  { %4380 = vmatprep.subr.bf16.mxu1 %v5106_v0 }
 0x358   :  { %v1267_v57 = vpop.f32.mrb[2].mxu1 }
 0x359   :  { %v1272_v42 = vcombine.high %v1267_v57, %v1267_v57  ;;  %v1279_v36 = vrot.slane %v1267_v57, %v5290_v34  ;;  %v4028_v15 = vpop.f32.mrb[3].mxu1 }
 0x35b   :  { %v1286_v31 = vrot.slane %v1272_v42, %v5290_v34  ;;  %v1287_v38 = vcombine.high %v1279_v36, %v1279_v36  ;;  %v1295_v39 = vrot.slane %v1279_v36, %v5290_v34 }
 0x35d   :  { %v1288_v23 = vcombine.high %v1286_v31, %v1286_v31  ;;  %v1302_v3 = vrot.slane %v1286_v31, %v5290_v34  ;;  %v1309_v41 = vrot.slane %v1287_v38, %v5290_v34  ;;  %v1317_v43 = vcombine.high %v1295_v39, %v1295_v39 }
 0x35e   :  { %v1329_v52 = vadd.f32 %v1295_v39, %v5588_v37 }
 0x35f   :  { %v1316_v56 = vrot.slane %v1288_v23, %v5290_v34  ;;  %v1318_v55 = vcombine.high %v1302_v3, %v1302_v3  ;;  %v1319_v59 = vcombine.high %v1309_v41, %v1309_v41  ;;  %v1330_v27 = vadd.f32 %v1309_v41, %v5590_v40 }
 0x360   :  { %v1331_v61 = vadd.f32 %v1317_v43, %v5594_v54  ;;  %v1333_v60 = vadd.f32 %v1302_v3, %v5599_v50  ;;  %v3692_v2 = vmul.f32 -1.442695, %v1329_v52 }
 0x361   :  { %v1320_v32 = vcombine.high %v1316_v56, %v1316_v56  ;;  %v1332_v6 = vadd.f32 %v1319_v59, %v5596_v49  ;;  %v1334_v19 = vadd.f32 %v1316_v56, %v5601_v51  ;;  %v1335_v22 = vadd.f32 %v1318_v55, %v5605_v14 }
 0x362   :  { %4575 = vpow2.f32 %v3692_v2  ;;  %v3693_v24 = vmul.f32 -1.442695, %v1330_v27  ;;  %v3694_v30 = vmul.f32 -1.442695, %v1331_v61  ;;  %v3696_v25 = vmul.f32 -1.442695, %v1333_v60 }
 0x363   :  { %v1336_v45 = vadd.f32 %v1320_v32, %v5609_v28  ;;  %v3695_v33 = vmul.f32 -1.442695, %v1332_v6  ;;  %v3697_v47 = vmul.f32 -1.442695, %v1334_v19  ;;  %v3698_v57 = vmul.f32 -1.442695, %v1335_v22 }
 0x364   :  { %4577 = vpow2.f32 %v3693_v24 }
 0x365   :  { %4579 = vpow2.f32 %v3694_v30  ;;  %v3699_v42 = vmul.f32 -1.442695, %v1336_v45 }
 0x366   :  { %4581 = vpow2.f32 %v3695_v33 }
 0x367   :  { %4583 = vpow2.f32 %v3696_v25 }
 0x368   :  { %4585 = vpow2.f32 %v3697_v47 }
 0x369   :  { %4587 = vpow2.f32 %v3698_v57 }
 0x36a   :  { %4589 = vpow2.f32 %v3699_v42 }
 0x36c   :  { %v4576_v36 = vpop.eup %4575 }
 0x36d   :  { %v1361_v15 = vadd.f32 1.0, %v4576_v36 }
 0x36e   :  { %v4578_v31 = vpop.eup %4577 }
 0x36f   :  { %v4580_v38 = vpop.eup %4579  ;;  %v1362_v39 = vadd.f32 1.0, %v4578_v31  ;;  %4591 = vrcp.f32 %v1361_v15 }
 0x370   :  { %v4582_v23 = vpop.eup %4581  ;;  %v1363_v3 = vadd.f32 1.0, %v4580_v38 }
 0x371   :  { %v4584_v41 = vpop.eup %4583  ;;  %v1364_v43 = vadd.f32 1.0, %v4582_v23  ;;  %4593 = vrcp.f32 %v1362_v39 }
 0x372   :  { %v4586_v52 = vpop.eup %4585  ;;  %v1365_v56 = vadd.f32 1.0, %v4584_v41  ;;  %4595 = vrcp.f32 %v1363_v3 }
 0x373   :  { %v4588_v55 = vpop.eup %4587  ;;  %v1366_v59 = vadd.f32 1.0, %v4586_v52  ;;  %4597 = vrcp.f32 %v1364_v43 }
 0x374   :  { %v4590_v27 = vpop.eup %4589  ;;  %v1367_v61 = vadd.f32 1.0, %v4588_v55  ;;  %4599 = vrcp.f32 %v1365_v56 }
 0x375   :  { %v1368_v60 = vadd.f32 1.0, %v4590_v27  ;;  %4601 = vrcp.f32 %v1366_v59 }
 0x376   :  { %4603 = vrcp.f32 %v1367_v61 }
 0x377   :  { %4605 = vrcp.f32 %v1368_v60 }
 0x379   :  { %v4592_v2 = vpop.eup %4591 }
 0x37a   :  { %v1385_v32 = vadd.f32 1e-06, %v4592_v2 }
 0x37b   :  { %v4594_v6 = vpop.eup %4593 }
 0x37c   :  { %v4596_v19 = vpop.eup %4595  ;;  %v1386_v22 = vadd.f32 1e-06, %v4594_v6  ;;  %4607 = vrcp.f32 %v1385_v32  ;;  %v1545_v25 = vcombine.low %v4592_v2, %v4594_v6 }
 0x37d   :  { %v4598_v24 = vpop.eup %4597  ;;  %v1387_v30 = vadd.f32 1e-06, %v4596_v19 }
 0x37e   :  { %v4600_v45 = vpop.eup %4599  ;;  %v1388_v33 = vadd.f32 1e-06, %v4598_v24  ;;  %4609 = vrcp.f32 %v1386_v22  ;;  %v1546_v47 = vcombine.low %v4596_v19, %v4598_v24  ;;  %v1555_v43 = vrot.slane %v1545_v25, %v5290_v34 }
 0x37f   :  { %v4602_v57 = vpop.eup %4601  ;;  %v1389_v42 = vadd.f32 1e-06, %v4600_v45  ;;  %4611 = vrcp.f32 %v1387_v30 }
 0x380   :  { %v4604_v36 = vpop.eup %4603  ;;  %v1390_v15 = vadd.f32 1e-06, %v4602_v57  ;;  %4613 = vrcp.f32 %v1388_v33  ;;  %v1547_v31 = vcombine.low %v4600_v45, %v4602_v57  ;;  %v1562_v38 = vrot.slane %v1546_v47, %v5290_v34 }
 0x381   :  { %v4606_v39 = vpop.eup %4605  ;;  %v1391_v23 = vadd.f32 1e-06, %v4604_v36  ;;  %4615 = vrcp.f32 %v1389_v42 }
 0x382   :  { %v1392_v3 = vadd.f32 1e-06, %v4606_v39  ;;  %4617 = vrcp.f32 %v1390_v15  ;;  %v1548_v41 = vcombine.low %v4604_v36, %v4606_v39  ;;  %v1569_v52 = vrot.slane %v1547_v31, %v5290_v34 }
 0x383   :  { %4619 = vrcp.f32 %v1391_v23  ;;  %v1577_v55 = vcombine.low %v1555_v43, %v1562_v38 }
 0x384   :  { %4621 = vrcp.f32 %v1392_v3  ;;  %v1576_v56 = vrot.slane %v1548_v41, %v5290_v34 }
 0x385   :  { %v1585_v2 = vrot.slane %v1577_v55, %v5290_v34 }
 0x386   :  { %v4608_v59 = vpop.eup %4607  ;;  %v1578_v27 = vcombine.low %v1569_v52, %v1576_v56 }
 0x387   :  { %v1401_v61 = vsub.f32 0.0, %v4608_v59 }
 0x388   :  { %v4610_v60 = vpop.eup %4609  ;;  %v1592_v32 = vrot.slane %v1578_v27, %v5290_v34 }
 0x389   :  { %v4612_v6 = vpop.eup %4611  ;;  %v1402_v19 = vsub.f32 0.0, %v4610_v60  ;;  %v1409_v22 = vmul.f32 1.442695, %v1401_v61  ;;  %v1449_v61 = vrot.slane %v5588_v37, 1 }
 0x38a   :  { %v4614_v24 = vpop.eup %4613  ;;  %v1403_v30 = vsub.f32 0.0, %v4612_v6  ;;  %v1593_v45 = vcombine.low %v1585_v2, %v1592_v32  ;;  %v1450_v2 = vrot.slane %v5590_v40, 1  ;;  %v1451_v32 = vrot.slane %v5594_v54, 1 }
 0x38b   :  { %v4616_v33 = vpop.eup %4615  ;;  %v1404_v25 = vsub.f32 0.0, %v4614_v24  ;;  %4623 = vpow2.f32 %v1409_v22  ;;  %v1411_v47 = vmul.f32 1.442695, %v1402_v19  ;;  %v1452_v6 = vrot.slane %v5596_v49, 1 }
 0x38c   :  { %v4618_v57 = vpop.eup %4617  ;;  %v1405_v42 = vsub.f32 0.0, %v4616_v33  ;;  %v1413_v36 = vmul.f32 1.442695, %v1403_v30  ;;  %4062 = vmatmul.mubr.f32.vlgmr.msra.gmra.mrb[18].mxu0 %v1593_v45  ;;  %v1453_v30 = vrot.slane %v5599_v50, 1 }
 0x38d   :  { %v4620_v15 = vpop.eup %4619  ;;  %v1406_v31 = vsub.f32 0.0, %v4618_v57  ;;  %4625 = vpow2.f32 %v1411_v47  ;;  %v1415_v38 = vmul.f32 1.442695, %v1404_v25  ;;  %4358 = vmatpush3.bf16.msra.mxu0 %v5200_v18  ;;  %4131 = vmatprep.mubr.msk.f32.mxu0 %vm5108_vm0, %v5107_v1  ;;  %v1454_v25 = vrot.slane %v5601_v51, 1 }
 0x38e   :  { %v4622_v39 = vpop.eup %4621  ;;  %v1407_v23 = vsub.f32 0.0, %v4620_v15  ;;  %4627 = vpow2.f32 %v1413_v36  ;;  %v1417_v3 = vmul.f32 1.442695, %v1405_v42  ;;  %4359 = vmatprep.subr.bf16.mxu0 %v5106_v0  ;;  %v1455_v47 = vrot.slane %v5605_v14, 1 }
 0x38f   :  { %v1408_v41 = vsub.f32 0.0, %v4622_v39  ;;  %4629 = vpow2.f32 %v1415_v38  ;;  %v1419_v43 = vmul.f32 1.442695, %v1406_v31 }
 0x390   :  { %4631 = vpow2.f32 %v1417_v3  ;;  %v1421_v52 = vmul.f32 1.442695, %v1407_v23 }
 0x391   :  { %4633 = vpow2.f32 %v1419_v43  ;;  %v1423_v56 = vmul.f32 1.442695, %v1408_v41  ;;  %4361 = vmatpush3.bf16.msra.mxu0 %v5203_v26 }
 0x392   :  { %4635 = vpow2.f32 %v1421_v52  ;;  %4362 = vmatprep.subr.bf16.mxu0 %v5106_v0 }
 0x393   :  { %4637 = vpow2.f32 %v1423_v56 }
 0x395   :  { %v4624_v55 = vpop.eup %4623  ;;  %4364 = vmatpush3.bf16.msra.mxu0 %v5207_v35 }
 0x396   :  { %v1425_v59 = vmul.f32 %v4624_v55, %v5526_v8  ;;  %v1433_v27 = vsub.f32 1.0, %v4624_v55  ;;  %4365 = vmatprep.subr.bf16.mxu0 %v5106_v0 }
 0x397   :  { %v4626_v60 = vpop.eup %4625 }
 0x398   :  { %v4628_v19 = vpop.eup %4627  ;;  %v1426_v22 = vmul.f32 %v4626_v60, %v5530_v4  ;;  %v1434_v24 = vsub.f32 1.0, %v4626_v60  ;;  %v1465_v45 = vmul.f32 %v1449_v61, %v1433_v27 }
 0x399   :  { %v4630_v8 = vpop.eup %4629  ;;  %v1427_v33 = vmul.f32 %v4628_v19, %v5536_v9  ;;  %v1435_v37 = vsub.f32 1.0, %v4628_v19  ;;  %4367 = vmatpush3.bf16.msra.mxu0 %v5211_v44  ;;  %v1456_v9 = vrot.slane %v5609_v28, 1 }
 0x39a   :  { %v4632_v40 = vpop.eup %4631  ;;  %v1428_v54 = vmul.f32 %v4630_v8, %v5540_v48  ;;  %v1436_v49 = vsub.f32 1.0, %v4630_v8  ;;  %v1466_v57 = vmul.f32 %v1450_v2, %v1434_v24  ;;  %v1473_v4 = vadd.f32 %v1465_v45, %v1425_v59  ;;  %4368 = vmatprep.subr.bf16.mxu0 %v5106_v0 }
 0x39b   :  { %v4634_v50 = vpop.eup %4633  ;;  %v1429_v42 = vmul.f32 %v4632_v40, %v5546_v17  ;;  %v1437_v36 = vsub.f32 1.0, %v4632_v40  ;;  %v1467_v15 = vmul.f32 %v1451_v32, %v1435_v37 }
 0x39c   :  { %v4636_v51 = vpop.eup %4635  ;;  %v1430_v14 = vmul.f32 %v4634_v50, %v5550_v13  ;;  %v1438_v31 = vsub.f32 1.0, %v4634_v50  ;;  %v1468_v38 = vmul.f32 %v1452_v6, %v1436_v49  ;;  %v1474_v39 = vadd.f32 %v1466_v57, %v1426_v22 }
 0x39d   :  { %v4638_v23 = vpop.eup %4637  ;;  %v1431_v48 = vmul.f32 %v4636_v51, %v5558_v20  ;;  %v1439_v3 = vsub.f32 1.0, %v4636_v51  ;;  %v1469_v41 = vmul.f32 %v1453_v30, %v1437_v36  ;;  %v1475_v43 = vadd.f32 %v1467_v15, %v1427_v33  ;;  %4370 = vmatpush3.bf16.msra.mxu0 %v5215_v53  ;;  %v5720_v15 = vld [vmem:[#allocation4 + $0x13] ss:$8 sm:$0x3] }
 0x39e   :  { %v1432_v17 = vmul.f32 %v4638_v23, %v5566_v58  ;;  %v1440_v52 = vsub.f32 1.0, %v4638_v23  ;;  %v1470_v56 = vmul.f32 %v1454_v25, %v1438_v31  ;;  %v1476_v28 = vadd.f32 %v1468_v38, %v1428_v54  ;;  %4371 = vmatprep.subr.bf16.mxu0 %v5106_v0  ;;  %v5726_v23 = vld [vmem:[#allocation4 + $0x33] ss:$8 sm:$0x3] }
 0x39f   :  { %v1471_v55 = vmul.f32 %v1455_v47, %v1439_v3  ;;  %v1477_v13 = vadd.f32 %v1469_v41, %v1429_v42  ;;  %vm1481_vm2 = vcmp.ge.f32.partialorder %v1473_v4, %v5357_v5  ;;  %vm1482_vm3 = vcmp.ge.f32.partialorder %v1474_v39, %v5360_v16  ;;  %v5729_v3 = vld [vmem:[#allocation4 + $0x43] ss:$8 sm:$0x3]  ;;  %v5731_v41 = vld [vmem:[#allocation4 + $0x53] ss:$8 sm:$0x3] }
 0x3a0   :  { %v1472_v59 = vmul.f32 %v1456_v9, %v1440_v52  ;;  %v1478_v20 = vadd.f32 %v1470_v56, %v1430_v14  ;;  %vm1483_vm4 = vcmp.ge.f32.partialorder %v1475_v43, %v5381_v12  ;;  %vm1484_vm5 = vcmp.ge.f32.partialorder %v1476_v28, %v5394_v29  ;;  %v5718_v9 = vld [vmem:[#allocation4 + $0x3] ss:$8 sm:$0x3] }
 0x3a1   :  { %v1479_v27 = vadd.f32 %v1471_v55, %v1431_v48  ;;  %vm1485_vm6 = vcmp.ge.f32.partialorder %v1477_v13, %v5406_v46  ;;  %v5656_v58 = vsel %vm1481_vm2, 0.0, %v1473_v4  ;;  %v5660_v61 = vsel %vm1482_vm3, 0.0, %v1474_v39  ;;  %4373 = vmatpush3.bf16.msra.mxu0 %v5219_v62  ;;  %v5724_v39 = vld [vmem:[#allocation4 + $0x23] ss:$8 sm:$0x3] }
 0x3a2   :  { %v1480_v60 = vadd.f32 %v1472_v59, %v1432_v17  ;;  %vm1486_vm7 = vcmp.ge.f32.partialorder %v1478_v20, %v5417_v63  ;;  %v5666_v2 = vsel %vm1483_vm4, 0.0, %v1475_v43  ;;  %v5670_v32 = vsel %vm1484_vm5, 0.0, %v1476_v28  ;;  %4374 = vmatprep.subr.bf16.mxu0 %v5106_v0  ;;  %v5735_v28 = vld [vmem:[#allocation4 + $0x63] ss:$8 sm:$0x3] }
 0x3a3   :  { %vm1487_vm8 = vcmp.ge.f32.partialorder %v1479_v27, %v5428_v10  ;;  %v5676_v6 = vsel %vm1485_vm6, 0.0, %v1477_v13  ;;  %v5680_v19 = vsel %vm1486_vm7, 0.0, %v1478_v20  ;;  %v3700_v22 = vsel %vm1481_vm2, 1.0, %v5107_v1  ;;  %v5739_v20 = vld [vmem:[#allocation4 + $0x73] ss:$8 sm:$0x3] }
 0x3a4   :  { %vm1488_vm9 = vcmp.ge.f32.partialorder %v1480_v60, %v5439_v21  ;;  %v5688_v24 = vsel %vm1487_vm8, 0.0, %v1479_v27  ;;  %v3701_v30 = vsel %vm1482_vm3, 1.0, %v5107_v1  ;;  %v3702_v45 = vsel %vm1483_vm4, 1.0, %v5107_v1  ;;  %1513 = vst [vmem:[#allocation11 + $0x2] sm:$0x1] %v3700_v22 }
 0x3a5   :  { %v5696_v8 = vsel %vm1488_vm9, 0.0, %v1480_v60  ;;  %v3703_v33 = vsel %vm1484_vm5, 1.0, %v5107_v1  ;;  %v3704_v37 = vsel %vm1485_vm6, 1.0, %v5107_v1  ;;  %v3705_v25 = vsel %vm1486_vm7, 1.0, %v5107_v1  ;;  %1514 = vst [vmem:[#allocation11 + $0xa] sm:$0x1] %v3701_v30  ;;  %4376 = vmatpush3.bf16.msra.mxu0 %v5223_v7 }
 0x3a6   :  { %1515 = vst [vmem:[#allocation11 + $0x12] sm:$0x1] %v3702_v45  ;;  %v3706_v47 = vsel %vm1487_vm8, 1.0, %v5107_v1  ;;  %v3707_v40 = vsel %vm1488_vm9, 1.0, %v5107_v1  ;;  %1516 = vst [vmem:[#allocation11 + $0x1a] sm:$0x1] %v3703_v33  ;;  %4377 = vmatprep.subr.bf16.mxu0 %v5106_v0 }
 0x3a7   :  { %1517 = vst [vmem:[#allocation11 + $0x22] sm:$0x1] %v3704_v37  ;;  %1518 = vst [vmem:[#allocation11 + $0x2a] sm:$0x1] %v3705_v25 }
 0x3a8   :  { %1519 = vst [vmem:[#allocation11 + $0x32] sm:$0x1] %v3706_v47  ;;  %1520 = vst [vmem:[#allocation11 + $0x3a] sm:$0x1] %v3707_v40 }
 0x3a9   :  { %4379 = vmatpush3.bf16.msra.mxu0 %v5227_v11 }
 0x3aa   :  { %4404 = vmatprep.subr.bf16.mxu0 %v5106_v0 }
 0x45f   :  { %v1661_v54 = vpop.f32.mrb[18].mxu0 }
 0x460   :  { %v1666_v49 = vcombine.high %v1661_v54, %v1661_v54  ;;  %v1673_v57 = vrot.slane %v1661_v54, %v5290_v34  ;;  %v4063_v4 = vpop.f32.mrb[19].mxu0 }
 0x462   :  { %v1680_v50 = vrot.slane %v1666_v49, %v5290_v34  ;;  %v1681_v42 = vcombine.high %v1673_v57, %v1673_v57  ;;  %v1689_v36 = vrot.slane %v1673_v57, %v5290_v34 }
 0x464   :  { %v1682_v51 = vcombine.high %v1680_v50, %v1680_v50  ;;  %v1696_v14 = vrot.slane %v1680_v50, %v5290_v34  ;;  %v1703_v31 = vrot.slane %v1681_v42, %v5290_v34  ;;  %v1711_v38 = vcombine.high %v1689_v36, %v1689_v36 }
 0x465   :  { %v1723_v48 = vadd.f32 %v1689_v36, %v5718_v9 }
 0x466   :  { %v1710_v43 = vrot.slane %v1682_v51, %v5290_v34  ;;  %v1712_v17 = vcombine.high %v1696_v14, %v1696_v14  ;;  %v1713_v52 = vcombine.high %v1703_v31, %v1703_v31  ;;  %v1724_v56 = vadd.f32 %v1703_v31, %v5720_v15 }
 0x467   :  { %v1725_v55 = vadd.f32 %v1711_v38, %v5724_v39  ;;  %v1727_v13 = vadd.f32 %v1696_v14, %v5729_v3  ;;  %v3708_v59 = vmul.f32 -1.442695, %v1723_v48 }
 0x468   :  { %v1714_v27 = vcombine.high %v1710_v43, %v1710_v43  ;;  %v1726_v60 = vadd.f32 %v1713_v52, %v5726_v23  ;;  %v1728_v22 = vadd.f32 %v1710_v43, %v5731_v41  ;;  %v1729_v30 = vadd.f32 %v1712_v17, %v5735_v28 }
 0x469   :  { %4639 = vpow2.f32 %v3708_v59  ;;  %v3709_v45 = vmul.f32 -1.442695, %v1724_v56  ;;  %v3710_v33 = vmul.f32 -1.442695, %v1725_v55  ;;  %v3712_v47 = vmul.f32 -1.442695, %v1727_v13 }
 0x46a   :  { %v1730_v37 = vadd.f32 %v1714_v27, %v5739_v20  ;;  %v3711_v25 = vmul.f32 -1.442695, %v1726_v60  ;;  %v3713_v40 = vmul.f32 -1.442695, %v1728_v22  ;;  %v3714_v54 = vmul.f32 -1.442695, %v1729_v30 }
 0x46b   :  { %4641 = vpow2.f32 %v3709_v45 }
 0x46c   :  { %4643 = vpow2.f32 %v3710_v33  ;;  %v3715_v49 = vmul.f32 -1.442695, %v1730_v37 }
 0x46d   :  { %4645 = vpow2.f32 %v3711_v25 }
 0x46e   :  { %4647 = vpow2.f32 %v3712_v47 }
 0x46f   :  { %4649 = vpow2.f32 %v3713_v40 }
 0x470   :  { %4651 = vpow2.f32 %v3714_v54 }
 0x471   :  { %4653 = vpow2.f32 %v3715_v49 }
 0x473   :  { %v4640_v57 = vpop.eup %4639 }
 0x474   :  { %v1755_v4 = vadd.f32 1.0, %v4640_v57 }
 0x475   :  { %v4642_v50 = vpop.eup %4641 }
 0x476   :  { %v4644_v42 = vpop.eup %4643  ;;  %v1756_v36 = vadd.f32 1.0, %v4642_v50  ;;  %4655 = vrcp.f32 %v1755_v4 }
 0x477   :  { %v4646_v51 = vpop.eup %4645  ;;  %v1757_v14 = vadd.f32 1.0, %v4644_v42 }
 0x478   :  { %v4648_v31 = vpop.eup %4647  ;;  %v1758_v38 = vadd.f32 1.0, %v4646_v51  ;;  %4657 = vrcp.f32 %v1756_v36 }
 0x479   :  { %v4650_v48 = vpop.eup %4649  ;;  %v1759_v43 = vadd.f32 1.0, %v4648_v31  ;;  %4659 = vrcp.f32 %v1757_v14 }
 0x47a   :  { %v4652_v17 = vpop.eup %4651  ;;  %v1760_v52 = vadd.f32 1.0, %v4650_v48  ;;  %4661 = vrcp.f32 %v1758_v38 }
 0x47b   :  { %v4654_v56 = vpop.eup %4653  ;;  %v1761_v55 = vadd.f32 1.0, %v4652_v17  ;;  %4663 = vrcp.f32 %v1759_v43 }
 0x47c   :  { %v1762_v13 = vadd.f32 1.0, %v4654_v56  ;;  %4665 = vrcp.f32 %v1760_v52 }
 0x47d   :  { %4667 = vrcp.f32 %v1761_v55 }
 0x47e   :  { %4669 = vrcp.f32 %v1762_v13 }
 0x480   :  { %v4656_v59 = vpop.eup %4655 }
 0x481   :  { %v1779_v27 = vadd.f32 1e-06, %v4656_v59 }
 0x482   :  { %v4658_v60 = vpop.eup %4657 }
 0x483   :  { %v4660_v22 = vpop.eup %4659  ;;  %v1780_v30 = vadd.f32 1e-06, %v4658_v60  ;;  %4671 = vrcp.f32 %v1779_v27  ;;  %v1939_v47 = vcombine.low %v4656_v59, %v4658_v60 }
 0x484   :  { %v4662_v45 = vpop.eup %4661  ;;  %v1781_v33 = vadd.f32 1e-06, %v4660_v22 }
 0x485   :  { %v4664_v37 = vpop.eup %4663  ;;  %v1782_v25 = vadd.f32 1e-06, %v4662_v45  ;;  %4673 = vrcp.f32 %v1780_v30  ;;  %v1940_v40 = vcombine.low %v4660_v22, %v4662_v45  ;;  %v1949_v38 = vrot.slane %v1939_v47, %v5290_v34 }
 0x486   :  { %v4666_v54 = vpop.eup %4665  ;;  %v1783_v49 = vadd.f32 1e-06, %v4664_v37  ;;  %4675 = vrcp.f32 %v1781_v33 }
 0x487   :  { %v4668_v57 = vpop.eup %4667  ;;  %v1784_v4 = vadd.f32 1e-06, %v4666_v54  ;;  %4677 = vrcp.f32 %v1782_v25  ;;  %v1941_v50 = vcombine.low %v4664_v37, %v4666_v54  ;;  %v1956_v42 = vrot.slane %v1940_v40, %v5290_v34 }
 0x488   :  { %v4670_v36 = vpop.eup %4669  ;;  %v1785_v51 = vadd.f32 1e-06, %v4668_v57  ;;  %4679 = vrcp.f32 %v1783_v49 }
 0x489   :  { %v1786_v14 = vadd.f32 1e-06, %v4670_v36  ;;  %4681 = vrcp.f32 %v1784_v4  ;;  %v1942_v31 = vcombine.low %v4668_v57, %v4670_v36  ;;  %v1963_v48 = vrot.slane %v1941_v50, %v5290_v34 }
 0x48a   :  { %4683 = vrcp.f32 %v1785_v51  ;;  %v1971_v17 = vcombine.low %v1949_v38, %v1956_v42 }
 0x48b   :  { %4685 = vrcp.f32 %v1786_v14  ;;  %v1970_v43 = vrot.slane %v1942_v31, %v5290_v34 }
 0x48c   :  { %v1979_v59 = vrot.slane %v1971_v17, %v5290_v34 }
 0x48d   :  { %v4672_v52 = vpop.eup %4671  ;;  %v1972_v56 = vcombine.low %v1963_v48, %v1970_v43 }
 0x48e   :  { %v1795_v55 = vsub.f32 0.0, %v4672_v52 }
 0x48f   :  { %v4674_v13 = vpop.eup %4673  ;;  %v1986_v27 = vrot.slane %v1972_v56, %v5290_v34 }
 0x490   :  { %v4676_v60 = vpop.eup %4675  ;;  %v1796_v22 = vsub.f32 0.0, %v4674_v13  ;;  %v1803_v30 = vmul.f32 1.442695, %v1795_v55  ;;  %v1843_v55 = vrot.slane %v5718_v9, 1 }
 0x491   :  { %v4678_v45 = vpop.eup %4677  ;;  %v1797_v33 = vsub.f32 0.0, %v4676_v60  ;;  %v1987_v37 = vcombine.low %v1979_v59, %v1986_v27  ;;  %v1844_v59 = vrot.slane %v5720_v15, 1  ;;  %v1845_v27 = vrot.slane %v5724_v39, 1 }
 0x492   :  { %v4680_v25 = vpop.eup %4679  ;;  %v1798_v47 = vsub.f32 0.0, %v4678_v45  ;;  %4687 = vpow2.f32 %v1803_v30  ;;  %v1805_v40 = vmul.f32 1.442695, %v1796_v22  ;;  %v1846_v60 = vrot.slane %v5726_v23, 1 }
 0x493   :  { %v4682_v54 = vpop.eup %4681  ;;  %v1799_v49 = vsub.f32 0.0, %v4680_v25  ;;  %v1807_v57 = vmul.f32 1.442695, %v1797_v33  ;;  %4097 = vmatmul.mubr.f32.vlgmr.msra.gmra.mrb[4].mxu1 %v1987_v37  ;;  %v1847_v33 = vrot.slane %v5729_v3, 1 }
 0x494   :  { %v4684_v4 = vpop.eup %4683  ;;  %v1800_v50 = vsub.f32 0.0, %v4682_v54  ;;  %4689 = vpow2.f32 %v1805_v40  ;;  %v1809_v42 = vmul.f32 1.442695, %v1798_v47  ;;  %4382 = vmatpush3.bf16.msra.mxu1 %v5200_v18  ;;  %4166 = vmatprep.mubr.msk.f32.mxu1 %vm5108_vm0, %v5107_v1  ;;  %v1848_v47 = vrot.slane %v5731_v41, 1 }
 0x495   :  { %v4686_v36 = vpop.eup %4685  ;;  %v1801_v51 = vsub.f32 0.0, %v4684_v4  ;;  %4691 = vpow2.f32 %v1807_v57  ;;  %v1811_v14 = vmul.f32 1.442695, %v1799_v49  ;;  %4383 = vmatprep.subr.bf16.mxu1 %v5106_v0  ;;  %v1849_v40 = vrot.slane %v5735_v28, 1 }
 0x496   :  { %v1802_v31 = vsub.f32 0.0, %v4686_v36  ;;  %4693 = vpow2.f32 %v1809_v42  ;;  %v1813_v38 = vmul.f32 1.442695, %v1800_v50 }
 0x497   :  { %4695 = vpow2.f32 %v1811_v14  ;;  %v1815_v48 = vmul.f32 1.442695, %v1801_v51 }
 0x498   :  { %4697 = vpow2.f32 %v1813_v38  ;;  %v1817_v43 = vmul.f32 1.442695, %v1802_v31  ;;  %4385 = vmatpush3.bf16.msra.mxu1 %v5203_v26 }
 0x499   :  { %4699 = vpow2.f32 %v1815_v48  ;;  %4386 = vmatprep.subr.bf16.mxu1 %v5106_v0 }
 0x49a   :  { %4701 = vpow2.f32 %v1817_v43 }
 0x49c   :  { %v4688_v17 = vpop.eup %4687  ;;  %4388 = vmatpush3.bf16.msra.mxu1 %v5207_v35 }
 0x49d   :  { %v1819_v52 = vmul.f32 %v4688_v17, %v5656_v58  ;;  %v1827_v56 = vsub.f32 1.0, %v4688_v17  ;;  %4389 = vmatprep.subr.bf16.mxu1 %v5106_v0 }
 0x49e   :  { %v4690_v13 = vpop.eup %4689 }
 0x49f   :  { %v4692_v22 = vpop.eup %4691  ;;  %v1820_v30 = vmul.f32 %v4690_v13, %v5660_v61  ;;  %v1828_v45 = vsub.f32 1.0, %v4690_v13  ;;  %v1859_v37 = vmul.f32 %v1843_v55, %v1827_v56 }
 0x4a0   :  { %v4694_v58 = vpop.eup %4693  ;;  %v1821_v25 = vmul.f32 %v4692_v22, %v5666_v2  ;;  %v1829_v9 = vsub.f32 1.0, %v4692_v22  ;;  %4391 = vmatpush3.bf16.msra.mxu1 %v5211_v44  ;;  %v1850_v2 = vrot.slane %v5739_v20, 1 }
 0x4a1   :  { %v4696_v15 = vpop.eup %4695  ;;  %v1822_v39 = vmul.f32 %v4694_v58, %v5670_v32  ;;  %v1830_v23 = vsub.f32 1.0, %v4694_v58  ;;  %v1860_v54 = vmul.f32 %v1844_v59, %v1828_v45  ;;  %v1867_v61 = vadd.f32 %v1859_v37, %v1819_v52  ;;  %4392 = vmatprep.subr.bf16.mxu1 %v5106_v0 }
 0x4a2   :  { %v4698_v3 = vpop.eup %4697  ;;  %v1823_v49 = vmul.f32 %v4696_v15, %v5676_v6  ;;  %v1831_v57 = vsub.f32 1.0, %v4696_v15  ;;  %v1861_v4 = vmul.f32 %v1845_v27, %v1829_v9 }
 0x4a3   :  { %v4700_v41 = vpop.eup %4699  ;;  %v1824_v28 = vmul.f32 %v4698_v3, %v5680_v19  ;;  %v1832_v50 = vsub.f32 1.0, %v4698_v3  ;;  %v1862_v42 = vmul.f32 %v1846_v60, %v1830_v23  ;;  %v1868_v36 = vadd.f32 %v1860_v54, %v1820_v30 }
 0x4a4   :  { %v4702_v51 = vpop.eup %4701  ;;  %v1825_v32 = vmul.f32 %v4700_v41, %v5688_v24  ;;  %v1833_v14 = vsub.f32 1.0, %v4700_v41  ;;  %v1863_v31 = vmul.f32 %v1847_v33, %v1831_v57  ;;  %v1869_v38 = vadd.f32 %v1861_v4, %v1821_v25  ;;  %4394 = vmatpush3.bf16.msra.mxu1 %v5215_v53  ;;  %v5849_v4 = vld [vmem:[#allocation4 + $0x14] ss:$8 sm:$0x3] }
 0x4a5   :  { %v1826_v6 = vmul.f32 %v4702_v51, %v5696_v8  ;;  %v1834_v48 = vsub.f32 1.0, %v4702_v51  ;;  %v1864_v43 = vmul.f32 %v1848_v47, %v1832_v50  ;;  %v1870_v20 = vadd.f32 %v1862_v42, %v1822_v39  ;;  %4395 = vmatprep.subr.bf16.mxu1 %v5106_v0  ;;  %v5855_v51 = vld [vmem:[#allocation4 + $0x34] ss:$8 sm:$0x3] }
 0x4a6   :  { %v1865_v17 = vmul.f32 %v1849_v40, %v1833_v14  ;;  %v1871_v19 = vadd.f32 %v1863_v31, %v1823_v49  ;;  %vm1875_vm10 = vcmp.ge.f32.partialorder %v1867_v61, %v5357_v5  ;;  %vm1876_vm11 = vcmp.ge.f32.partialorder %v1868_v36, %v5360_v16  ;;  %v5858_v14 = vld [vmem:[#allocation4 + $0x44] ss:$8 sm:$0x3]  ;;  %v5860_v31 = vld [vmem:[#allocation4 + $0x54] ss:$8 sm:$0x3] }
 0x4a7   :  { %v1866_v52 = vmul.f32 %v1850_v2, %v1834_v48  ;;  %v1872_v24 = vadd.f32 %v1864_v43, %v1824_v28  ;;  %vm1877_vm12 = vcmp.ge.f32.partialorder %v1869_v38, %v5381_v12  ;;  %vm1878_vm13 = vcmp.ge.f32.partialorder %v1870_v20, %v5394_v29  ;;  %v5847_v2 = vld [vmem:[#allocation4 + $0x4] ss:$8 sm:$0x3] }
 0x4a8   :  { %v1873_v56 = vadd.f32 %v1865_v17, %v1825_v32  ;;  %vm1879_vm14 = vcmp.ge.f32.partialorder %v1871_v19, %v5406_v46  ;;  %v5786_v8 = vsel %vm1875_vm10, 0.0, %v1867_v61  ;;  %v5790_v55 = vsel %vm1876_vm11, 0.0, %v1868_v36  ;;  %4397 = vmatpush3.bf16.msra.mxu1 %v5219_v62  ;;  %v5853_v36 = vld [vmem:[#allocation4 + $0x24] ss:$8 sm:$0x3] }
 0x4a9   :  { %v1874_v13 = vadd.f32 %v1866_v52, %v1826_v6  ;;  %vm1880_vm15 = vcmp.ge.f32.partialorder %v1872_v24, %v5417_v63  ;;  %v5796_v59 = vsel %vm1877_vm12, 0.0, %v1869_v38  ;;  %v5800_v27 = vsel %vm1878_vm13, 0.0, %v1870_v20  ;;  %4398 = vmatprep.subr.bf16.mxu1 %v5106_v0  ;;  %v5864_v20 = vld [vmem:[#allocation4 + $0x64] ss:$8 sm:$0x3] }
 0x4aa   :  { %vm1881_vm1 = vcmp.ge.f32.partialorder %v1873_v56, %v5428_v10  ;;  %v5806_v60 = vsel %vm1879_vm14, 0.0, %v1871_v19  ;;  %v5810_v22 = vsel %vm1880_vm15, 0.0, %v1872_v24  ;;  %v3716_v30 = vsel %vm1875_vm10, 1.0, %v5107_v1  ;;  %v5868_v24 = vld [vmem:[#allocation4 + $0x74] ss:$8 sm:$0x3] }
 0x4ab   :  { %vm1882_vm2 = vcmp.ge.f32.partialorder %v1874_v13, %v5439_v21  ;;  %v5818_v45 = vsel %vm1881_vm1, 0.0, %v1873_v56  ;;  %v3717_v33 = vsel %vm1876_vm11, 1.0, %v5107_v1  ;;  %v3718_v37 = vsel %vm1877_vm12, 1.0, %v5107_v1  ;;  %1907 = vst [vmem:[#allocation11 + $0x3] sm:$0x1] %v3716_v30 }
 0x4ac   :  { %v5826_v58 = vsel %vm1882_vm2, 0.0, %v1874_v13  ;;  %v3719_v25 = vsel %vm1878_vm13, 1.0, %v5107_v1  ;;  %v3720_v9 = vsel %vm1879_vm14, 1.0, %v5107_v1  ;;  %v3721_v47 = vsel %vm1880_vm15, 1.0, %v5107_v1  ;;  %1908 = vst [vmem:[#allocation11 + $0xb] sm:$0x1] %v3717_v33  ;;  %4400 = vmatpush3.bf16.msra.mxu1 %v5223_v7 }
 0x4ad   :  { %1909 = vst [vmem:[#allocation11 + $0x13] sm:$0x1] %v3718_v37  ;;  %v3722_v40 = vsel %vm1881_vm1, 1.0, %v5107_v1  ;;  %v3723_v15 = vsel %vm1882_vm2, 1.0, %v5107_v1  ;;  %1910 = vst [vmem:[#allocation11 + $0x1b] sm:$0x1] %v3719_v25  ;;  %4401 = vmatprep.subr.bf16.mxu1 %v5106_v0 }
 0x4ae   :  { %1911 = vst [vmem:[#allocation11 + $0x23] sm:$0x1] %v3720_v9  ;;  %1912 = vst [vmem:[#allocation11 + $0x2b] sm:$0x1] %v3721_v47 }
 0x4af   :  { %1913 = vst [vmem:[#allocation11 + $0x33] sm:$0x1] %v3722_v40  ;;  %1914 = vst [vmem:[#allocation11 + $0x3b] sm:$0x1] %v3723_v15 }
 0x4b0   :  { %4403 = vmatpush3.bf16.msra.mxu1 %v5227_v11 }
 0x566   :  { %v2055_v39 = vpop.f32.mrb[4].mxu1 }
 0x567   :  { %v2060_v23 = vcombine.high %v2055_v39, %v2055_v39  ;;  %v2067_v54 = vrot.slane %v2055_v39, %v5290_v34  ;;  %v4098_v61 = vpop.f32.mrb[5].mxu1 }
 0x569   :  { %v2074_v3 = vrot.slane %v2060_v23, %v5290_v34  ;;  %v2075_v49 = vcombine.high %v2067_v54, %v2067_v54  ;;  %v2083_v57 = vrot.slane %v2067_v54, %v5290_v34 }
 0x56b   :  { %v2076_v41 = vcombine.high %v2074_v3, %v2074_v3  ;;  %v2090_v28 = vrot.slane %v2074_v3, %v5290_v34  ;;  %v2097_v50 = vrot.slane %v2075_v49, %v5290_v34  ;;  %v2105_v42 = vcombine.high %v2083_v57, %v2083_v57 }
 0x56c   :  { %v2117_v32 = vadd.f32 %v2083_v57, %v5847_v2 }
 0x56d   :  { %v2104_v38 = vrot.slane %v2076_v41, %v5290_v34  ;;  %v2106_v6 = vcombine.high %v2090_v28, %v2090_v28  ;;  %v2107_v48 = vcombine.high %v2097_v50, %v2097_v50  ;;  %v2118_v43 = vadd.f32 %v2097_v50, %v5849_v4 }
 0x56e   :  { %v2119_v17 = vadd.f32 %v2105_v42, %v5853_v36  ;;  %v2121_v19 = vadd.f32 %v2090_v28, %v5858_v14  ;;  %v3724_v52 = vmul.f32 -1.442695, %v2117_v32 }
 0x56f   :  { %v2108_v56 = vcombine.high %v2104_v38, %v2104_v38  ;;  %v2120_v13 = vadd.f32 %v2107_v48, %v5855_v51  ;;  %v2122_v30 = vadd.f32 %v2104_v38, %v5860_v31  ;;  %v2123_v33 = vadd.f32 %v2106_v6, %v5864_v20 }
 0x570   :  { %4703 = vpow2.f32 %v3724_v52  ;;  %v3725_v37 = vmul.f32 -1.442695, %v2118_v43  ;;  %v3726_v25 = vmul.f32 -1.442695, %v2119_v17  ;;  %v3728_v40 = vmul.f32 -1.442695, %v2121_v19 }
 0x571   :  { %v2124_v9 = vadd.f32 %v2108_v56, %v5868_v24  ;;  %v3727_v47 = vmul.f32 -1.442695, %v2120_v13  ;;  %v3729_v15 = vmul.f32 -1.442695, %v2122_v30  ;;  %v3730_v39 = vmul.f32 -1.442695, %v2123_v33 }
 0x572   :  { %4705 = vpow2.f32 %v3725_v37 }
 0x573   :  { %4707 = vpow2.f32 %v3726_v25  ;;  %v3731_v23 = vmul.f32 -1.442695, %v2124_v9 }
 0x574   :  { %4709 = vpow2.f32 %v3727_v47 }
 0x575   :  { %4711 = vpow2.f32 %v3728_v40 }
 0x576   :  { %4713 = vpow2.f32 %v3729_v15 }
 0x577   :  { %4715 = vpow2.f32 %v3730_v39 }
 0x578   :  { %4717 = vpow2.f32 %v3731_v23 }
 0x57a   :  { %v4704_v54 = vpop.eup %4703 }
 0x57b   :  { %v2149_v61 = vadd.f32 1.0, %v4704_v54 }
 0x57c   :  { %v4706_v3 = vpop.eup %4705 }
 0x57d   :  { %v4708_v49 = vpop.eup %4707  ;;  %v2150_v57 = vadd.f32 1.0, %v4706_v3  ;;  %4719 = vrcp.f32 %v2149_v61 }
 0x57e   :  { %v4710_v41 = vpop.eup %4709  ;;  %v2151_v28 = vadd.f32 1.0, %v4708_v49 }
 0x57f   :  { %v4712_v50 = vpop.eup %4711  ;;  %v2152_v42 = vadd.f32 1.0, %v4710_v41  ;;  %4721 = vrcp.f32 %v2150_v57 }
 0x580   :  { %v4714_v32 = vpop.eup %4713  ;;  %v2153_v38 = vadd.f32 1.0, %v4712_v50  ;;  %4723 = vrcp.f32 %v2151_v28 }
 0x581   :  { %v4716_v6 = vpop.eup %4715  ;;  %v2154_v48 = vadd.f32 1.0, %v4714_v32  ;;  %4725 = vrcp.f32 %v2152_v42 }
 0x582   :  { %v4718_v43 = vpop.eup %4717  ;;  %v2155_v17 = vadd.f32 1.0, %v4716_v6  ;;  %4727 = vrcp.f32 %v2153_v38 }
 0x583   :  { %v2156_v19 = vadd.f32 1.0, %v4718_v43  ;;  %4729 = vrcp.f32 %v2154_v48 }
 0x584   :  { %4731 = vrcp.f32 %v2155_v17 }
 0x585   :  { %4733 = vrcp.f32 %v2156_v19 }
 0x587   :  { %v4720_v52 = vpop.eup %4719 }
 0x588   :  { %v2173_v56 = vadd.f32 1e-06, %v4720_v52 }
 0x589   :  { %v4722_v13 = vpop.eup %4721 }
 0x58a   :  { %v4724_v30 = vpop.eup %4723  ;;  %v2174_v33 = vadd.f32 1e-06, %v4722_v13  ;;  %4735 = vrcp.f32 %v2173_v56  ;;  %v2333_v40 = vcombine.low %v4720_v52, %v4722_v13 }
 0x58b   :  { %v4726_v37 = vpop.eup %4725  ;;  %v2175_v25 = vadd.f32 1e-06, %v4724_v30 }
 0x58c   :  { %v4728_v9 = vpop.eup %4727  ;;  %v2176_v47 = vadd.f32 1e-06, %v4726_v37  ;;  %4737 = vrcp.f32 %v2174_v33  ;;  %v2334_v15 = vcombine.low %v4724_v30, %v4726_v37  ;;  %v2343_v42 = vrot.slane %v2333_v40, %v5290_v34 }
 0x58d   :  { %v4730_v39 = vpop.eup %4729  ;;  %v2177_v23 = vadd.f32 1e-06, %v4728_v9  ;;  %4739 = vrcp.f32 %v2175_v25 }
 0x58e   :  { %v4732_v54 = vpop.eup %4731  ;;  %v2178_v61 = vadd.f32 1e-06, %v4730_v39  ;;  %4741 = vrcp.f32 %v2176_v47  ;;  %v2335_v3 = vcombine.low %v4728_v9, %v4730_v39  ;;  %v2350_v49 = vrot.slane %v2334_v15, %v5290_v34 }
 0x58f   :  { %v4734_v57 = vpop.eup %4733  ;;  %v2179_v41 = vadd.f32 1e-06, %v4732_v54  ;;  %4743 = vrcp.f32 %v2177_v23 }
 0x590   :  { %v2180_v28 = vadd.f32 1e-06, %v4734_v57  ;;  %4745 = vrcp.f32 %v2178_v61  ;;  %v2336_v50 = vcombine.low %v4732_v54, %v4734_v57  ;;  %v2357_v32 = vrot.slane %v2335_v3, %v5290_v34 }
 0x591   :  { %4747 = vrcp.f32 %v2179_v41  ;;  %v2365_v6 = vcombine.low %v2343_v42, %v2350_v49 }
 0x592   :  { %4749 = vrcp.f32 %v2180_v28  ;;  %v2364_v38 = vrot.slane %v2336_v50, %v5290_v34 }
 0x593   :  { %v2373_v52 = vrot.slane %v2365_v6, %v5290_v34 }
 0x594   :  { %v4736_v48 = vpop.eup %4735  ;;  %v2366_v43 = vcombine.low %v2357_v32, %v2364_v38 }
 0x595   :  { %v2189_v17 = vsub.f32 0.0, %v4736_v48 }
 0x596   :  { %v4738_v19 = vpop.eup %4737  ;;  %v2380_v56 = vrot.slane %v2366_v43, %v5290_v34  ;;  %v2237_v43 = vrot.slane %v5847_v2, 1 }
 0x597   :  { %v4740_v13 = vpop.eup %4739  ;;  %v2190_v30 = vsub.f32 0.0, %v4738_v19  ;;  %v2197_v33 = vmul.f32 1.442695, %v2189_v17  ;;  %v2238_v19 = vrot.slane %v5849_v4, 1 }
 0x598   :  { %v4742_v37 = vpop.eup %4741  ;;  %v2191_v25 = vsub.f32 0.0, %v4740_v13  ;;  %v2381_v9 = vcombine.low %v2373_v52, %v2380_v56  ;;  %v2239_v52 = vrot.slane %v5853_v36, 1 }
 0x599   :  { %v4744_v47 = vpop.eup %4743  ;;  %v2192_v40 = vsub.f32 0.0, %v4742_v37  ;;  %4751 = vpow2.f32 %v2197_v33  ;;  %v2199_v15 = vmul.f32 1.442695, %v2190_v30 }
 0x59a   :  { %v4746_v39 = vpop.eup %4745  ;;  %v2193_v23 = vsub.f32 0.0, %v4744_v47  ;;  %v2201_v54 = vmul.f32 1.442695, %v2191_v25  ;;  %4132 = vmatmul.mubr.f32.vlgmr.msra.gmra.mrb[20].mxu0 %v2381_v9  ;;  %v2242_v25 = vrot.slane %v5860_v31, 1  ;;  %v2243_v9 = vrot.slane %v5864_v20, 1 }
 0x59b   :  { %v4748_v61 = vpop.eup %4747  ;;  %v2194_v3 = vsub.f32 0.0, %v4746_v39  ;;  %4753 = vpow2.f32 %v2199_v15  ;;  %v2203_v49 = vmul.f32 1.442695, %v2192_v40  ;;  %4406 = vmatpush3.bf16.msra.mxu0 %v5200_v18  ;;  %4201 = vmatprep.mubr.msk.f32.mxu0 %vm5108_vm0, %v5107_v1 }
 0x59c   :  { %v4750_v57 = vpop.eup %4749  ;;  %v2195_v41 = vsub.f32 0.0, %v4748_v61  ;;  %4755 = vpow2.f32 %v2201_v54  ;;  %v2205_v28 = vmul.f32 1.442695, %v2193_v23  ;;  %4407 = vmatprep.subr.bf16.mxu0 %v5106_v0 }
 0x59d   :  { %v2196_v50 = vsub.f32 0.0, %v4750_v57  ;;  %4757 = vpow2.f32 %v2203_v49  ;;  %v2207_v42 = vmul.f32 1.442695, %v2194_v3 }
 0x59e   :  { %4759 = vpow2.f32 %v2205_v28  ;;  %v2209_v32 = vmul.f32 1.442695, %v2195_v41 }
 0x59f   :  { %4761 = vpow2.f32 %v2207_v42  ;;  %v2211_v38 = vmul.f32 1.442695, %v2196_v50  ;;  %4409 = vmatpush3.bf16.msra.mxu0 %v5203_v26  ;;  %v2240_v26 = vrot.slane %v5855_v51, 1 }
 0x5a0   :  { %4763 = vpow2.f32 %v2209_v32  ;;  %4410 = vmatprep.subr.bf16.mxu0 %v5106_v0 }
 0x5a1   :  { %4765 = vpow2.f32 %v2211_v38 }
 0x5a3   :  { %v4752_v18 = vpop.eup %4751  ;;  %4412 = vmatpush3.bf16.msra.mxu0 %v5207_v35  ;;  %v2241_v35 = vrot.slane %v5858_v14, 1 }
 0x5a4   :  { %v2213_v6 = vmul.f32 %v4752_v18, %v5786_v8  ;;  %v2221_v48 = vsub.f32 1.0, %v4752_v18  ;;  %4413 = vmatprep.subr.bf16.mxu0 %v5106_v0 }
 0x5a5   :  { %v4754_v17 = vpop.eup %4753 }
 0x5a6   :  { %v4756_v56 = vpop.eup %4755  ;;  %v2214_v13 = vmul.f32 %v4754_v17, %v5790_v55  ;;  %v2222_v30 = vsub.f32 1.0, %v4754_v17  ;;  %v2253_v33 = vmul.f32 %v2237_v43, %v2221_v48 }
 0x5a7   :  { %v4758_v8 = vpop.eup %4757  ;;  %v2215_v37 = vmul.f32 %v4756_v56, %v5796_v59  ;;  %v2223_v2 = vsub.f32 1.0, %v4756_v56  ;;  %4415 = vmatpush3.bf16.msra.mxu0 %v5211_v44  ;;  %v2244_v59 = vrot.slane %v5868_v24, 1 }
 0x5a8   :  { %v4760_v4 = vpop.eup %4759  ;;  %v2216_v36 = vmul.f32 %v4758_v8, %v5800_v27  ;;  %v2224_v51 = vsub.f32 1.0, %v4758_v8  ;;  %v2254_v47 = vmul.f32 %v2238_v19, %v2222_v30  ;;  %v2261_v55 = vadd.f32 %v2253_v33, %v2213_v6  ;;  %4416 = vmatprep.subr.bf16.mxu0 %v5106_v0 }
 0x5a9   :  { %v4762_v14 = vpop.eup %4761  ;;  %v2217_v40 = vmul.f32 %v4760_v4, %v5806_v60  ;;  %v2225_v15 = vsub.f32 1.0, %v4760_v4  ;;  %v2255_v39 = vmul.f32 %v2239_v52, %v2223_v2 }
 0x5aa   :  { %v4764_v31 = vpop.eup %4763  ;;  %v2218_v20 = vmul.f32 %v4762_v14, %v5810_v22  ;;  %v2226_v23 = vsub.f32 1.0, %v4762_v14  ;;  %v2256_v44 = vmul.f32 %v2240_v26, %v2224_v51  ;;  %v2262_v54 = vadd.f32 %v2254_v47, %v2214_v13  ;;  %v5978_v51 = vld [vmem:[#allocation4 + $0x15] ss:$8 sm:$0x3] }
 0x5ab   :  { %v4766_v61 = vpop.eup %4765  ;;  %v2219_v27 = vmul.f32 %v4764_v31, %v5818_v45  ;;  %v2227_v3 = vsub.f32 1.0, %v4764_v31  ;;  %v2257_v49 = vmul.f32 %v2241_v35, %v2225_v15  ;;  %v2263_v57 = vadd.f32 %v2255_v39, %v2215_v37  ;;  %4418 = vmatpush3.bf16.msra.mxu0 %v5215_v53  ;;  %v5982_v14 = vld [vmem:[#allocation4 + $0x25] ss:$8 sm:$0x3] }
 0x5ac   :  { %v2220_v60 = vmul.f32 %v4766_v61, %v5826_v58  ;;  %v2228_v41 = vsub.f32 1.0, %v4766_v61  ;;  %v2258_v28 = vmul.f32 %v2242_v25, %v2226_v23  ;;  %v2264_v24 = vadd.f32 %v2256_v44, %v2216_v36  ;;  %4419 = vmatprep.subr.bf16.mxu0 %v5106_v0  ;;  %v5976_v36 = vld [vmem:[#allocation4 + $0x5] ss:$8 sm:$0x3] }
 0x5ad   :  { %v2259_v50 = vmul.f32 %v2243_v9, %v2227_v3  ;;  %v2265_v22 = vadd.f32 %v2257_v49, %v2217_v40  ;;  %vm2269_vm0 = vcmp.ge.f32.partialorder %v2261_v55, %v5357_v5  ;;  %vm2270_vm3 = vcmp.ge.f32.partialorder %v2262_v54, %v5360_v16  ;;  %v5984_v40 = vld [vmem:[#allocation4 + $0x35] ss:$8 sm:$0x3] }
 0x5ae   :  { %v2260_v42 = vmul.f32 %v2244_v59, %v2228_v41  ;;  %v2266_v45 = vadd.f32 %v2258_v28, %v2218_v20  ;;  %vm2271_vm4 = vcmp.ge.f32.partialorder %v2263_v57, %v5381_v12  ;;  %vm2272_vm5 = vcmp.ge.f32.partialorder %v2264_v24, %v5394_v29  ;;  %v5987_v59 = vld [vmem:[#allocation4 + $0x45] ss:$8 sm:$0x3]  ;;  %v5989_v39 = vld [vmem:[#allocation4 + $0x55] ss:$8 sm:$0x3] }
 0x5af   :  { %v2267_v53 = vadd.f32 %v2259_v50, %v2219_v27  ;;  %vm2273_vm6 = vcmp.ge.f32.partialorder %v2265_v22, %v5406_v46  ;;  %v5915_v58 = vsel %vm2269_vm0, 0.0, %v2261_v55  ;;  %v5919_v32 = vsel %vm2270_vm3, 0.0, %v2262_v54  ;;  %4421 = vmatpush3.bf16.msra.mxu0 %v5219_v62  ;;  %v5993_v54 = vld [vmem:[#allocation4 + $0x65] ss:$8 sm:$0x3] }
 0x5b0   :  { %v2268_v38 = vadd.f32 %v2260_v42, %v2220_v60  ;;  %vm2274_vm7 = vcmp.ge.f32.partialorder %v2266_v45, %v5417_v63  ;;  %v5925_v18 = vsel %vm2271_vm4, 0.0, %v2263_v57  ;;  %v5929_v6 = vsel %vm2272_vm5, 0.0, %v2264_v24  ;;  %4422 = vmatprep.subr.bf16.mxu0 %v5106_v0  ;;  %v5997_v49 = vld [vmem:[#allocation4 + $0x75] ss:$8 sm:$0x3] }
 0x5b1   :  { %vm2275_vm8 = vcmp.ge.f32.partialorder %v2267_v53, %v5428_v10  ;;  %v5935_v48 = vsel %vm2273_vm6, 0.0, %v2265_v22  ;;  %v5939_v62 = vsel %vm2274_vm7, 0.0, %v2266_v45  ;;  %v3732_v43 = vsel %vm2269_vm0, 1.0, %v5107_v1 }
 0x5b2   :  { %vm2276_vm9 = vcmp.ge.f32.partialorder %v2268_v38, %v5439_v21  ;;  %v5947_v17 = vsel %vm2275_vm8, 0.0, %v2267_v53  ;;  %v3733_v19 = vsel %vm2270_vm3, 1.0, %v5107_v1  ;;  %v3734_v52 = vsel %vm2271_vm4, 1.0, %v5107_v1  ;;  %2301 = vst [vmem:[#allocation11 + $0x4] sm:$0x1] %v3732_v43 }
 0x5b3   :  { %v5955_v26 = vsel %vm2276_vm9, 0.0, %v2268_v38  ;;  %v3735_v56 = vsel %vm2272_vm5, 1.0, %v5107_v1  ;;  %v3736_v13 = vsel %vm2273_vm6, 1.0, %v5107_v1  ;;  %v3737_v30 = vsel %vm2274_vm7, 1.0, %v5107_v1  ;;  %2302 = vst [vmem:[#allocation11 + $0xc] sm:$0x1] %v3733_v19  ;;  %4424 = vmatpush3.bf16.msra.mxu0 %v5223_v7 }
 0x5b4   :  { %2303 = vst [vmem:[#allocation11 + $0x14] sm:$0x1] %v3734_v52  ;;  %v3738_v35 = vsel %vm2275_vm8, 1.0, %v5107_v1  ;;  %v3739_v33 = vsel %vm2276_vm9, 1.0, %v5107_v1  ;;  %2304 = vst [vmem:[#allocation11 + $0x1c] sm:$0x1] %v3735_v56  ;;  %4425 = vmatprep.subr.bf16.mxu0 %v5106_v0 }
 0x5b5   :  { %2305 = vst [vmem:[#allocation11 + $0x24] sm:$0x1] %v3736_v13  ;;  %2306 = vst [vmem:[#allocation11 + $0x2c] sm:$0x1] %v3737_v30 }
 0x5b6   :  { %2307 = vst [vmem:[#allocation11 + $0x34] sm:$0x1] %v3738_v35  ;;  %2308 = vst [vmem:[#allocation11 + $0x3c] sm:$0x1] %v3739_v33 }
 0x5b7   :  { %4427 = vmatpush3.bf16.msra.mxu0 %v5227_v11 }
 0x66d   :  { %v2449_v8 = vpop.f32.mrb[20].mxu0 }
 0x66e   :  { %v2454_v37 = vcombine.high %v2449_v8, %v2449_v8  ;;  %v2461_v2 = vrot.slane %v2449_v8, %v5290_v34  ;;  %v4133_v7 = vpop.f32.mrb[21].mxu0 }
 0x670   :  { %v2468_v25 = vrot.slane %v2454_v37, %v5290_v34  ;;  %v2469_v9 = vcombine.high %v2461_v2, %v2461_v2  ;;  %v2477_v4 = vrot.slane %v2461_v2, %v5290_v34 }
 0x672   :  { %v2470_v47 = vcombine.high %v2468_v25, %v2468_v25  ;;  %v2484_v0 = vrot.slane %v2468_v25, %v5290_v34  ;;  %v2491_v55 = vrot.slane %v2469_v9, %v5290_v34  ;;  %v2499_v11 = vcombine.high %v2477_v4, %v2477_v4 }
 0x673   :  { %v2511_v15 = vadd.f32 %v2477_v4, %v5976_v36 }
 0x674   :  { %v2498_v31 = vrot.slane %v2470_v47, %v5290_v34  ;;  %v2500_v20 = vcombine.high %v2484_v0, %v2484_v0  ;;  %v2501_v23 = vcombine.high %v2491_v55, %v2491_v55  ;;  %v2512_v44 = vadd.f32 %v2491_v55, %v5978_v51 }
 0x675   :  { %v2513_v61 = vadd.f32 %v2499_v11, %v5982_v14  ;;  %v2515_v27 = vadd.f32 %v2484_v0, %v5987_v59  ;;  %v3740_v3 = vmul.f32 -1.442695, %v2511_v15 }
 0x676   :  { %v2502_v57 = vcombine.high %v2498_v31, %v2498_v31  ;;  %v2514_v60 = vadd.f32 %v2501_v23, %v5984_v40  ;;  %v2516_v41 = vadd.f32 %v2498_v31, %v5989_v39  ;;  %v2517_v28 = vadd.f32 %v2500_v20, %v5993_v54 }
 0x677   :  { %4767 = vpow2.f32 %v3740_v3  ;;  %v3741_v24 = vmul.f32 -1.442695, %v2512_v44  ;;  %v3742_v50 = vmul.f32 -1.442695, %v2513_v61  ;;  %v3744_v45 = vmul.f32 -1.442695, %v2515_v27 }
 0x678   :  { %v2518_v22 = vadd.f32 %v2502_v57, %v5997_v49  ;;  %v3743_v42 = vmul.f32 -1.442695, %v2514_v60  ;;  %v3745_v53 = vmul.f32 -1.442695, %v2516_v41  ;;  %v3746_v38 = vmul.f32 -1.442695, %v2517_v28 }
 0x679   :  { %4769 = vpow2.f32 %v3741_v24 }
 0x67a   :  { %4771 = vpow2.f32 %v3742_v50  ;;  %v3747_v43 = vmul.f32 -1.442695, %v2518_v22 }
 0x67b   :  { %4773 = vpow2.f32 %v3743_v42 }
 0x67c   :  { %4775 = vpow2.f32 %v3744_v45 }
 0x67d   :  { %4777 = vpow2.f32 %v3745_v53 }
 0x67e   :  { %4779 = vpow2.f32 %v3746_v38 }
 0x67f   :  { %4781 = vpow2.f32 %v3747_v43 }
 0x681   :  { %v4768_v19 = vpop.eup %4767 }
 0x682   :  { %v2543_v52 = vadd.f32 1.0, %v4768_v19 }
 0x683   :  { %v4770_v56 = vpop.eup %4769 }
 0x684   :  { %v4772_v13 = vpop.eup %4771  ;;  %v2544_v30 = vadd.f32 1.0, %v4770_v56  ;;  %4783 = vrcp.f32 %v2543_v52 }
 0x685   :  { %v4774_v35 = vpop.eup %4773  ;;  %v2545_v33 = vadd.f32 1.0, %v4772_v13 }
 0x686   :  { %v4776_v8 = vpop.eup %4775  ;;  %v2546_v37 = vadd.f32 1.0, %v4774_v35  ;;  %4785 = vrcp.f32 %v2544_v30 }
 0x687   :  { %v4778_v2 = vpop.eup %4777  ;;  %v2547_v7 = vadd.f32 1.0, %v4776_v8  ;;  %4787 = vrcp.f32 %v2545_v33 }
 0x688   :  { %v4780_v25 = vpop.eup %4779  ;;  %v2548_v9 = vadd.f32 1.0, %v4778_v2  ;;  %4789 = vrcp.f32 %v2546_v37 }
 0x689   :  { %v4782_v4 = vpop.eup %4781  ;;  %v2549_v47 = vadd.f32 1.0, %v4780_v25  ;;  %4791 = vrcp.f32 %v2547_v7 }
 0x68a   :  { %v2550_v0 = vadd.f32 1.0, %v4782_v4  ;;  %4793 = vrcp.f32 %v2548_v9 }
 0x68b   :  { %4795 = vrcp.f32 %v2549_v47 }
 0x68c   :  { %4797 = vrcp.f32 %v2550_v0 }
 0x68e   :  { %v4784_v55 = vpop.eup %4783 }
 0x68f   :  { %v2567_v11 = vadd.f32 1e-06, %v4784_v55 }
 0x690   :  { %v4786_v15 = vpop.eup %4785 }
 0x691   :  { %v4788_v31 = vpop.eup %4787  ;;  %v2568_v20 = vadd.f32 1e-06, %v4786_v15  ;;  %4799 = vrcp.f32 %v2567_v11  ;;  %v2727_v3 = vcombine.low %v4784_v55, %v4786_v15 }
 0x692   :  { %v4790_v23 = vpop.eup %4789  ;;  %v2569_v44 = vadd.f32 1e-06, %v4788_v31 }
 0x693   :  { %v4792_v61 = vpop.eup %4791  ;;  %v2570_v27 = vadd.f32 1e-06, %v4790_v23  ;;  %4801 = vrcp.f32 %v2568_v20  ;;  %v2728_v57 = vcombine.low %v4788_v31, %v4790_v23  ;;  %v2737_v43 = vrot.slane %v2727_v3, %v5290_v34 }
 0x694   :  { %v4794_v60 = vpop.eup %4793  ;;  %v2571_v41 = vadd.f32 1e-06, %v4792_v61  ;;  %4803 = vrcp.f32 %v2569_v44 }
 0x695   :  { %v4796_v28 = vpop.eup %4795  ;;  %v2572_v24 = vadd.f32 1e-06, %v4794_v60  ;;  %4805 = vrcp.f32 %v2570_v27  ;;  %v2729_v50 = vcombine.low %v4792_v61, %v4794_v60  ;;  %v2744_v22 = vrot.slane %v2728_v57, %v5290_v34 }
 0x696   :  { %v4798_v42 = vpop.eup %4797  ;;  %v2573_v45 = vadd.f32 1e-06, %v4796_v28  ;;  %4807 = vrcp.f32 %v2571_v41 }
 0x697   :  { %v2574_v53 = vadd.f32 1e-06, %v4798_v42  ;;  %4809 = vrcp.f32 %v2572_v24  ;;  %v2730_v38 = vcombine.low %v4796_v28, %v4798_v42  ;;  %v2751_v19 = vrot.slane %v2729_v50, %v5290_v34 }
 0x698   :  { %4811 = vrcp.f32 %v2573_v45  ;;  %v2759_v56 = vcombine.low %v2737_v43, %v2744_v22  ;;  %v2631_v45 = vrot.slane %v5976_v36, 1  ;;  %v2633_v43 = vrot.slane %v5982_v14, 1 }
 0x699   :  { %4813 = vrcp.f32 %v2574_v53  ;;  %v2758_v52 = vrot.slane %v2730_v38, %v5290_v34  ;;  %v2632_v38 = vrot.slane %v5978_v51, 1  ;;  %v2636_v36 = vrot.slane %v5989_v39, 1 }
 0x69a   :  { %v2767_v8 = vrot.slane %v2759_v56, %v5290_v34 }
 0x69b   :  { %v4800_v13 = vpop.eup %4799  ;;  %v2760_v30 = vcombine.low %v2751_v19, %v2758_v52  ;;  %v2634_v19 = vrot.slane %v5984_v40, 1 }
 0x69c   :  { %v2583_v35 = vsub.f32 0.0, %v4800_v13 }
 0x69d   :  { %v4802_v33 = vpop.eup %4801  ;;  %v2774_v37 = vrot.slane %v2760_v30, %v5290_v34  ;;  %v2635_v30 = vrot.slane %v5987_v59, 1  ;;  %v2638_v59 = vrot.slane %v5997_v49, 1 }
 0x69e   :  { %v4804_v2 = vpop.eup %4803  ;;  %v2584_v7 = vsub.f32 0.0, %v4802_v33  ;;  %v2591_v25 = vmul.f32 1.442695, %v2583_v35 }
 0x69f   :  { %v4806_v9 = vpop.eup %4805  ;;  %v2585_v4 = vsub.f32 0.0, %v4804_v2  ;;  %v2775_v47 = vcombine.low %v2767_v8, %v2774_v37  ;;  %v2637_v37 = vrot.slane %v5993_v54, 1 }
 0x6a0   :  { %v4808_v0 = vpop.eup %4807  ;;  %v2586_v55 = vsub.f32 0.0, %v4806_v9  ;;  %4815 = vpow2.f32 %v2591_v25  ;;  %v2593_v11 = vmul.f32 1.442695, %v2584_v7 }
 0x6a1   :  { %v4810_v15 = vpop.eup %4809  ;;  %v2587_v31 = vsub.f32 0.0, %v4808_v0  ;;  %v2595_v20 = vmul.f32 1.442695, %v2585_v4  ;;  %4167 = vmatmul.mubr.f32.vlgmr.msra.gmra.mrb[6].mxu1 %v2775_v47 }
 0x6a2   :  { %v4812_v23 = vpop.eup %4811  ;;  %v2588_v44 = vsub.f32 0.0, %v4810_v15  ;;  %4817 = vpow2.f32 %v2593_v11  ;;  %v2597_v61 = vmul.f32 1.442695, %v2586_v55 }
 0x6a3   :  { %v4814_v27 = vpop.eup %4813  ;;  %v2589_v3 = vsub.f32 0.0, %v4812_v23  ;;  %4819 = vpow2.f32 %v2595_v20  ;;  %v2599_v57 = vmul.f32 1.442695, %v2587_v31 }
 0x6a4   :  { %v2590_v60 = vsub.f32 0.0, %v4814_v27  ;;  %4821 = vpow2.f32 %v2597_v61  ;;  %v2601_v41 = vmul.f32 1.442695, %v2588_v44 }
 0x6a5   :  { %4823 = vpow2.f32 %v2599_v57  ;;  %v2603_v28 = vmul.f32 1.442695, %v2589_v3 }
 0x6a6   :  { %4825 = vpow2.f32 %v2601_v41  ;;  %v2605_v24 = vmul.f32 1.442695, %v2590_v60 }
 0x6a7   :  { %4827 = vpow2.f32 %v2603_v28 }
 0x6a8   :  { %4829 = vpow2.f32 %v2605_v24 }
 0x6aa   :  { %v4816_v50 = vpop.eup %4815 }
 0x6ab   :  { %v2607_v22 = vmul.f32 %v4816_v50, %v5915_v58  ;;  %v2615_v42 = vsub.f32 1.0, %v4816_v50 }
 0x6ac   :  { %v4818_v53 = vpop.eup %4817 }
 0x6ad   :  { %v4820_v52 = vpop.eup %4819  ;;  %v2608_v56 = vmul.f32 %v4818_v53, %v5919_v32  ;;  %v2616_v13 = vsub.f32 1.0, %v4818_v53  ;;  %v2647_v35 = vmul.f32 %v2631_v45, %v2615_v42 }
 0x6ae   :  { %v4822_v33 = vpop.eup %4821  ;;  %v2609_v58 = vmul.f32 %v4820_v52, %v5925_v18  ;;  %v2617_v8 = vsub.f32 1.0, %v4820_v52 }
 0x6af   :  { %v4824_v51 = vpop.eup %4823  ;;  %v2610_v14 = vmul.f32 %v4822_v33, %v5929_v6  ;;  %v2618_v2 = vsub.f32 1.0, %v4822_v33  ;;  %v2648_v40 = vmul.f32 %v2632_v38, %v2616_v13  ;;  %v2655_v7 = vadd.f32 %v2647_v35, %v2607_v22 }
 0x6b0   :  { %v4826_v25 = vpop.eup %4825  ;;  %v2611_v32 = vmul.f32 %v4824_v51, %v5935_v48  ;;  %v2619_v9 = vsub.f32 1.0, %v4824_v51  ;;  %v2649_v4 = vmul.f32 %v2633_v43, %v2617_v8  ;;  %v6082_v51 = vld [vmem:[#allocation4 + $0x16] ss:$8 sm:$0x3] }
 0x6b1   :  { %v4828_v47 = vpop.eup %4827  ;;  %v2612_v18 = vmul.f32 %v4826_v25, %v5939_v62  ;;  %v2620_v0 = vsub.f32 1.0, %v4826_v25  ;;  %v2650_v39 = vmul.f32 %v2634_v19, %v2618_v2  ;;  %v2656_v55 = vadd.f32 %v2648_v40, %v2608_v56  ;;  %v6086_v25 = vld [vmem:[#allocation4 + $0x26] ss:$8 sm:$0x3] }
 0x6b2   :  { %v4830_v54 = vpop.eup %4829  ;;  %v2613_v11 = vmul.f32 %v4828_v47, %v5947_v17  ;;  %v2621_v6 = vsub.f32 1.0, %v4828_v47  ;;  %v2651_v15 = vmul.f32 %v2635_v30, %v2619_v9  ;;  %v2657_v31 = vadd.f32 %v2649_v4, %v2609_v58  ;;  %v6093_v4 = vld [vmem:[#allocation4 + $0x56] ss:$8 sm:$0x3] }
 0x6b3   :  { %v2614_v20 = vmul.f32 %v4830_v54, %v5955_v26  ;;  %v2622_v23 = vsub.f32 1.0, %v4830_v54  ;;  %v2652_v48 = vmul.f32 %v2636_v36, %v2620_v0  ;;  %v2658_v44 = vadd.f32 %v2650_v39, %v2610_v14 }
 0x6b4   :  { %v2653_v61 = vmul.f32 %v2637_v37, %v2621_v6  ;;  %v2659_v49 = vadd.f32 %v2651_v15, %v2611_v32  ;;  %vm2663_vm10 = vcmp.ge.f32.partialorder %v2655_v7, %v5357_v5  ;;  %vm2664_vm11 = vcmp.ge.f32.partialorder %v2656_v55, %v5360_v16  ;;  %v6080_v37 = vld [vmem:[#allocation4 + $0x6] ss:$8 sm:$0x3]  ;;  %v6088_v32 = vld [vmem:[#allocation4 + $0x36] ss:$8 sm:$0x3] }
 0x6b5   :  { %v2654_v62 = vmul.f32 %v2638_v59, %v2622_v23  ;;  %v2660_v27 = vadd.f32 %v2652_v48, %v2612_v18  ;;  %vm2665_vm12 = vcmp.ge.f32.partialorder %v2657_v31, %v5381_v12  ;;  %vm2666_vm13 = vcmp.ge.f32.partialorder %v2658_v44, %v5394_v29  ;;  %v6091_v59 = vld [vmem:[#allocation4 + $0x46] ss:$8 sm:$0x3]  ;;  %v6101_v15 = vld [vmem:[#allocation4 + $0x76] ss:$8 sm:$0x3] }
 0x6b6   :  { %v2661_v17 = vadd.f32 %v2653_v61, %v2613_v11  ;;  %vm2667_vm14 = vcmp.ge.f32.partialorder %v2659_v49, %v5406_v46  ;;  %v6032_v26 = vsel %vm2663_vm10, 0.0, %v2655_v7  ;;  %v6036_v3 = vsel %vm2664_vm11, 0.0, %v2656_v55  ;;  %v6097_v55 = vld [vmem:[#allocation4 + $0x66] ss:$8 sm:$0x3] }
 0x6b7   :  { %v2662_v57 = vadd.f32 %v2654_v62, %v2614_v20  ;;  %vm2668_vm15 = vcmp.ge.f32.partialorder %v2660_v27, %v5417_v63  ;;  %v6041_v60 = vsel %vm2665_vm12, 0.0, %v2657_v31  ;;  %v6045_v41 = vsel %vm2666_vm13, 0.0, %v2658_v44 }
 0x6b8   :  { %vm2669_vm1 = vcmp.ge.f32.partialorder %v2661_v17, %v5428_v10  ;;  %v6050_v28 = vsel %vm2667_vm14, 0.0, %v2659_v49  ;;  %v6052_v24 = vsel %vm2668_vm15, 0.0, %v2660_v27  ;;  %v3748_v50 = vsel %vm2663_vm10, 1.0, %v5107_v1 }
 0x6b9   :  { %vm2670_vm2 = vcmp.ge.f32.partialorder %v2662_v57, %v5439_v21  ;;  %v6058_v22 = vsel %vm2669_vm1, 0.0, %v2661_v17  ;;  %v3749_v42 = vsel %vm2664_vm11, 1.0, %v5107_v1  ;;  %v3750_v45 = vsel %vm2665_vm12, 1.0, %v5107_v1  ;;  %2695 = vst [vmem:[#allocation11 + $0x5] sm:$0x1] %v3748_v50 }
 0x6ba   :  { %v6066_v53 = vsel %vm2670_vm2, 0.0, %v2662_v57  ;;  %v3751_v38 = vsel %vm2666_vm13, 1.0, %v5107_v1  ;;  %v3752_v43 = vsel %vm2667_vm14, 1.0, %v5107_v1  ;;  %v3753_v19 = vsel %vm2668_vm15, 1.0, %v5107_v1  ;;  %2696 = vst [vmem:[#allocation11 + $0xd] sm:$0x1] %v3749_v42 }
 0x6bb   :  { %2697 = vst [vmem:[#allocation11 + $0x15] sm:$0x1] %v3750_v45  ;;  %v3754_v52 = vsel %vm2669_vm1, 1.0, %v5107_v1  ;;  %v3755_v56 = vsel %vm2670_vm2, 1.0, %v5107_v1  ;;  %2698 = vst [vmem:[#allocation11 + $0x1d] sm:$0x1] %v3751_v38 }
 0x6bc   :  { %2699 = vst [vmem:[#allocation11 + $0x25] sm:$0x1] %v3752_v43  ;;  %2700 = vst [vmem:[#allocation11 + $0x2d] sm:$0x1] %v3753_v19 }
 0x6bd   :  { %2701 = vst [vmem:[#allocation11 + $0x35] sm:$0x1] %v3754_v52  ;;  %2702 = vst [vmem:[#allocation11 + $0x3d] sm:$0x1] %v3755_v56 }
 0x774   :  { %v2843_v13 = vpop.f32.mrb[6].mxu1 }
 0x775   :  { %v2848_v30 = vcombine.high %v2843_v13, %v2843_v13  ;;  %v2855_v35 = vrot.slane %v2843_v13, %v5290_v34  ;;  %v4168_v33 = vpop.f32.mrb[7].mxu1 }
 0x777   :  { %v2862_v58 = vrot.slane %v2848_v30, %v5290_v34  ;;  %v2863_v8 = vcombine.high %v2855_v35, %v2855_v35  ;;  %v2871_v36 = vrot.slane %v2855_v35, %v5290_v34 }
 0x779   :  { %v2864_v14 = vcombine.high %v2862_v58, %v2862_v58  ;;  %v2878_v2 = vrot.slane %v2862_v58, %v5290_v34  ;;  %v2885_v40 = vrot.slane %v2863_v8, %v5290_v34  ;;  %v2893_v7 = vcombine.high %v2871_v36, %v2871_v36 }
 0x77a   :  { %v2905_v9 = vadd.f32 %v2871_v36, %v6080_v37 }
 0x77b   :  { %v2892_v47 = vrot.slane %v2864_v14, %v5290_v34  ;;  %v2894_v18 = vcombine.high %v2878_v2, %v2878_v2  ;;  %v2895_v0 = vcombine.high %v2885_v40, %v2885_v40  ;;  %v2906_v39 = vadd.f32 %v2885_v40, %v6082_v51 }
 0x77c   :  { %v2907_v54 = vadd.f32 %v2893_v7, %v6086_v25  ;;  %v2909_v11 = vadd.f32 %v2878_v2, %v6091_v59  ;;  %v3756_v6 = vmul.f32 -1.442695, %v2905_v9 }
 0x77d   :  { %v2896_v31 = vcombine.high %v2892_v47, %v2892_v47  ;;  %v2908_v20 = vadd.f32 %v2895_v0, %v6088_v32  ;;  %v2910_v23 = vadd.f32 %v2892_v47, %v6093_v4  ;;  %v2911_v48 = vadd.f32 %v2894_v18, %v6097_v55 }
 0x77e   :  { %4831 = vpow2.f32 %v3756_v6  ;;  %v3757_v44 = vmul.f32 -1.442695, %v2906_v39  ;;  %v3758_v61 = vmul.f32 -1.442695, %v2907_v54  ;;  %v3760_v27 = vmul.f32 -1.442695, %v2909_v11 }
 0x77f   :  { %v2912_v49 = vadd.f32 %v2896_v31, %v6101_v15  ;;  %v3759_v62 = vmul.f32 -1.442695, %v2908_v20  ;;  %v3761_v17 = vmul.f32 -1.442695, %v2910_v23  ;;  %v3762_v57 = vmul.f32 -1.442695, %v2911_v48 }
 0x780   :  { %4833 = vpow2.f32 %v3757_v44 }
 0x781   :  { %4835 = vpow2.f32 %v3758_v61  ;;  %v3763_v50 = vmul.f32 -1.442695, %v2912_v49 }
 0x782   :  { %4837 = vpow2.f32 %v3759_v62 }
 0x783   :  { %4839 = vpow2.f32 %v3760_v27 }
 0x784   :  { %4841 = vpow2.f32 %v3761_v17 }
 0x785   :  { %4843 = vpow2.f32 %v3762_v57 }
 0x786   :  { %4845 = vpow2.f32 %v3763_v50 }
 0x788   :  { %v4832_v42 = vpop.eup %4831 }
 0x789   :  { %v2937_v45 = vadd.f32 1.0, %v4832_v42 }
 0x78a   :  { %v4834_v38 = vpop.eup %4833 }
 0x78b   :  { %v4836_v43 = vpop.eup %4835  ;;  %v2938_v19 = vadd.f32 1.0, %v4834_v38  ;;  %4847 = vrcp.f32 %v2937_v45 }
 0x78c   :  { %v4838_v52 = vpop.eup %4837  ;;  %v2939_v56 = vadd.f32 1.0, %v4836_v43 }
 0x78d   :  { %v4840_v13 = vpop.eup %4839  ;;  %v2940_v30 = vadd.f32 1.0, %v4838_v52  ;;  %4849 = vrcp.f32 %v2938_v19 }
 0x78e   :  { %v4842_v35 = vpop.eup %4841  ;;  %v2941_v33 = vadd.f32 1.0, %v4840_v13  ;;  %4851 = vrcp.f32 %v2939_v56 }
 0x78f   :  { %v4844_v58 = vpop.eup %4843  ;;  %v2942_v8 = vadd.f32 1.0, %v4842_v35  ;;  %4853 = vrcp.f32 %v2940_v30 }
 0x790   :  { %v4846_v36 = vpop.eup %4845  ;;  %v2943_v14 = vadd.f32 1.0, %v4844_v58  ;;  %4855 = vrcp.f32 %v2941_v33 }
 0x791   :  { %v2944_v2 = vadd.f32 1.0, %v4846_v36  ;;  %4857 = vrcp.f32 %v2942_v8 }
 0x792   :  { %4859 = vrcp.f32 %v2943_v14 }
 0x793   :  { %4861 = vrcp.f32 %v2944_v2 }
 0x795   :  { %v4848_v40 = vpop.eup %4847 }
 0x796   :  { %v2961_v7 = vadd.f32 1e-06, %v4848_v40 }
 0x797   :  { %v4850_v9 = vpop.eup %4849 }
 0x798   :  { %v4852_v47 = vpop.eup %4851  ;;  %v2962_v18 = vadd.f32 1e-06, %v4850_v9  ;;  %4863 = vrcp.f32 %v2961_v7  ;;  %v3121_v6 = vcombine.low %v4848_v40, %v4850_v9 }
 0x799   :  { %v4854_v0 = vpop.eup %4853  ;;  %v2963_v39 = vadd.f32 1e-06, %v4852_v47 }
 0x79a   :  { %v4856_v54 = vpop.eup %4855  ;;  %v2964_v11 = vadd.f32 1e-06, %v4854_v0  ;;  %4865 = vrcp.f32 %v2962_v18  ;;  %v3122_v31 = vcombine.low %v4852_v47, %v4854_v0  ;;  %v3131_v50 = vrot.slane %v3121_v6, %v5290_v34 }
 0x79b   :  { %v4858_v20 = vpop.eup %4857  ;;  %v2965_v23 = vadd.f32 1e-06, %v4856_v54  ;;  %4867 = vrcp.f32 %v2963_v39 }
 0x79c   :  { %v4860_v48 = vpop.eup %4859  ;;  %v2966_v44 = vadd.f32 1e-06, %v4858_v20  ;;  %4869 = vrcp.f32 %v2964_v11  ;;  %v3123_v61 = vcombine.low %v4856_v54, %v4858_v20  ;;  %v3138_v49 = vrot.slane %v3122_v31, %v5290_v34 }
 0x79d   :  { %v4862_v62 = vpop.eup %4861  ;;  %v2967_v27 = vadd.f32 1e-06, %v4860_v48  ;;  %4871 = vrcp.f32 %v2965_v23 }
 0x79e   :  { %v2968_v17 = vadd.f32 1e-06, %v4862_v62  ;;  %4873 = vrcp.f32 %v2966_v44  ;;  %v3124_v57 = vcombine.low %v4860_v48, %v4862_v62  ;;  %v3145_v42 = vrot.slane %v3123_v61, %v5290_v34 }
 0x79f   :  { %4875 = vrcp.f32 %v2967_v27  ;;  %v3153_v38 = vcombine.low %v3131_v50, %v3138_v49  ;;  %v3025_v27 = vrot.slane %v6080_v37, 1  ;;  %v3027_v50 = vrot.slane %v6086_v25, 1 }
 0x7a0   :  { %4877 = vrcp.f32 %v2968_v17  ;;  %v3152_v45 = vrot.slane %v3124_v57, %v5290_v34  ;;  %v3026_v57 = vrot.slane %v6082_v51, 1  ;;  %v3030_v37 = vrot.slane %v6093_v4, 1 }
 0x7a1   :  { %v3161_v13 = vrot.slane %v3153_v38, %v5290_v34 }
 0x7a2   :  { %v4864_v43 = vpop.eup %4863  ;;  %v3154_v19 = vcombine.low %v3145_v42, %v3152_v45  ;;  %v3028_v42 = vrot.slane %v6088_v32, 1 }
 0x7a3   :  { %v2977_v52 = vsub.f32 0.0, %v4864_v43 }
 0x7a4   :  { %v4866_v56 = vpop.eup %4865  ;;  %v3168_v30 = vrot.slane %v3154_v19, %v5290_v34  ;;  %v3029_v19 = vrot.slane %v6091_v59, 1  ;;  %v3032_v59 = vrot.slane %v6101_v15, 1 }
 0x7a5   :  { %v4868_v35 = vpop.eup %4867  ;;  %v2978_v33 = vsub.f32 0.0, %v4866_v56  ;;  %v2985_v58 = vmul.f32 1.442695, %v2977_v52 }
 0x7a6   :  { %v4870_v8 = vpop.eup %4869  ;;  %v2979_v36 = vsub.f32 0.0, %v4868_v35  ;;  %v3169_v14 = vcombine.low %v3161_v13, %v3168_v30  ;;  %v3031_v30 = vrot.slane %v6097_v55, 1 }
 0x7a7   :  { %v4872_v2 = vpop.eup %4871  ;;  %v2980_v40 = vsub.f32 0.0, %v4870_v8  ;;  %4879 = vpow2.f32 %v2985_v58  ;;  %v2987_v7 = vmul.f32 1.442695, %v2978_v33 }
 0x7a8   :  { %v4874_v9 = vpop.eup %4873  ;;  %v2981_v47 = vsub.f32 0.0, %v4872_v2  ;;  %v2989_v18 = vmul.f32 1.442695, %v2979_v36  ;;  %4202 = vmatmul.mubr.f32.vlgmr.msra.gmra.mrb[22].mxu0 %v3169_v14 }
 0x7a9   :  { %v4876_v0 = vpop.eup %4875  ;;  %v2982_v39 = vsub.f32 0.0, %v4874_v9  ;;  %4881 = vpow2.f32 %v2987_v7  ;;  %v2991_v54 = vmul.f32 1.442695, %v2980_v40 }
 0x7aa   :  { %v4878_v11 = vpop.eup %4877  ;;  %v2983_v6 = vsub.f32 0.0, %v4876_v0  ;;  %4883 = vpow2.f32 %v2989_v18  ;;  %v2993_v31 = vmul.f32 1.442695, %v2981_v47 }
 0x7ab   :  { %v2984_v20 = vsub.f32 0.0, %v4878_v11  ;;  %4885 = vpow2.f32 %v2991_v54  ;;  %v2995_v23 = vmul.f32 1.442695, %v2982_v39 }
 0x7ac   :  { %4887 = vpow2.f32 %v2993_v31  ;;  %v2997_v48 = vmul.f32 1.442695, %v2983_v6 }
 0x7ad   :  { %4889 = vpow2.f32 %v2995_v23  ;;  %v2999_v44 = vmul.f32 1.442695, %v2984_v20 }
 0x7ae   :  { %4891 = vpow2.f32 %v2997_v48 }
 0x7af   :  { %4893 = vpow2.f32 %v2999_v44 }
 0x7b1   :  { %v4880_v61 = vpop.eup %4879 }
 0x7b2   :  { %v3001_v49 = vmul.f32 %v4880_v61, %v6032_v26  ;;  %v3009_v62 = vsub.f32 1.0, %v4880_v61 }
 0x7b3   :  { %v4882_v17 = vpop.eup %4881 }
 0x7b4   :  { %v4884_v45 = vpop.eup %4883  ;;  %v3002_v38 = vmul.f32 %v4882_v17, %v6036_v3  ;;  %v3010_v43 = vsub.f32 1.0, %v4882_v17  ;;  %v3041_v52 = vmul.f32 %v3025_v27, %v3009_v62 }
 0x7b5   :  { %v4886_v56 = vpop.eup %4885  ;;  %v3003_v26 = vmul.f32 %v4884_v45, %v6041_v60  ;;  %v3011_v13 = vsub.f32 1.0, %v4884_v45 }
 0x7b6   :  { %v4888_v51 = vpop.eup %4887  ;;  %v3004_v25 = vmul.f32 %v4886_v56, %v6045_v41  ;;  %v3012_v35 = vsub.f32 1.0, %v4886_v56  ;;  %v3042_v32 = vmul.f32 %v3026_v57, %v3010_v43  ;;  %v3049_v33 = vadd.f32 %v3041_v52, %v3001_v49 }
 0x7b7   :  { %v4890_v58 = vpop.eup %4889  ;;  %v3005_v3 = vmul.f32 %v4888_v51, %v6050_v28  ;;  %v3013_v8 = vsub.f32 1.0, %v4888_v51  ;;  %v3043_v36 = vmul.f32 %v3027_v50, %v3011_v13  ;;  %v6186_v51 = vld [vmem:[#allocation4 + $0x17] ss:$8 sm:$0x3] }
 0x7b8   :  { %v4892_v14 = vpop.eup %4891  ;;  %v3006_v60 = vmul.f32 %v4890_v58, %v6052_v24  ;;  %v3014_v2 = vsub.f32 1.0, %v4890_v58  ;;  %v3044_v4 = vmul.f32 %v3028_v42, %v3012_v35  ;;  %v3050_v40 = vadd.f32 %v3042_v32, %v3002_v38  ;;  %v6190_v58 = vld [vmem:[#allocation4 + $0x27] ss:$8 sm:$0x3] }
 0x7b9   :  { %v4894_v55 = vpop.eup %4893  ;;  %v3007_v7 = vmul.f32 %v4892_v14, %v6058_v22  ;;  %v3015_v41 = vsub.f32 1.0, %v4892_v14  ;;  %v3045_v9 = vmul.f32 %v3029_v19, %v3013_v8  ;;  %v3051_v47 = vadd.f32 %v3043_v36, %v3003_v26  ;;  %v6197_v36 = vld [vmem:[#allocation4 + $0x57] ss:$8 sm:$0x3] }
 0x7ba   :  { %v3008_v18 = vmul.f32 %v4894_v55, %v6066_v53  ;;  %v3016_v0 = vsub.f32 1.0, %v4894_v55  ;;  %v3046_v28 = vmul.f32 %v3030_v37, %v3014_v2  ;;  %v3052_v39 = vadd.f32 %v3044_v4, %v3004_v25 }
 0x7bb   :  { %v3047_v54 = vmul.f32 %v3031_v30, %v3015_v41  ;;  %v3053_v15 = vadd.f32 %v3045_v9, %v3005_v3  ;;  %vm3057_vm0 = vcmp.ge.f32.partialorder %v3049_v33, %v5357_v5  ;;  %vm3058_vm3 = vcmp.ge.f32.partialorder %v3050_v40, %v5360_v16  ;;  %v6184_v30 = vld [vmem:[#allocation4 + $0x7] ss:$8 sm:$0x3]  ;;  %v6192_v3 = vld [vmem:[#allocation4 + $0x37] ss:$8 sm:$0x3] }
 0x7bc   :  { %v3048_v24 = vmul.f32 %v3032_v59, %v3016_v0  ;;  %v3054_v11 = vadd.f32 %v3046_v28, %v3006_v60  ;;  %vm3059_vm4 = vcmp.ge.f32.partialorder %v3051_v47, %v5381_v12  ;;  %vm3060_vm5 = vcmp.ge.f32.partialorder %v3052_v39, %v5394_v29  ;;  %v6195_v59 = vld [vmem:[#allocation4 + $0x47] ss:$8 sm:$0x3]  ;;  %v6205_v9 = vld [vmem:[#allocation4 + $0x77] ss:$8 sm:$0x3] }
 0x7bd   :  { %v3055_v22 = vadd.f32 %v3047_v54, %v3007_v7  ;;  %vm3061_vm6 = vcmp.ge.f32.partialorder %v3053_v15, %v5406_v46  ;;  %v6136_v53 = vsel %vm3057_vm0, 0.0, %v3049_v33  ;;  %v6140_v6 = vsel %vm3058_vm3, 0.0, %v3050_v40  ;;  %v6201_v40 = vld [vmem:[#allocation4 + $0x67] ss:$8 sm:$0x3] }
 0x7be   :  { %v3056_v31 = vadd.f32 %v3048_v24, %v3008_v18  ;;  %vm3062_vm7 = vcmp.ge.f32.partialorder %v3054_v11, %v5417_v63  ;;  %v6145_v20 = vsel %vm3059_vm4, 0.0, %v3051_v47  ;;  %v6149_v23 = vsel %vm3060_vm5, 0.0, %v3052_v39 }
 0x7bf   :  { %vm3063_vm8 = vcmp.ge.f32.partialorder %v3055_v22, %v5428_v10  ;;  %v6154_v48 = vsel %vm3061_vm6, 0.0, %v3053_v15  ;;  %v6156_v44 = vsel %vm3062_vm7, 0.0, %v3054_v11  ;;  %v3764_v61 = vsel %vm3057_vm0, 1.0, %v5107_v1 }
 0x7c0   :  { %vm3064_vm9 = vcmp.ge.f32.partialorder %v3056_v31, %v5439_v21  ;;  %v6162_v49 = vsel %vm3063_vm8, 0.0, %v3055_v22  ;;  %v3765_v62 = vsel %vm3058_vm3, 1.0, %v5107_v1  ;;  %v3766_v27 = vsel %vm3059_vm4, 1.0, %v5107_v1  ;;  %3089 = vst [vmem:[#allocation11 + $0x6] sm:$0x1] %v3764_v61 }
 0x7c1   :  { %v6170_v17 = vsel %vm3064_vm9, 0.0, %v3056_v31  ;;  %v3767_v57 = vsel %vm3060_vm5, 1.0, %v5107_v1  ;;  %v3768_v50 = vsel %vm3061_vm6, 1.0, %v5107_v1  ;;  %v3769_v42 = vsel %vm3062_vm7, 1.0, %v5107_v1  ;;  %3090 = vst [vmem:[#allocation11 + $0xe] sm:$0x1] %v3765_v62 }
 0x7c2   :  { %3091 = vst [vmem:[#allocation11 + $0x16] sm:$0x1] %v3766_v27  ;;  %v3770_v45 = vsel %vm3063_vm8, 1.0, %v5107_v1  ;;  %v3771_v38 = vsel %vm3064_vm9, 1.0, %v5107_v1  ;;  %3092 = vst [vmem:[#allocation11 + $0x1e] sm:$0x1] %v3767_v57 }
 0x7c3   :  { %3093 = vst [vmem:[#allocation11 + $0x26] sm:$0x1] %v3768_v50  ;;  %3094 = vst [vmem:[#allocation11 + $0x2e] sm:$0x1] %v3769_v42 }
 0x7c4   :  { %3095 = vst [vmem:[#allocation11 + $0x36] sm:$0x1] %v3770_v45  ;;  %3096 = vst [vmem:[#allocation11 + $0x3e] sm:$0x1] %v3771_v38 }
 0x87b   :  { %v3237_v43 = vpop.f32.mrb[22].mxu0 }
 0x87c   :  { %v3242_v19 = vcombine.high %v3237_v43, %v3237_v43  ;;  %v3249_v52 = vrot.slane %v3237_v43, %v5290_v34  ;;  %v4203_v56 = vpop.f32.mrb[23].mxu0 }
 0x87e   :  { %v3256_v26 = vrot.slane %v3242_v19, %v5290_v34  ;;  %v3257_v13 = vcombine.high %v3249_v52, %v3249_v52  ;;  %v3265_v37 = vrot.slane %v3249_v52, %v5290_v34 }
 0x880   :  { %v3258_v25 = vcombine.high %v3256_v26, %v3256_v26  ;;  %v3272_v35 = vrot.slane %v3256_v26, %v5290_v34  ;;  %v3279_v32 = vrot.slane %v3257_v13, %v5290_v34  ;;  %v3287_v33 = vcombine.high %v3265_v37, %v3265_v37 }
 0x881   :  { %v3299_v8 = vadd.f32 %v3265_v37, %v6184_v30 }
 0x882   :  { %v3286_v14 = vrot.slane %v3258_v25, %v5290_v34  ;;  %v3288_v60 = vcombine.high %v3272_v35, %v3272_v35  ;;  %v3289_v2 = vcombine.high %v3279_v32, %v3279_v32  ;;  %v3300_v4 = vadd.f32 %v3279_v32, %v6186_v51 }
 0x883   :  { %v3301_v55 = vadd.f32 %v3287_v33, %v6190_v58  ;;  %v3303_v7 = vadd.f32 %v3272_v35, %v6195_v59  ;;  %v3772_v41 = vmul.f32 -1.442695, %v3299_v8 }
 0x884   :  { %v3290_v47 = vcombine.high %v3286_v14, %v3286_v14  ;;  %v3302_v18 = vadd.f32 %v3289_v2, %v6192_v3  ;;  %v3304_v0 = vadd.f32 %v3286_v14, %v6197_v36  ;;  %v3305_v28 = vadd.f32 %v3288_v60, %v6201_v40 }
 0x885   :  { %4895 = vpow2.f32 %v3772_v41  ;;  %v3773_v39 = vmul.f32 -1.442695, %v3300_v4  ;;  %v3774_v54 = vmul.f32 -1.442695, %v3301_v55  ;;  %v3776_v11 = vmul.f32 -1.442695, %v3303_v7 }
 0x886   :  { %v3306_v15 = vadd.f32 %v3290_v47, %v6205_v9  ;;  %v3775_v24 = vmul.f32 -1.442695, %v3302_v18  ;;  %v3777_v22 = vmul.f32 -1.442695, %v3304_v0  ;;  %v3778_v31 = vmul.f32 -1.442695, %v3305_v28 }
 0x887   :  { %4897 = vpow2.f32 %v3773_v39 }
 0x888   :  { %4899 = vpow2.f32 %v3774_v54  ;;  %v3779_v61 = vmul.f32 -1.442695, %v3306_v15 }
 0x889   :  { %4901 = vpow2.f32 %v3775_v24 }
 0x88a   :  { %4903 = vpow2.f32 %v3776_v11 }
 0x88b   :  { %4905 = vpow2.f32 %v3777_v22 }
 0x88c   :  { %4907 = vpow2.f32 %v3778_v31 }
 0x88d   :  { %4909 = vpow2.f32 %v3779_v61 }
 0x88f   :  { %v4896_v62 = vpop.eup %4895 }
 0x890   :  { %v3331_v27 = vadd.f32 1.0, %v4896_v62 }
 0x891   :  { %v4898_v57 = vpop.eup %4897 }
 0x892   :  { %v4900_v50 = vpop.eup %4899  ;;  %v3332_v42 = vadd.f32 1.0, %v4898_v57  ;;  %4911 = vrcp.f32 %v3331_v27 }
 0x893   :  { %v4902_v45 = vpop.eup %4901  ;;  %v3333_v38 = vadd.f32 1.0, %v4900_v50 }
 0x894   :  { %v4904_v43 = vpop.eup %4903  ;;  %v3334_v19 = vadd.f32 1.0, %v4902_v45  ;;  %4913 = vrcp.f32 %v3332_v42 }
 0x895   :  { %v4906_v52 = vpop.eup %4905  ;;  %v3335_v56 = vadd.f32 1.0, %v4904_v43  ;;  %4915 = vrcp.f32 %v3333_v38 }
 0x896   :  { %v4908_v26 = vpop.eup %4907  ;;  %v3336_v13 = vadd.f32 1.0, %v4906_v52  ;;  %4917 = vrcp.f32 %v3334_v19 }
 0x897   :  { %v4910_v37 = vpop.eup %4909  ;;  %v3337_v25 = vadd.f32 1.0, %v4908_v26  ;;  %4919 = vrcp.f32 %v3335_v56 }
 0x898   :  { %v3338_v35 = vadd.f32 1.0, %v4910_v37  ;;  %4921 = vrcp.f32 %v3336_v13 }
 0x899   :  { %4923 = vrcp.f32 %v3337_v25 }
 0x89a   :  { %4925 = vrcp.f32 %v3338_v35 }
 0x89c   :  { %v4912_v32 = vpop.eup %4911 }
 0x89d   :  { %v3355_v33 = vadd.f32 1e-06, %v4912_v32 }
 0x89e   :  { %v4914_v8 = vpop.eup %4913 }
 0x89f   :  { %v4916_v14 = vpop.eup %4915  ;;  %v3356_v60 = vadd.f32 1e-06, %v4914_v8  ;;  %4927 = vrcp.f32 %v3355_v33  ;;  %v3558_v41 = vcombine.low %v4912_v32, %v4914_v8 }
 0x8a0   :  { %v4918_v2 = vpop.eup %4917  ;;  %v3357_v4 = vadd.f32 1e-06, %v4916_v14 }
 0x8a1   :  { %v4920_v55 = vpop.eup %4919  ;;  %v3358_v7 = vadd.f32 1e-06, %v4918_v2  ;;  %4929 = vrcp.f32 %v3356_v60  ;;  %v3559_v47 = vcombine.low %v4916_v14, %v4918_v2  ;;  %v3568_v61 = vrot.slane %v3558_v41, %v5290_v34 }
 0x8a2   :  { %v4922_v18 = vpop.eup %4921  ;;  %v3359_v0 = vadd.f32 1e-06, %v4920_v55  ;;  %4931 = vrcp.f32 %v3357_v4 }
 0x8a3   :  { %v4924_v28 = vpop.eup %4923  ;;  %v3360_v39 = vadd.f32 1e-06, %v4922_v18  ;;  %4933 = vrcp.f32 %v3358_v7  ;;  %v3560_v54 = vcombine.low %v4920_v55, %v4922_v18  ;;  %v3575_v15 = vrot.slane %v3559_v47, %v5290_v34 }
 0x8a4   :  { %v4926_v24 = vpop.eup %4925  ;;  %v3361_v11 = vadd.f32 1e-06, %v4924_v28  ;;  %4935 = vrcp.f32 %v3359_v0 }
 0x8a5   :  { %v3362_v22 = vadd.f32 1e-06, %v4926_v24  ;;  %4937 = vrcp.f32 %v3360_v39  ;;  %v3561_v31 = vcombine.low %v4924_v28, %v4926_v24  ;;  %v3582_v62 = vrot.slane %v3560_v54, %v5290_v34 }
 0x8a6   :  { %4939 = vrcp.f32 %v3361_v11  ;;  %v3590_v57 = vcombine.low %v3568_v61, %v3575_v15 }
 0x8a7   :  { %4941 = vrcp.f32 %v3362_v22  ;;  %v3589_v27 = vrot.slane %v3561_v31, %v5290_v34 }
 0x8a8   :  { %v3598_v43 = vrot.slane %v3590_v57, %v5290_v34 }
 0x8a9   :  { %v4928_v50 = vpop.eup %4927  ;;  %v3591_v42 = vcombine.low %v3582_v62, %v3589_v27 }
 0x8aa   :  { %v3371_v45 = vsub.f32 0.0, %v4928_v50 }
 0x8ab   :  { %v4930_v38 = vpop.eup %4929  ;;  %v3605_v19 = vrot.slane %v3591_v42, %v5290_v34 }
 0x8ac   :  { %v4932_v52 = vpop.eup %4931  ;;  %v3372_v56 = vsub.f32 0.0, %v4930_v38  ;;  %v3379_v26 = vmul.f32 1.442695, %v3371_v45 }
 0x8ad   :  { %v4934_v13 = vpop.eup %4933  ;;  %v3373_v37 = vsub.f32 0.0, %v4932_v52  ;;  %v3606_v25 = vcombine.low %v3598_v43, %v3605_v19 }
 0x8ae   :  { %v4936_v35 = vpop.eup %4935  ;;  %v3374_v32 = vsub.f32 0.0, %v4934_v13  ;;  %4943 = vpow2.f32 %v3379_v26  ;;  %v3381_v33 = vmul.f32 1.442695, %v3372_v56 }
 0x8af   :  { %v4938_v8 = vpop.eup %4937  ;;  %v3375_v14 = vsub.f32 0.0, %v4936_v35  ;;  %v3383_v60 = vmul.f32 1.442695, %v3373_v37  ;;  %3612 = vst [vmem:[#allocation12] sm:$0xff] %v3606_v25 }
 0x8b0   :  { %v4940_v2 = vpop.eup %4939  ;;  %v3376_v4 = vsub.f32 0.0, %v4938_v8  ;;  %4945 = vpow2.f32 %v3381_v33  ;;  %v3385_v55 = vmul.f32 1.442695, %v3374_v32 }
 0x8b1   :  { %5036 = shalt.err (!%p5033_p0)
}
 0x8b2   :  { %s5037_s22 = scalar_lea.hbm %s6324_s6, 128 }
 0x8b3   :  { %p5038_p1 = scmp.ne.s32.totalorder %s6324_s6, %s5037_s22  ;;  %p5041_p2 = scmp.lt.u32.totalorder %s5037_s22, %s6324_s6 }
 0x8b5   :  { %p5043_p3 = pnand %p5041_p2, %p5038_p1 }
 0x8b7   :  { %5046 = shalt.err (!%p5043_p3)
}
 0x8b8   :  { %3635 = dma.vmem_to_hbm [thread:$0]  %s3633_s18, 128, %s6324_s6, [#allocation13]   ;;  %v4942_v7 = vpop.eup %4941  ;;  %v3377_v41 = vsub.f32 0.0, %v4940_v2  ;;  %4947 = vpow2.f32 %v3383_v60  ;;  %v3387_v47 = vmul.f32 1.442695, %v3375_v14  ;;  %v3419_v11 = vrot.slane %v6184_v30, 1 }
 0x8b9   :  { %v3378_v18 = vsub.f32 0.0, %v4942_v7  ;;  %4949 = vpow2.f32 %v3385_v55  ;;  %v3389_v0 = vmul.f32 1.442695, %v3376_v4  ;;  %v4944_v54 = vpop.eup %4943  ;;  %v3420_v31 = vrot.slane %v6186_v51, 1  ;;  %s5112_s6 = smov [#allocation11]  }
 0x8ba   :  { %4951 = vpow2.f32 %v3387_v47  ;;  %v3391_v28 = vmul.f32 1.442695, %v3377_v41  ;;  %v3395_v15 = vmul.f32 %v4944_v54, %v6136_v53  ;;  %v3403_v24 = vsub.f32 1.0, %v4944_v54  ;;  %v4946_v22 = vpop.eup %4945  ;;  %s3619_s30 = sshll.u32 %s5112_s6, 4  ;;  %s3620_s30 = int_to_ptr.vmem [resolvable:$true] %s3619_s30 }
 0x8bb   :  { %4953 = vpow2.f32 %v3389_v0  ;;  %v3393_v39 = vmul.f32 1.442695, %v3378_v18  ;;  %v3421_v61 = vrot.slane %v6190_v58, 1  ;;  %v3422_v62 = vrot.slane %v6192_v3, 1  ;;  %s5047_s8 = scalar_lea.vmem %s3620_s30, 1024  ;;  %p5052_p5 = scmp.lt.s32.totalorder %s3620_s30, %s3620_s30 }
 0x8bc   :  { %4955 = vpow2.f32 %v3391_v28  ;;  %v3396_v57 = vmul.f32 %v4946_v22, %v6140_v6  ;;  %v3404_v50 = vsub.f32 1.0, %v4946_v22  ;;  %v3423_v42 = vrot.slane %v6195_v59, 1  ;;  %p5048_p4 = scmp.ne.s32.totalorder %s3620_s30, %s5047_s8  ;;  %p5053_p6 = scmp.lt.s32.totalorder %s5047_s8, %s5047_s8 }
 0x8bd   :  { %4957 = vpow2.f32 %v3393_v39  ;;  %v3435_v45 = vmul.f32 %v3419_v11, %v3403_v24  ;;  %v3424_v30 = vrot.slane %v6197_v36, 1  ;;  %v3425_v19 = vrot.slane %v6201_v40, 1 }
 0x8be   :  { %v3436_v3 = vmul.f32 %v3420_v31, %v3404_v50  ;;  %v3426_v59 = vrot.slane %v6205_v9, 1  ;;  %p5054_p7 = por %p5053_p6, %p5052_p5 }
 0x8bf   :  { %v3443_v56 = vadd.f32 %v3435_v45, %v3395_v15 }
 0x8c0   :  { %v3444_v32 = vadd.f32 %v3436_v3, %v3396_v57  ;;  %p5055_p8 = pnand %p5054_p7, %p5048_p4 }
 0x8c1   :  { %vm3451_vm10 = vcmp.ge.f32.partialorder %v3443_v56, %v5357_v5 }
 0x8c2   :  { %v4948_v27 = vpop.eup %4947  ;;  %vm3452_vm11 = vcmp.ge.f32.partialorder %v3444_v32, %v5360_v16  ;;  %v3459_v41 = vsel %vm3451_vm10, 0.0, %v3443_v56 }
 0x8c3   :  { %v4950_v38 = vpop.eup %4949  ;;  %v3397_v53 = vmul.f32 %v4948_v27, %v6145_v20  ;;  %v3405_v43 = vsub.f32 1.0, %v4948_v27  ;;  %v3781_v5 = vsel %vm3452_vm11, 1.0, %v5107_v1  ;;  %v3460_v15 = vsel %vm3452_vm11, 0.0, %v3444_v32 }
 0x8c4   :  { %v4952_v51 = vpop.eup %4951  ;;  %v3398_v58 = vmul.f32 %v4950_v38, %v6149_v23  ;;  %v3406_v52 = vsub.f32 1.0, %v4950_v38  ;;  %3484 = vst [vmem:[#allocation11 + $0xf] sm:$0x1] %v3781_v5 }
 0x8c5   :  { %v4954_v26 = vpop.eup %4953  ;;  %v3399_v6 = vmul.f32 %v4952_v51, %v6154_v48  ;;  %v3407_v13 = vsub.f32 1.0, %v4952_v51  ;;  %v3437_v37 = vmul.f32 %v3421_v61, %v3405_v43 }
 0x8c6   :  { %v4956_v25 = vpop.eup %4955  ;;  %v3400_v20 = vmul.f32 %v4954_v26, %v6156_v44  ;;  %v3408_v35 = vsub.f32 1.0, %v4954_v26  ;;  %v3438_v36 = vmul.f32 %v3422_v62, %v3406_v52  ;;  %v3499_v62 = vcombine.low %v3459_v41, %v3460_v15 }
 0x8c7   :  { %v4958_v40 = vpop.eup %4957  ;;  %v3401_v33 = vmul.f32 %v4956_v25, %v6162_v49  ;;  %v3409_v23 = vsub.f32 1.0, %v4956_v25  ;;  %v3439_v8 = vmul.f32 %v3423_v42, %v3407_v13  ;;  %v3445_v14 = vadd.f32 %v3437_v37, %v3397_v53 }
 0x8c8   :  { %v3402_v60 = vmul.f32 %v4958_v40, %v6170_v17  ;;  %v3410_v2 = vsub.f32 1.0, %v4958_v40  ;;  %v3440_v48 = vmul.f32 %v3424_v30, %v3408_v35  ;;  %v3446_v4 = vadd.f32 %v3438_v36, %v3398_v58 }
 0x8c9   :  { %v3441_v55 = vmul.f32 %v3425_v19, %v3409_v23  ;;  %v3447_v9 = vadd.f32 %v3439_v8, %v3399_v6  ;;  %vm3453_vm12 = vcmp.ge.f32.partialorder %v3445_v14, %v5381_v12  ;;  %v3780_v17 = vsel %vm3451_vm10, 1.0, %v5107_v1 }
 0x8ca   :  { %v3442_v44 = vmul.f32 %v3426_v59, %v3410_v2  ;;  %v3448_v7 = vadd.f32 %v3440_v48, %v3400_v20  ;;  %vm3454_vm13 = vcmp.ge.f32.partialorder %v3446_v4, %v5394_v29  ;;  %v3782_v18 = vsel %vm3453_vm12, 1.0, %v5107_v1  ;;  %3483 = vst [vmem:[#allocation11 + $0x7] sm:$0x1] %v3780_v17 }
 0x8cb   :  { %v3449_v49 = vadd.f32 %v3441_v55, %v3401_v33  ;;  %vm3455_vm14 = vcmp.ge.f32.partialorder %v3447_v9, %v5406_v46  ;;  %v3783_v0 = vsel %vm3454_vm13, 1.0, %v5107_v1  ;;  %3485 = vst [vmem:[#allocation11 + $0x17] sm:$0x1] %v3782_v18  ;;  %v3461_v24 = vsel %vm3453_vm12, 0.0, %v3445_v14 }
 0x8cc   :  { %v3450_v47 = vadd.f32 %v3442_v44, %v3402_v60  ;;  %vm3456_vm15 = vcmp.ge.f32.partialorder %v3448_v7, %v5417_v63  ;;  %v3784_v28 = vsel %vm3455_vm14, 1.0, %v5107_v1  ;;  %3486 = vst [vmem:[#allocation11 + $0x1f] sm:$0x1] %v3783_v0  ;;  %v3463_v22 = vsel %vm3455_vm14, 0.0, %v3447_v9 }
 0x8cd   :  { %vm3457_vm1 = vcmp.ge.f32.partialorder %v3449_v49, %v5428_v10  ;;  %v3785_v39 = vsel %vm3456_vm15, 1.0, %v5107_v1  ;;  %3487 = vst [vmem:[#allocation11 + $0x27] sm:$0x1] %v3784_v28  ;;  %v3464_v31 = vsel %vm3456_vm15, 0.0, %v3448_v7 }
 0x8ce   :  { %vm3458_vm2 = vcmp.ge.f32.partialorder %v3450_v47, %v5439_v21  ;;  %v3786_v54 = vsel %vm3457_vm1, 1.0, %v5107_v1  ;;  %3488 = vst [vmem:[#allocation11 + $0x2f] sm:$0x1] %v3785_v39  ;;  %v3462_v21 = vsel %vm3454_vm13, 0.0, %v3446_v4  ;;  %v3465_v16 = vsel %vm3457_vm1, 0.0, %v3449_v49 }
 0x8cf   :  { %v3787_v11 = vsel %vm3458_vm2, 1.0, %v5107_v1  ;;  %3489 = vst [vmem:[#allocation11 + $0x37] sm:$0x1] %v3786_v54  ;;  %v3466_v61 = vsel %vm3458_vm2, 0.0, %v3450_v47  ;;  %v3500_v12 = vcombine.low %v3461_v24, %v3462_v21 }
 0x8d0   :  { %3490 = vst [vmem:[#allocation11 + $0x3f] sm:$0x1] %v3787_v11 }
 0x8d1   :  { %5058 = shalt.err (!%p5055_p8)
}
 0x8d2   :  { %s5059_s11 = scalar_lea.hbm %s6323_s5, 1024 }
 0x8d3   :  { %p5060_p9 = scmp.ne.s32.totalorder %s6323_s5, %s5059_s11  ;;  %p5063_p10 = scmp.lt.u32.totalorder %s5059_s11, %s6323_s5 }
 0x8d5   :  { %p5065_p11 = pnand %p5063_p10, %p5060_p9 }
 0x8d7   :  { %5068 = shalt.err (!%p5065_p11)
}
 0x8d8   :  { %3625 = dma.vmem_to_hbm [thread:$0]  %s3620_s30, 1024, %s6323_s5, [#allocation7], %s5103_s1, %s5103_s1, %s5104_s25   ;;  %v3501_v1 = vcombine.low %v3463_v22, %v3464_v31  ;;  %v3502_v29 = vcombine.low %v3465_v16, %v3466_v61  ;;  %v3509_v46 = vrot.slane %v3499_v62, %v5290_v34  ;;  %v3516_v63 = vrot.slane %v3500_v12, %v5290_v34 }
 0x8d9   :  { %s5113_s16 = smov [#allocation14]  }
 0x8da   :  { %v3523_v10 = vrot.slane %v3501_v1, %v5290_v34  ;;  %v3530_v27 = vrot.slane %v3502_v29, %v5290_v34  ;;  %v3531_v57 = vcombine.low %v3509_v46, %v3516_v63  ;;  %s3642_s3 = sshll.u32 %s5113_s16, 4  ;;  %s3643_s3 = int_to_ptr.vmem [resolvable:$true] %s3642_s3 }
 0x8db   :  { %s5069_s5 = scalar_lea.vmem %s3643_s3, 128  ;;  %p5074_p13 = scmp.lt.s32.totalorder %s3643_s3, %s3643_s3 }
 0x8dc   :  { %v3532_v50 = vcombine.low %v3523_v10, %v3530_v27  ;;  %v3539_v42 = vrot.slane %v3531_v57, %v5290_v34  ;;  %p5070_p12 = scmp.ne.s32.totalorder %s3643_s3, %s5069_s5  ;;  %p5075_p0 = scmp.lt.s32.totalorder %s5069_s5, %s5069_s5 }
 0x8de   :  { %v3546_v45 = vrot.slane %v3532_v50, %v5290_v34  ;;  %p5076_p1 = por %p5075_p0, %p5074_p13 }
 0x8e0   :  { %v3547_v38 = vcombine.low %v3539_v42, %v3546_v45  ;;  %p5077_p2 = pnand %p5076_p1, %p5070_p12 }
 0x8e2   :  { %3613 = vst [vmem:[#allocation14] sm:$0xff] %v3547_v38 }
 0x8e3   :  { %5080 = shalt.err (!%p5077_p2)
}
 0x8e4   :  { %s5081_s17 = scalar_lea.hbm %s6325_s7, 128 }
 0x8e5   :  { %p5082_p3 = scmp.ne.s32.totalorder %s6325_s7, %s5081_s17  ;;  %p5085_p4 = scmp.lt.u32.totalorder %s5081_s17, %s6325_s7 }
 0x8e7   :  { %p5087_p5 = pnand %p5085_p4, %p5082_p3 }
 0x8e9   :  { %5090 = shalt.err (!%p5087_p5)
}
 0x8ea   :  { %3645 = dma.vmem_to_hbm [thread:$0]  %s3643_s3, 128, %s6325_s7, [#allocation13]  }
 0x8eb   :  { %5095 = dma.done.wait [#allocation7], 1024  }
 0x8ec   :  { %5096 = vsyncadd [#allocation7], 4294966272 }
 0x8ed   :  { %5097 = dma.done.wait [#allocation13], 256  }
 0x8ee   :  { %5098 = vsyncadd [#allocation13], 4294967040 }
 0x8ef   :  { %3655 = vsyncpa [#allocation6], 1 }
 0x8f0   :  { %3656 = vsyncpa [#allocation9], 1 }
 0x8f1   :  { %3657 = vsyncpa [#allocation7], 1 }
 0x8f2   :  { %3658 = vsyncpa [#allocation13], 1 }

</bundles_post_ra>
